<compile_context>
chip_gen: v5e
topology: v5e:2x2
jax: 0.10.0
libtpu: 0.0.40
codegen_flags: <defaults>
</compile_context>

<pallas_src>
import functools

import numpy as np

import jax
import jax.numpy as jnp
from jax.experimental import pallas as pl
from jax.experimental.pallas import tpu as pltpu


# ----------------------- in-kernel exact GELU (erf) --------------------------
# Rational-polynomial erf (XLA's f32 approximation) so nn.GELU() lowers to
# VPU mul/add plus one EUP reciprocal inside the kernel.
_ERF_ALPHA = (2.2905065861350646e-04, 3.4082910107109506e-03,
              5.0955695062380861e-02, 1.8520832239976145e-01,
              1.1283791435190840e+00)
_ERF_BETA = (-1.1791602954361697e-07, 2.3547966471313185e-05,
             1.0179625278914885e-03, 1.4070470171167667e-02,
             1.1098505178285362e-01, 4.9746925110067538e-01,
             1.0000000000000000e+00)


def _gelu(x):  # exact (erf) GELU — matches nn.GELU() default
    z = jnp.clip(x * 0.7071067811865476, -3.832506856900711, 3.832506856900711)
    z2 = z * z
    p = _ERF_ALPHA[0]
    for c in _ERF_ALPHA[1:]:
        p = p * z2 + c
    q = _ERF_BETA[0]
    for c in _ERF_BETA[1:]:
        q = q * z2 + c
    erf = (z * p) * pl.reciprocal(q, approx=True)   # divide -> EUP slot
    return 0.5 * x * (1.0 + erf)


# ------------------------------ fused kernel ---------------------------------

def _decoder_kernel(x_ref, skip_ref, w4_ref, b4_ref, w1_ref, b1_ref,
                    w2_ref, b2_ref, padup_ref, padsk_ref, repad_ref, mask_ref,
                    o_ref,
                    ych_ref, p1_ref, p2_ref, s1_ref, s2_ref,
                    *, Cout, Cin1, Hs, Ws, H, W, Wp, Lo, Lp):
    """One batch element per grid step: ConvT+IN+GELU -> concat -> 2x(conv+IN+GELU).

    x_ref     (1, Cin, Hs*Ws)  f32   low-res input
    skip_ref  (1, Cout, H*W)   f32   skip connection (flattened H*W)
    w4_ref    (4*Cout, Cin)    bf16  ConvT weights, row = (2*dh+dw)*Cout + co
    w1_ref    (Cout, 9*Cin1)   bf16  conv1 weights, col = (kh*3+kw)*Cin1 + cin
    w2_ref    (Cout, 9*Cout)   bf16  conv2 weights
    b*_ref    (Cout, 1)        f32   biases
    padup_ref (4*Hs*Ws, Lp)    bf16  0/1 gather: sub-pixel interleave + replicate pad
    padsk_ref (H*W, Lp)        bf16  0/1 gather: replicate pad of the skip image
    repad_ref (Lo, Lp)         bf16  0/1 gather: re-pad conv1 output for conv2
    mask_ref  (1, Lo)          f32   1.0 on valid columns (c < W) of the H*Wp layout
    o_ref     (1, Cout, H, W)  f32   decoder output (NCHW)
    scratch: ych(Cout,4HsWs)f32, p1(Cin1,Lp)bf16, p2(Cout,Lp)bf16,
             s1(9*Cin1,Lo)bf16, s2(9*Cout,Lo)bf16
    """
    f32 = jnp.float32
    HsWs = Hs * Ws
    inv_n = 1.0 / float(H * W)
    eps = 1e-5

    # ---- Stage 1: ConvTranspose2d(k=2, s=2) + bias + InstanceNorm + GELU ----
    xb = x_ref[0].astype(jnp.bfloat16)                                 # (Cin, HsWs)
    y4 = jnp.dot(w4_ref[...], xb, preferred_element_type=f32)          # (4*Cout, HsWs)
    # regroup (d, co) rows -> per-channel (Cout, 4*HsWs) so IN stats are per-row
    for d in range(4):
        ych_ref[:, d * HsWs:(d + 1) * HsWs] = y4[d * Cout:(d + 1) * Cout, :]
    y = ych_ref[...] + b4_ref[...]                                     # (Cout, 4*HsWs)
    mean = jnp.sum(y, axis=-1, keepdims=True) * inv_n
    cen = y - mean
    var = jnp.sum(cen * cen, axis=-1, keepdims=True) * inv_n
    g_up = _gelu(cen * jax.lax.rsqrt(var + eps))                       # f32, O(1)
    # sub-pixel interleave + replicate padding via constant 0/1 gather matmul
    up_pad = jnp.dot(g_up.astype(jnp.bfloat16), padup_ref[...],
                     preferred_element_type=f32)                       # (Cout, Lp)
    p1_ref[0:Cout, :] = up_pad.astype(jnp.bfloat16)

    # skip channels: replicate padding via gather matmul, lower half of P1
    sk = skip_ref[0].astype(jnp.bfloat16)                              # (Cout, H*W)
    sk_pad = jnp.dot(sk, padsk_ref[...], preferred_element_type=f32)   # (Cout, Lp)
    p1_ref[Cout:Cin1, :] = sk_pad.astype(jnp.bfloat16)

    mask = mask_ref[...]                                               # (1, Lo)

    # ---- Stage 2: Conv2d 3x3 replicate + bias + InstanceNorm + GELU ---------
    # stage the 9-tap im2col slab (one shifted slice per tap) -> ONE dot, K=9*Cin1
    for kh in range(3):
        for kw in range(3):
            t = kh * 3 + kw
            off = kh * Wp + kw
            s1_ref[t * Cin1:(t + 1) * Cin1, :] = p1_ref[:, off:off + Lo]
    h1 = jnp.dot(w1_ref[...], s1_ref[...],
                 preferred_element_type=f32) + b1_ref[...]             # (Cout, Lo)
    mean = jnp.sum(h1 * mask, axis=-1, keepdims=True) * inv_n
    cen = h1 - mean
    var = jnp.sum(cen * cen * mask, axis=-1, keepdims=True) * inv_n
    g1 = _gelu(cen * jax.lax.rsqrt(var + eps))                         # (Cout, Lo) f32
    # replicate re-pad for conv2 (garbage columns are never selected by repad)
    p2 = jnp.dot(g1.astype(jnp.bfloat16), repad_ref[...],
                 preferred_element_type=f32)                           # (Cout, Lp)
    p2_ref[...] = p2.astype(jnp.bfloat16)

    # ---- Stage 3: second Conv2d 3x3 replicate + bias + InstanceNorm + GELU --
    for kh in range(3):
        for kw in range(3):
            t = kh * 3 + kw
            off = kh * Wp + kw
            s2_ref[t * Cout:(t + 1) * Cout, :] = p2_ref[:, off:off + Lo]
    h2 = jnp.dot(w2_ref[...], s2_ref[...],
                 preferred_element_type=f32) + b2_ref[...]             # (Cout, Lo)
    mean = jnp.sum(h2 * mask, axis=-1, keepdims=True) * inv_n
    cen = h2 - mean
    var = jnp.sum(cen * cen * mask, axis=-1, keepdims=True) * inv_n
    g2 = _gelu(cen * jax.lax.rsqrt(var + eps))                         # (Cout, Lo) f32

    # ---- store exact NCHW output, dropping the 2 pad columns per row --------
    for h in range(H):
        o_ref[0, :, h, :] = g2[:, h * Wp:h * Wp + W]


# --------------------- constant gather matrices (trace-time) -----------------

def _gather_constants(Hs, Ws, H, W, Hp, Wp, Lo, Lp):
    HsWs, HW = Hs * Ws, H * W
    pad_up = np.zeros((4 * HsWs, Lp), np.float32)
    pad_sk = np.zeros((HW, Lp), np.float32)
    repad = np.zeros((Lo, Lp), np.float32)
    for m in range(Lp):
        r = min(m // Wp, Hp - 1)
        c = m % Wp
        hh = min(max(r - 1, 0), H - 1)        # replicate (edge) padding
        ww = min(max(c - 1, 0), W - 1)
        d = (hh % 2) * 2 + (ww % 2)           # sub-pixel plane of ConvT output
        pad_up[d * HsWs + (hh // 2) * Ws + (ww // 2), m] = 1.0
        pad_sk[hh * W + ww, m] = 1.0
        repad[hh * Wp + ww, m] = 1.0          # source in the (H, Wp) conv layout
    mask = np.zeros((1, Lo), np.float32)
    for l in range(Lo):
        mask[0, l] = 1.0 if (l % Wp) < W else 0.0
    return (jnp.asarray(pad_up, jnp.bfloat16), jnp.asarray(pad_sk, jnp.bfloat16),
            jnp.asarray(repad, jnp.bfloat16), jnp.asarray(mask, jnp.float32))


# ----------------------------- Decoder forward -------------------------------

def decoder_forward(p, x, skip):
    B, Cin, Hs, Ws = x.shape
    Cout = p["up_w"].shape[1]
    Cin1 = 2 * Cout
    H, W = 2 * Hs, 2 * Ws
    Hp, Wp = H + 2, W + 2
    HsWs, HW = Hs * Ws, H * W
    Lo = H * Wp                  # conv output layout length (2 garbage cols/row)
    Lp = Hp * Wp + 2             # padded image length (+2 so the last tap slice fits)

    # weight packing (tiny; in deployment these would be pre-packed once)
    w4 = jnp.transpose(p["up_w"], (2, 3, 1, 0)).reshape(4 * Cout, Cin).astype(jnp.bfloat16)
    b4 = p["up_b"].reshape(Cout, 1).astype(jnp.float32)
    w1 = jnp.transpose(p["c1_w"], (0, 2, 3, 1)).reshape(Cout, 9 * Cin1).astype(jnp.bfloat16)
    b1 = p["c1_b"].reshape(Cout, 1).astype(jnp.float32)
    w2 = jnp.transpose(p["c2_w"], (0, 2, 3, 1)).reshape(Cout, 9 * Cout).astype(jnp.bfloat16)
    b2 = p["c2_b"].reshape(Cout, 1).astype(jnp.float32)

    pu, ps, rp, msk = _gather_constants(Hs, Ws, H, W, Hp, Wp, Lo, Lp)

    xf = x.reshape(B, Cin, HsWs)         # free metadata reshapes (contiguous)
    sf = skip.reshape(B, Cout, HW)

    kernel = functools.partial(_decoder_kernel, Cout=Cout, Cin1=Cin1,
                               Hs=Hs, Ws=Ws, H=H, W=W, Wp=Wp, Lo=Lo, Lp=Lp)

    return pl.pallas_call(
        kernel,
        out_shape=jax.ShapeDtypeStruct((B, Cout, H, W), jnp.float32),
        grid=(B,),
        in_specs=[
            pl.BlockSpec((1, Cin, HsWs), lambda b: (b, 0, 0)),
            pl.BlockSpec((1, Cout, HW), lambda b: (b, 0, 0)),
            pl.BlockSpec((4 * Cout, Cin), lambda b: (0, 0)),
            pl.BlockSpec((Cout, 1), lambda b: (0, 0)),
            pl.BlockSpec((Cout, 9 * Cin1), lambda b: (0, 0)),
            pl.BlockSpec((Cout, 1), lambda b: (0, 0)),
            pl.BlockSpec((Cout, 9 * Cout), lambda b: (0, 0)),
            pl.BlockSpec((Cout, 1), lambda b: (0, 0)),
            pl.BlockSpec((4 * HsWs, Lp), lambda b: (0, 0)),
            pl.BlockSpec((HW, Lp), lambda b: (0, 0)),
            pl.BlockSpec((Lo, Lp), lambda b: (0, 0)),
            pl.BlockSpec((1, Lo), lambda b: (0, 0)),
        ],
        out_specs=pl.BlockSpec((1, Cout, H, W), lambda b: (b, 0, 0, 0)),
        scratch_shapes=[
            pltpu.VMEM((Cout, 4 * HsWs), jnp.float32),   # ych: per-channel ConvT
            pltpu.VMEM((Cin1, Lp), jnp.bfloat16),        # P1 : padded [up|skip]
            pltpu.VMEM((Cout, Lp), jnp.bfloat16),        # P2 : padded conv1 out
            pltpu.VMEM((9 * Cin1, Lo), jnp.bfloat16),    # S1 : conv1 im2col slab
            pltpu.VMEM((9 * Cout, Lo), jnp.bfloat16),    # S2 : conv2 im2col slab
        ],
        compiler_params=pltpu.CompilerParams(
            dimension_semantics=("parallel",),
            vmem_limit_bytes=32 * 1024 * 1024,
        ),
    )(xf, sf, w4, b4, w1, b1, w2, b2, pu, ps, rp, msk)


def init_decoder_params(key, in_ch, out_ch):
    ks = jax.random.split(key, 6)

    def u(k, shape, fan_in):
        bound = 1.0 / float(fan_in) ** 0.5
        return jax.random.uniform(k, shape, jnp.float32, -bound, bound)

    return {
        # ConvTranspose2d weight layout: (in_ch, out_ch, 2, 2)
        "up_w": u(ks[0], (in_ch, out_ch, 2, 2), out_ch * 4),
        "up_b": u(ks[1], (out_ch,), out_ch * 4),
        "c1_w": u(ks[2], (out_ch, out_ch * 2, 3, 3), out_ch * 2 * 9),
        "c1_b": u(ks[3], (out_ch,), out_ch * 2 * 9),
        "c2_w": u(ks[4], (out_ch, out_ch, 3, 3), out_ch * 9),
        "c2_b": u(ks[5], (out_ch,), out_ch * 9),
    }


# ------------------------- plain-JAX reference check -------------------------

def _reference_decoder(p, x, skip):
    hp = jax.lax.Precision.HIGHEST
    bf = lambda a: a.astype(jnp.bfloat16).astype(jnp.float32)

    def inorm(t):
        m = jnp.mean(t, axis=(2, 3), keepdims=True)
        v = jnp.mean(jnp.square(t - m), axis=(2, 3), keepdims=True)
        return (t - m) * jax.lax.rsqrt(v + 1e-5)

    gelu = lambda t: jax.nn.gelu(t, approximate=False)

    B, _, Hs, Ws = x.shape
    Cout = p["up_w"].shape[1]
    e = jnp.einsum("bchw,cokl->bohkwl", bf(x), bf(p["up_w"]), precision=hp)
    up = e.reshape(B, Cout, 2 * Hs, 2 * Ws) + p["up_b"][None, :, None, None]
    up = gelu(inorm(up))

    h = jnp.concatenate([up, skip], axis=1)

    def conv3(t, w, b):
        tp = jnp.pad(t, ((0, 0), (0, 0), (1, 1), (1, 1)), mode="edge")
        y = jax.lax.conv_general_dilated(
            bf(tp), bf(w), (1, 1), "VALID",
            dimension_numbers=("NCHW", "OIHW", "NCHW"), precision=hp)
        return y + b[None, :, None, None]

    h = gelu(inorm(conv3(h, p["c1_w"], p["c1_b"])))
    h = gelu(inorm(conv3(h, p["c2_w"], p["c2_b"])))
    return h


# ----------------------------------- main ------------------------------------

if __name__ == "__main__":
    # Decoder(in_ch=8, out_ch=4): x (B, 8, 8, 8), skip (B, 4, 16, 16).
    # Dropout(0.2) is identity (inference / eval semantics).
    in_ch, out_ch = 8, 4
    B, Hs, Ws = 2, 8, 8

    key = jax.random.PRNGKey(0)
    kp, kx, ksk = jax.random.split(key, 3)
    params = init_decoder_params(kp, in_ch, out_ch)
    x = jax.random.normal(kx, (B, in_ch, Hs, Ws), jnp.float32)
    skip = jax.random.normal(ksk, (B, out_ch, 2 * Hs, 2 * Ws), jnp.float32)

    out = jax.jit(decoder_forward)(params, x, skip)
    out = jax.block_until_ready(out)

    assert out.shape == (B, out_ch, 2 * Hs, 2 * Ws), out.shape
    assert bool(jnp.all(jnp.isfinite(out)))

    ref = _reference_decoder(params, x, skip)
    err = float(jnp.max(jnp.abs(out - ref)))
    assert err < 3e-2, f"max abs error vs reference: {err}"

    print("KERNEL_OK")
</pallas_src>

<mosaic_0001>
module attributes {stable_mosaic.version = 11 : i64} {
  func.func @_decoder_kernel(%arg0: i32, %arg1: memref<1x8x64xf32, #tpu.memory_space<vmem>>, %arg2: memref<1x4x256xf32, #tpu.memory_space<vmem>>, %arg3: memref<16x8xbf16, #tpu.memory_space<vmem>>, %arg4: memref<4x1xf32, #tpu.memory_space<vmem>>, %arg5: memref<4x72xbf16, #tpu.memory_space<vmem>>, %arg6: memref<4x1xf32, #tpu.memory_space<vmem>>, %arg7: memref<4x36xbf16, #tpu.memory_space<vmem>>, %arg8: memref<4x1xf32, #tpu.memory_space<vmem>>, %arg9: memref<256x326xbf16, #tpu.memory_space<vmem>>, %arg10: memref<256x326xbf16, #tpu.memory_space<vmem>>, %arg11: memref<288x326xbf16, #tpu.memory_space<vmem>>, %arg12: memref<1x288xf32, #tpu.memory_space<vmem>>, %arg13: memref<1x4x16x16xf32, #tpu.memory_space<vmem>>, %arg14: memref<4x256xf32, #tpu.memory_space<vmem>>, %arg15: memref<8x326xbf16, #tpu.memory_space<vmem>>, %arg16: memref<4x326xbf16, #tpu.memory_space<vmem>>, %arg17: memref<72x288xbf16, #tpu.memory_space<vmem>>, %arg18: memref<36x288xbf16, #tpu.memory_space<vmem>>) attributes {dimension_semantics = [#tpu.dimension_semantics<parallel>], iteration_bounds = array<i64: 2>, scalar_prefetch = 0 : i64, scratch_operands = 5 : i64, tpu.core_type = #tpu.core_type<tc>, window_params = [{transform_indices = @transform_0, window_bounds = array<i64: 1, 8, 64>}, {transform_indices = @transform_1, window_bounds = array<i64: 1, 4, 256>}, {pipeline_mode = #tpu.pipeline_mode<synchronous>, transform_indices = @transform_2, window_bounds = array<i64: 16, 8>}, {pipeline_mode = #tpu.pipeline_mode<synchronous>, transform_indices = @transform_3, window_bounds = array<i64: 4, 1>}, {pipeline_mode = #tpu.pipeline_mode<synchronous>, transform_indices = @transform_4, window_bounds = array<i64: 4, 72>}, {pipeline_mode = #tpu.pipeline_mode<synchronous>, transform_indices = @transform_5, window_bounds = array<i64: 4, 1>}, {pipeline_mode = #tpu.pipeline_mode<synchronous>, transform_indices = @transform_6, window_bounds = array<i64: 4, 36>}, {pipeline_mode = #tpu.pipeline_mode<synchronous>, transform_indices = @transform_7, window_bounds = array<i64: 4, 1>}, {pipeline_mode = #tpu.pipeline_mode<synchronous>, transform_indices = @transform_8, window_bounds = array<i64: 256, 326>}, {pipeline_mode = #tpu.pipeline_mode<synchronous>, transform_indices = @transform_9, window_bounds = array<i64: 256, 326>}, {pipeline_mode = #tpu.pipeline_mode<synchronous>, transform_indices = @transform_10, window_bounds = array<i64: 288, 326>}, {pipeline_mode = #tpu.pipeline_mode<synchronous>, transform_indices = @transform_11, window_bounds = array<i64: 1, 288>}, {transform_indices = @transform_12, window_bounds = array<i64: 1, 4, 16, 16>}]} {
    %c0 = arith.constant 0 : index
    %c0_0 = arith.constant 0 : index
    %c0_1 = arith.constant 0 : index
    %0 = vector.load %arg1[%c0, %c0_0, %c0_1] : memref<1x8x64xf32, #tpu.memory_space<vmem>>, vector<1x8x64xf32>
    %1 = vector.shape_cast %0 : vector<1x8x64xf32> to vector<8x64xf32>
    %2 = arith.truncf %1 : vector<8x64xf32> to vector<8x64xbf16>
    %c0_2 = arith.constant 0 : index
    %c0_3 = arith.constant 0 : index
    %3 = vector.load %arg3[%c0_2, %c0_3] : memref<16x8xbf16, #tpu.memory_space<vmem>>, vector<16x8xbf16>
    %cst = arith.constant dense<0.000000e+00> : vector<16x64xf32>
    %4 = tpu.matmul %3, %2, %cst {dimension_numbers = #tpu.dot_dimension_numbers<[1], [0], [0], [1], [0, 0, 1, 1], [], []>} : vector<16x8xbf16>, vector<8x64xbf16>, vector<16x64xf32> -> vector<16x64xf32>
    %5 = vector.extract_strided_slice %4 {offsets = [0, 0], sizes = [4, 64], strides = [1, 1]} : vector<16x64xf32> to vector<4x64xf32>
    %c0_4 = arith.constant 0 : index
    %c0_5 = arith.constant 0 : index
    %6 = vector.load %arg14[%c0_4, %c0_5] : memref<4x256xf32, #tpu.memory_space<vmem>>, vector<4x64xf32>
    tpu.vector_store %arg14[%c0_4, %c0_5], %5 {strides = array<i32>} : memref<4x256xf32, #tpu.memory_space<vmem>>, vector<4x64xf32>,
    %7 = vector.extract_strided_slice %4 {offsets = [4, 0], sizes = [4, 64], strides = [1, 1]} : vector<16x64xf32> to vector<4x64xf32>
    %c0_6 = arith.constant 0 : index
    %c64 = arith.constant 64 : index
    %8 = vector.load %arg14[%c0_6, %c64] : memref<4x256xf32, #tpu.memory_space<vmem>>, vector<4x64xf32>
    tpu.vector_store %arg14[%c0_6, %c64], %7 {strides = array<i32>} : memref<4x256xf32, #tpu.memory_space<vmem>>, vector<4x64xf32>,
    %9 = vector.extract_strided_slice %4 {offsets = [8, 0], sizes = [4, 64], strides = [1, 1]} : vector<16x64xf32> to vector<4x64xf32>
    %c0_7 = arith.constant 0 : index
    %c128 = arith.constant 128 : index
    %10 = vector.load %arg14[%c0_7, %c128] : memref<4x256xf32, #tpu.memory_space<vmem>>, vector<4x64xf32>
    tpu.vector_store %arg14[%c0_7, %c128], %9 {strides = array<i32>} : memref<4x256xf32, #tpu.memory_space<vmem>>, vector<4x64xf32>,
    %11 = vector.extract_strided_slice %4 {offsets = [12, 0], sizes = [4, 64], strides = [1, 1]} : vector<16x64xf32> to vector<4x64xf32>
    %c0_8 = arith.constant 0 : index
    %c192 = arith.constant 192 : index
    %12 = vector.load %arg14[%c0_8, %c192] : memref<4x256xf32, #tpu.memory_space<vmem>>, vector<4x64xf32>
    tpu.vector_store %arg14[%c0_8, %c192], %11 {strides = array<i32>} : memref<4x256xf32, #tpu.memory_space<vmem>>, vector<4x64xf32>,
    %c0_9 = arith.constant 0 : index
    %c0_10 = arith.constant 0 : index
    %13 = vector.load %arg14[%c0_9, %c0_10] : memref<4x256xf32, #tpu.memory_space<vmem>>, vector<4x256xf32>
    %c0_11 = arith.constant 0 : index
    %c0_12 = arith.constant 0 : index
    %14 = vector.load %arg4[%c0_11, %c0_12] : memref<4x1xf32, #tpu.memory_space<vmem>>, vector<4x1xf32>
    %15 = vector.broadcast %14 : vector<4x1xf32> to vector<4x256xf32>
    %16 = arith.addf %13, %15 : vector<4x256xf32>
    %cst_13 = arith.constant dense<0.000000e+00> : vector<4xf32>
    %17 = vector.multi_reduction <add>, %16, %cst_13 [1] : vector<4x256xf32> to vector<4xf32>
    %18 = vector.shape_cast %17 : vector<4xf32> to vector<4x1xf32>
    %cst_14 = arith.constant 3.906250e-03 : f32
    %19 = vector.broadcast %cst_14 : f32 to vector<4x1xf32>
    %20 = arith.mulf %18, %19 : vector<4x1xf32>
    %21 = vector.broadcast %20 : vector<4x1xf32> to vector<4x256xf32>
    %22 = arith.subf %16, %21 : vector<4x256xf32>
    %23 = arith.mulf %22, %22 : vector<4x256xf32>
    %cst_15 = arith.constant dense<0.000000e+00> : vector<4xf32>
    %24 = vector.multi_reduction <add>, %23, %cst_15 [1] : vector<4x256xf32> to vector<4xf32>
    %25 = vector.shape_cast %24 : vector<4xf32> to vector<4x1xf32>
    %cst_16 = arith.constant 3.906250e-03 : f32
    %26 = vector.broadcast %cst_16 : f32 to vector<4x1xf32>
    %27 = arith.mulf %25, %26 : vector<4x1xf32>
    %cst_17 = arith.constant 9.99999974E-6 : f32
    %28 = vector.broadcast %cst_17 : f32 to vector<4x1xf32>
    %29 = arith.addf %27, %28 : vector<4x1xf32>
    %30 = math.rsqrt %29 : vector<4x1xf32>
    %31 = vector.broadcast %30 : vector<4x1xf32> to vector<4x256xf32>
    %32 = arith.mulf %22, %31 : vector<4x256xf32>
    %cst_18 = arith.constant 0.707106769 : f32
    %33 = vector.broadcast %cst_18 : f32 to vector<4x256xf32>
    %34 = arith.mulf %32, %33 : vector<4x256xf32>
    %cst_19 = arith.constant -3.8325069 : f32
    %cst_20 = arith.constant 3.8325069 : f32
    %35 = vector.broadcast %cst_19 : f32 to vector<4x256xf32>
    %36 = arith.maximumf %35, %34 : vector<4x256xf32>
    %37 = vector.broadcast %cst_20 : f32 to vector<4x256xf32>
    %38 = arith.minimumf %37, %36 : vector<4x256xf32>
    %39 = arith.mulf %38, %38 : vector<4x256xf32>
    %cst_21 = arith.constant 2.29050653E-4 : f32
    %40 = vector.broadcast %cst_21 : f32 to vector<4x256xf32>
    %41 = arith.mulf %40, %39 : vector<4x256xf32>
    %cst_22 = arith.constant 0.00340829091 : f32
    %42 = vector.broadcast %cst_22 : f32 to vector<4x256xf32>
    %43 = arith.addf %41, %42 : vector<4x256xf32>
    %44 = arith.mulf %43, %39 : vector<4x256xf32>
    %cst_23 = arith.constant 0.0509556942 : f32
    %45 = vector.broadcast %cst_23 : f32 to vector<4x256xf32>
    %46 = arith.addf %44, %45 : vector<4x256xf32>
    %47 = arith.mulf %46, %39 : vector<4x256xf32>
    %cst_24 = arith.constant 0.185208321 : f32
    %48 = vector.broadcast %cst_24 : f32 to vector<4x256xf32>
    %49 = arith.addf %47, %48 : vector<4x256xf32>
    %50 = arith.mulf %49, %39 : vector<4x256xf32>
    %cst_25 = arith.constant 1.12837911 : f32
    %51 = vector.broadcast %cst_25 : f32 to vector<4x256xf32>
    %52 = arith.addf %50, %51 : vector<4x256xf32>
    %cst_26 = arith.constant -1.17916031E-7 : f32
    %53 = vector.broadcast %cst_26 : f32 to vector<4x256xf32>
    %54 = arith.mulf %53, %39 : vector<4x256xf32>
    %cst_27 = arith.constant 2.35479656E-5 : f32
    %55 = vector.broadcast %cst_27 : f32 to vector<4x256xf32>
    %56 = arith.addf %54, %55 : vector<4x256xf32>
    %57 = arith.mulf %56, %39 : vector<4x256xf32>
    %cst_28 = arith.constant 0.00101796258 : f32
    %58 = vector.broadcast %cst_28 : f32 to vector<4x256xf32>
    %59 = arith.addf %57, %58 : vector<4x256xf32>
    %60 = arith.mulf %59, %39 : vector<4x256xf32>
    %cst_29 = arith.constant 0.0140704699 : f32
    %61 = vector.broadcast %cst_29 : f32 to vector<4x256xf32>
    %62 = arith.addf %60, %61 : vector<4x256xf32>
    %63 = arith.mulf %62, %39 : vector<4x256xf32>
    %cst_30 = arith.constant 0.110985048 : f32
    %64 = vector.broadcast %cst_30 : f32 to vector<4x256xf32>
    %65 = arith.addf %63, %64 : vector<4x256xf32>
    %66 = arith.mulf %65, %39 : vector<4x256xf32>
    %cst_31 = arith.constant 0.497469246 : f32
    %67 = vector.broadcast %cst_31 : f32 to vector<4x256xf32>
    %68 = arith.addf %66, %67 : vector<4x256xf32>
    %69 = arith.mulf %68, %39 : vector<4x256xf32>
    %cst_32 = arith.constant 1.000000e+00 : f32
    %70 = vector.broadcast %cst_32 : f32 to vector<4x256xf32>
    %71 = arith.addf %69, %70 : vector<4x256xf32>
    %72 = arith.mulf %38, %52 : vector<4x256xf32>
    %73 = tpu.reciprocal %71 {approx = true} : vector<4x256xf32> -> vector<4x256xf32>
    %74 = arith.mulf %72, %73 : vector<4x256xf32>
    %cst_33 = arith.constant 5.000000e-01 : f32
    %75 = vector.broadcast %cst_33 : f32 to vector<4x256xf32>
    %76 = arith.mulf %75, %32 : vector<4x256xf32>
    %cst_34 = arith.constant 1.000000e+00 : f32
    %77 = vector.broadcast %cst_34 : f32 to vector<4x256xf32>
    %78 = arith.addf %77, %74 : vector<4x256xf32>
    %79 = arith.mulf %76, %78 : vector<4x256xf32>
    %80 = arith.truncf %79 : vector<4x256xf32> to vector<4x256xbf16>
    %c0_35 = arith.constant 0 : index
    %c0_36 = arith.constant 0 : index
    %81 = vector.load %arg9[%c0_35, %c0_36] : memref<256x326xbf16, #tpu.memory_space<vmem>>, vector<256x326xbf16>
    %cst_37 = arith.constant dense<0.000000e+00> : vector<4x326xf32>
    %82 = tpu.matmul %80, %81, %cst_37 {dimension_numbers = #tpu.dot_dimension_numbers<[1], [0], [0], [1], [0, 0, 1, 1], [], []>} : vector<4x256xbf16>, vector<256x326xbf16>, vector<4x326xf32> -> vector<4x326xf32>
    %83 = arith.truncf %82 : vector<4x326xf32> to vector<4x326xbf16>
    %c0_38 = arith.constant 0 : index
    %c0_39 = arith.constant 0 : index
    %84 = vector.load %arg15[%c0_38, %c0_39] : memref<8x326xbf16, #tpu.memory_space<vmem>>, vector<4x326xbf16>
    tpu.vector_store %arg15[%c0_38, %c0_39], %83 {strides = array<i32>} : memref<8x326xbf16, #tpu.memory_space<vmem>>, vector<4x326xbf16>,
    %c0_40 = arith.constant 0 : index
    %c0_41 = arith.constant 0 : index
    %c0_42 = arith.constant 0 : index
    %85 = vector.load %arg2[%c0_40, %c0_41, %c0_42] : memref<1x4x256xf32, #tpu.memory_space<vmem>>, vector<1x4x256xf32>
    %86 = vector.shape_cast %85 : vector<1x4x256xf32> to vector<4x256xf32>
    %87 = arith.truncf %86 : vector<4x256xf32> to vector<4x256xbf16>
    %c0_43 = arith.constant 0 : index
    %c0_44 = arith.constant 0 : index
    %88 = vector.load %arg10[%c0_43, %c0_44] : memref<256x326xbf16, #tpu.memory_space<vmem>>, vector<256x326xbf16>
    %cst_45 = arith.constant dense<0.000000e+00> : vector<4x326xf32>
    %89 = tpu.matmul %87, %88, %cst_45 {dimension_numbers = #tpu.dot_dimension_numbers<[1], [0], [0], [1], [0, 0, 1, 1], [], []>} : vector<4x256xbf16>, vector<256x326xbf16>, vector<4x326xf32> -> vector<4x326xf32>
    %90 = arith.truncf %89 : vector<4x326xf32> to vector<4x326xbf16>
    %c4 = arith.constant 4 : index
    %c0_46 = arith.constant 0 : index
    %91 = vector.load %arg15[%c4, %c0_46] : memref<8x326xbf16, #tpu.memory_space<vmem>>, vector<4x326xbf16>
    tpu.vector_store %arg15[%c4, %c0_46], %90 {strides = array<i32>} : memref<8x326xbf16, #tpu.memory_space<vmem>>, vector<4x326xbf16>,
    %c0_47 = arith.constant 0 : index
    %c0_48 = arith.constant 0 : index
    %92 = vector.load %arg12[%c0_47, %c0_48] : memref<1x288xf32, #tpu.memory_space<vmem>>, vector<1x288xf32>
    %c0_49 = arith.constant 0 : index
    %c0_50 = arith.constant 0 : index
    %93 = vector.load %arg15[%c0_49, %c0_50] : memref<8x326xbf16, #tpu.memory_space<vmem>>, vector<8x288xbf16>
    %c0_51 = arith.constant 0 : index
    %c0_52 = arith.constant 0 : index
    %94 = vector.load %arg17[%c0_51, %c0_52] : memref<72x288xbf16, #tpu.memory_space<vmem>>, vector<8x288xbf16>
    tpu.vector_store %arg17[%c0_51, %c0_52], %93 {strides = array<i32>} : memref<72x288xbf16, #tpu.memory_space<vmem>>, vector<8x288xbf16>,
    %c0_53 = arith.constant 0 : index
    %c1 = arith.constant 1 : index
    %95 = vector.load %arg15[%c0_53, %c1] : memref<8x326xbf16, #tpu.memory_space<vmem>>, vector<8x288xbf16>
    %c8 = arith.constant 8 : index
    %c0_54 = arith.constant 0 : index
    %96 = vector.load %arg17[%c8, %c0_54] : memref<72x288xbf16, #tpu.memory_space<vmem>>, vector<8x288xbf16>
    tpu.vector_store %arg17[%c8, %c0_54], %95 {strides = array<i32>} : memref<72x288xbf16, #tpu.memory_space<vmem>>, vector<8x288xbf16>,
    %c0_55 = arith.constant 0 : index
    %c2 = arith.constant 2 : index
    %97 = vector.load %arg15[%c0_55, %c2] : memref<8x326xbf16, #tpu.memory_space<vmem>>, vector<8x288xbf16>
    %c16 = arith.constant 16 : index
    %c0_56 = arith.constant 0 : index
    %98 = vector.load %arg17[%c16, %c0_56] : memref<72x288xbf16, #tpu.memory_space<vmem>>, vector<8x288xbf16>
    tpu.vector_store %arg17[%c16, %c0_56], %97 {strides = array<i32>} : memref<72x288xbf16, #tpu.memory_space<vmem>>, vector<8x288xbf16>,
    %c0_57 = arith.constant 0 : index
    %c18 = arith.constant 18 : index
    %99 = vector.load %arg15[%c0_57, %c18] : memref<8x326xbf16, #tpu.memory_space<vmem>>, vector<8x288xbf16>
    %c24 = arith.constant 24 : index
    %c0_58 = arith.constant 0 : index
    %100 = vector.load %arg17[%c24, %c0_58] : memref<72x288xbf16, #tpu.memory_space<vmem>>, vector<8x288xbf16>
    tpu.vector_store %arg17[%c24, %c0_58], %99 {strides = array<i32>} : memref<72x288xbf16, #tpu.memory_space<vmem>>, vector<8x288xbf16>,
    %c0_59 = arith.constant 0 : index
    %c19 = arith.constant 19 : index
    %101 = vector.load %arg15[%c0_59, %c19] : memref<8x326xbf16, #tpu.memory_space<vmem>>, vector<8x288xbf16>
    %c32 = arith.constant 32 : index
    %c0_60 = arith.constant 0 : index
    %102 = vector.load %arg17[%c32, %c0_60] : memref<72x288xbf16, #tpu.memory_space<vmem>>, vector<8x288xbf16>
    tpu.vector_store %arg17[%c32, %c0_60], %101 {strides = array<i32>} : memref<72x288xbf16, #tpu.memory_space<vmem>>, vector<8x288xbf16>,
    %c0_61 = arith.constant 0 : index
    %c20 = arith.constant 20 : index
    %103 = vector.load %arg15[%c0_61, %c20] : memref<8x326xbf16, #tpu.memory_space<vmem>>, vector<8x288xbf16>
    %c40 = arith.constant 40 : index
    %c0_62 = arith.constant 0 : index
    %104 = vector.load %arg17[%c40, %c0_62] : memref<72x288xbf16, #tpu.memory_space<vmem>>, vector<8x288xbf16>
    tpu.vector_store %arg17[%c40, %c0_62], %103 {strides = array<i32>} : memref<72x288xbf16, #tpu.memory_space<vmem>>, vector<8x288xbf16>,
    %c0_63 = arith.constant 0 : index
    %c36 = arith.constant 36 : index
    %105 = vector.load %arg15[%c0_63, %c36] : memref<8x326xbf16, #tpu.memory_space<vmem>>, vector<8x288xbf16>
    %c48 = arith.constant 48 : index
    %c0_64 = arith.constant 0 : index
    %106 = vector.load %arg17[%c48, %c0_64] : memref<72x288xbf16, #tpu.memory_space<vmem>>, vector<8x288xbf16>
    tpu.vector_store %arg17[%c48, %c0_64], %105 {strides = array<i32>} : memref<72x288xbf16, #tpu.memory_space<vmem>>, vector<8x288xbf16>,
    %c0_65 = arith.constant 0 : index
    %c37 = arith.constant 37 : index
    %107 = vector.load %arg15[%c0_65, %c37] : memref<8x326xbf16, #tpu.memory_space<vmem>>, vector<8x288xbf16>
    %c56 = arith.constant 56 : index
    %c0_66 = arith.constant 0 : index
    %108 = vector.load %arg17[%c56, %c0_66] : memref<72x288xbf16, #tpu.memory_space<vmem>>, vector<8x288xbf16>
    tpu.vector_store %arg17[%c56, %c0_66], %107 {strides = array<i32>} : memref<72x288xbf16, #tpu.memory_space<vmem>>, vector<8x288xbf16>,
    %c0_67 = arith.constant 0 : index
    %c38 = arith.constant 38 : index
    %109 = vector.load %arg15[%c0_67, %c38] : memref<8x326xbf16, #tpu.memory_space<vmem>>, vector<8x288xbf16>
    %c64_68 = arith.constant 64 : index
    %c0_69 = arith.constant 0 : index
    %110 = vector.load %arg17[%c64_68, %c0_69] : memref<72x288xbf16, #tpu.memory_space<vmem>>, vector<8x288xbf16>
    tpu.vector_store %arg17[%c64_68, %c0_69], %109 {strides = array<i32>} : memref<72x288xbf16, #tpu.memory_space<vmem>>, vector<8x288xbf16>,
    %c0_70 = arith.constant 0 : index
    %c0_71 = arith.constant 0 : index
    %111 = vector.load %arg5[%c0_70, %c0_71] : memref<4x72xbf16, #tpu.memory_space<vmem>>, vector<4x72xbf16>
    %c0_72 = arith.constant 0 : index
    %c0_73 = arith.constant 0 : index
    %112 = vector.load %arg17[%c0_72, %c0_73] : memref<72x288xbf16, #tpu.memory_space<vmem>>, vector<72x288xbf16>
    %cst_74 = arith.constant dense<0.000000e+00> : vector<4x288xf32>
    %113 = tpu.matmul %111, %112, %cst_74 {dimension_numbers = #tpu.dot_dimension_numbers<[1], [0], [0], [1], [0, 0, 1, 1], [], []>} : vector<4x72xbf16>, vector<72x288xbf16>, vector<4x288xf32> -> vector<4x288xf32>
    %c0_75 = arith.constant 0 : index
    %c0_76 = arith.constant 0 : index
    %114 = vector.load %arg6[%c0_75, %c0_76] : memref<4x1xf32, #tpu.memory_space<vmem>>, vector<4x1xf32>
    %115 = vector.broadcast %114 : vector<4x1xf32> to vector<4x288xf32>
    %116 = arith.addf %113, %115 : vector<4x288xf32>
    %117 = vector.broadcast %92 : vector<1x288xf32> to vector<4x288xf32>
    %118 = arith.mulf %116, %117 : vector<4x288xf32>
    %cst_77 = arith.constant dense<0.000000e+00> : vector<4xf32>
    %119 = vector.multi_reduction <add>, %118, %cst_77 [1] : vector<4x288xf32> to vector<4xf32>
    %120 = vector.shape_cast %119 : vector<4xf32> to vector<4x1xf32>
    %cst_78 = arith.constant 3.906250e-03 : f32
    %121 = vector.broadcast %cst_78 : f32 to vector<4x1xf32>
    %122 = arith.mulf %120, %121 : vector<4x1xf32>
    %123 = vector.broadcast %122 : vector<4x1xf32> to vector<4x288xf32>
    %124 = arith.subf %116, %123 : vector<4x288xf32>
    %125 = arith.mulf %124, %124 : vector<4x288xf32>
    %126 = vector.broadcast %92 : vector<1x288xf32> to vector<4x288xf32>
    %127 = arith.mulf %125, %126 : vector<4x288xf32>
    %cst_79 = arith.constant dense<0.000000e+00> : vector<4xf32>
    %128 = vector.multi_reduction <add>, %127, %cst_79 [1] : vector<4x288xf32> to vector<4xf32>
    %129 = vector.shape_cast %128 : vector<4xf32> to vector<4x1xf32>
    %cst_80 = arith.constant 3.906250e-03 : f32
    %130 = vector.broadcast %cst_80 : f32 to vector<4x1xf32>
    %131 = arith.mulf %129, %130 : vector<4x1xf32>
    %cst_81 = arith.constant 9.99999974E-6 : f32
    %132 = vector.broadcast %cst_81 : f32 to vector<4x1xf32>
    %133 = arith.addf %131, %132 : vector<4x1xf32>
    %134 = math.rsqrt %133 : vector<4x1xf32>
    %135 = vector.broadcast %134 : vector<4x1xf32> to vector<4x288xf32>
    %136 = arith.mulf %124, %135 : vector<4x288xf32>
    %cst_82 = arith.constant 0.707106769 : f32
    %137 = vector.broadcast %cst_82 : f32 to vector<4x288xf32>
    %138 = arith.mulf %136, %137 : vector<4x288xf32>
    %cst_83 = arith.constant -3.8325069 : f32
    %cst_84 = arith.constant 3.8325069 : f32
    %139 = vector.broadcast %cst_83 : f32 to vector<4x288xf32>
    %140 = arith.maximumf %139, %138 : vector<4x288xf32>
    %141 = vector.broadcast %cst_84 : f32 to vector<4x288xf32>
    %142 = arith.minimumf %141, %140 : vector<4x288xf32>
    %143 = arith.mulf %142, %142 : vector<4x288xf32>
    %cst_85 = arith.constant 2.29050653E-4 : f32
    %144 = vector.broadcast %cst_85 : f32 to vector<4x288xf32>
    %145 = arith.mulf %144, %143 : vector<4x288xf32>
    %cst_86 = arith.constant 0.00340829091 : f32
    %146 = vector.broadcast %cst_86 : f32 to vector<4x288xf32>
    %147 = arith.addf %145, %146 : vector<4x288xf32>
    %148 = arith.mulf %147, %143 : vector<4x288xf32>
    %cst_87 = arith.constant 0.0509556942 : f32
    %149 = vector.broadcast %cst_87 : f32 to vector<4x288xf32>
    %150 = arith.addf %148, %149 : vector<4x288xf32>
    %151 = arith.mulf %150, %143 : vector<4x288xf32>
    %cst_88 = arith.constant 0.185208321 : f32
    %152 = vector.broadcast %cst_88 : f32 to vector<4x288xf32>
    %153 = arith.addf %151, %152 : vector<4x288xf32>
    %154 = arith.mulf %153, %143 : vector<4x288xf32>
    %cst_89 = arith.constant 1.12837911 : f32
    %155 = vector.broadcast %cst_89 : f32 to vector<4x288xf32>
    %156 = arith.addf %154, %155 : vector<4x288xf32>
    %cst_90 = arith.constant -1.17916031E-7 : f32
    %157 = vector.broadcast %cst_90 : f32 to vector<4x288xf32>
    %158 = arith.mulf %157, %143 : vector<4x288xf32>
    %cst_91 = arith.constant 2.35479656E-5 : f32
    %159 = vector.broadcast %cst_91 : f32 to vector<4x288xf32>
    %160 = arith.addf %158, %159 : vector<4x288xf32>
    %161 = arith.mulf %160, %143 : vector<4x288xf32>
    %cst_92 = arith.constant 0.00101796258 : f32
    %162 = vector.broadcast %cst_92 : f32 to vector<4x288xf32>
    %163 = arith.addf %161, %162 : vector<4x288xf32>
    %164 = arith.mulf %163, %143 : vector<4x288xf32>
    %cst_93 = arith.constant 0.0140704699 : f32
    %165 = vector.broadcast %cst_93 : f32 to vector<4x288xf32>
    %166 = arith.addf %164, %165 : vector<4x288xf32>
    %167 = arith.mulf %166, %143 : vector<4x288xf32>
    %cst_94 = arith.constant 0.110985048 : f32
    %168 = vector.broadcast %cst_94 : f32 to vector<4x288xf32>
    %169 = arith.addf %167, %168 : vector<4x288xf32>
    %170 = arith.mulf %169, %143 : vector<4x288xf32>
    %cst_95 = arith.constant 0.497469246 : f32
    %171 = vector.broadcast %cst_95 : f32 to vector<4x288xf32>
    %172 = arith.addf %170, %171 : vector<4x288xf32>
    %173 = arith.mulf %172, %143 : vector<4x288xf32>
    %cst_96 = arith.constant 1.000000e+00 : f32
    %174 = vector.broadcast %cst_96 : f32 to vector<4x288xf32>
    %175 = arith.addf %173, %174 : vector<4x288xf32>
    %176 = arith.mulf %142, %156 : vector<4x288xf32>
    %177 = tpu.reciprocal %175 {approx = true} : vector<4x288xf32> -> vector<4x288xf32>
    %178 = arith.mulf %176, %177 : vector<4x288xf32>
    %cst_97 = arith.constant 5.000000e-01 : f32
    %179 = vector.broadcast %cst_97 : f32 to vector<4x288xf32>
    %180 = arith.mulf %179, %136 : vector<4x288xf32>
    %cst_98 = arith.constant 1.000000e+00 : f32
    %181 = vector.broadcast %cst_98 : f32 to vector<4x288xf32>
    %182 = arith.addf %181, %178 : vector<4x288xf32>
    %183 = arith.mulf %180, %182 : vector<4x288xf32>
    %184 = arith.truncf %183 : vector<4x288xf32> to vector<4x288xbf16>
    %c0_99 = arith.constant 0 : index
    %c0_100 = arith.constant 0 : index
    %185 = vector.load %arg11[%c0_99, %c0_100] : memref<288x326xbf16, #tpu.memory_space<vmem>>, vector<288x326xbf16>
    %cst_101 = arith.constant dense<0.000000e+00> : vector<4x326xf32>
    %186 = tpu.matmul %184, %185, %cst_101 {dimension_numbers = #tpu.dot_dimension_numbers<[1], [0], [0], [1], [0, 0, 1, 1], [], []>} : vector<4x288xbf16>, vector<288x326xbf16>, vector<4x326xf32> -> vector<4x326xf32>
    %187 = arith.truncf %186 : vector<4x326xf32> to vector<4x326xbf16>
    %c0_102 = arith.constant 0 : index
    %c0_103 = arith.constant 0 : index
    %188 = vector.load %arg16[%c0_102, %c0_103] : memref<4x326xbf16, #tpu.memory_space<vmem>>, vector<4x326xbf16>
    tpu.vector_store %arg16[%c0_102, %c0_103], %187 {strides = array<i32>} : memref<4x326xbf16, #tpu.memory_space<vmem>>, vector<4x326xbf16>,
    %c0_104 = arith.constant 0 : index
    %c0_105 = arith.constant 0 : index
    %189 = vector.load %arg16[%c0_104, %c0_105] : memref<4x326xbf16, #tpu.memory_space<vmem>>, vector<4x288xbf16>
    %c0_106 = arith.constant 0 : index
    %c0_107 = arith.constant 0 : index
    %190 = vector.load %arg18[%c0_106, %c0_107] : memref<36x288xbf16, #tpu.memory_space<vmem>>, vector<4x288xbf16>
    tpu.vector_store %arg18[%c0_106, %c0_107], %189 {strides = array<i32>} : memref<36x288xbf16, #tpu.memory_space<vmem>>, vector<4x288xbf16>,
    %c0_108 = arith.constant 0 : index
    %c1_109 = arith.constant 1 : index
    %191 = vector.load %arg16[%c0_108, %c1_109] : memref<4x326xbf16, #tpu.memory_space<vmem>>, vector<4x288xbf16>
    %c4_110 = arith.constant 4 : index
    %c0_111 = arith.constant 0 : index
    %192 = vector.load %arg18[%c4_110, %c0_111] : memref<36x288xbf16, #tpu.memory_space<vmem>>, vector<4x288xbf16>
    tpu.vector_store %arg18[%c4_110, %c0_111], %191 {strides = array<i32>} : memref<36x288xbf16, #tpu.memory_space<vmem>>, vector<4x288xbf16>,
    %c0_112 = arith.constant 0 : index
    %c2_113 = arith.constant 2 : index
    %193 = vector.load %arg16[%c0_112, %c2_113] : memref<4x326xbf16, #tpu.memory_space<vmem>>, vector<4x288xbf16>
    %c8_114 = arith.constant 8 : index
    %c0_115 = arith.constant 0 : index
    %194 = vector.load %arg18[%c8_114, %c0_115] : memref<36x288xbf16, #tpu.memory_space<vmem>>, vector<4x288xbf16>
    tpu.vector_store %arg18[%c8_114, %c0_115], %193 {strides = array<i32>} : memref<36x288xbf16, #tpu.memory_space<vmem>>, vector<4x288xbf16>,
    %c0_116 = arith.constant 0 : index
    %c18_117 = arith.constant 18 : index
    %195 = vector.load %arg16[%c0_116, %c18_117] : memref<4x326xbf16, #tpu.memory_space<vmem>>, vector<4x288xbf16>
    %c12 = arith.constant 12 : index
    %c0_118 = arith.constant 0 : index
    %196 = vector.load %arg18[%c12, %c0_118] : memref<36x288xbf16, #tpu.memory_space<vmem>>, vector<4x288xbf16>
    tpu.vector_store %arg18[%c12, %c0_118], %195 {strides = array<i32>} : memref<36x288xbf16, #tpu.memory_space<vmem>>, vector<4x288xbf16>,
    %c0_119 = arith.constant 0 : index
    %c19_120 = arith.constant 19 : index
    %197 = vector.load %arg16[%c0_119, %c19_120] : memref<4x326xbf16, #tpu.memory_space<vmem>>, vector<4x288xbf16>
    %c16_121 = arith.constant 16 : index
    %c0_122 = arith.constant 0 : index
    %198 = vector.load %arg18[%c16_121, %c0_122] : memref<36x288xbf16, #tpu.memory_space<vmem>>, vector<4x288xbf16>
    tpu.vector_store %arg18[%c16_121, %c0_122], %197 {strides = array<i32>} : memref<36x288xbf16, #tpu.memory_space<vmem>>, vector<4x288xbf16>,
    %c0_123 = arith.constant 0 : index
    %c20_124 = arith.constant 20 : index
    %199 = vector.load %arg16[%c0_123, %c20_124] : memref<4x326xbf16, #tpu.memory_space<vmem>>, vector<4x288xbf16>
    %c20_125 = arith.constant 20 : index
    %c0_126 = arith.constant 0 : index
    %200 = vector.load %arg18[%c20_125, %c0_126] : memref<36x288xbf16, #tpu.memory_space<vmem>>, vector<4x288xbf16>
    tpu.vector_store %arg18[%c20_125, %c0_126], %199 {strides = array<i32>} : memref<36x288xbf16, #tpu.memory_space<vmem>>, vector<4x288xbf16>,
    %c0_127 = arith.constant 0 : index
    %c36_128 = arith.constant 36 : index
    %201 = vector.load %arg16[%c0_127, %c36_128] : memref<4x326xbf16, #tpu.memory_space<vmem>>, vector<4x288xbf16>
    %c24_129 = arith.constant 24 : index
    %c0_130 = arith.constant 0 : index
    %202 = vector.load %arg18[%c24_129, %c0_130] : memref<36x288xbf16, #tpu.memory_space<vmem>>, vector<4x288xbf16>
    tpu.vector_store %arg18[%c24_129, %c0_130], %201 {strides = array<i32>} : memref<36x288xbf16, #tpu.memory_space<vmem>>, vector<4x288xbf16>,
    %c0_131 = arith.constant 0 : index
    %c37_132 = arith.constant 37 : index
    %203 = vector.load %arg16[%c0_131, %c37_132] : memref<4x326xbf16, #tpu.memory_space<vmem>>, vector<4x288xbf16>
    %c28 = arith.constant 28 : index
    %c0_133 = arith.constant 0 : index
    %204 = vector.load %arg18[%c28, %c0_133] : memref<36x288xbf16, #tpu.memory_space<vmem>>, vector<4x288xbf16>
    tpu.vector_store %arg18[%c28, %c0_133], %203 {strides = array<i32>} : memref<36x288xbf16, #tpu.memory_space<vmem>>, vector<4x288xbf16>,
    %c0_134 = arith.constant 0 : index
    %c38_135 = arith.constant 38 : index
    %205 = vector.load %arg16[%c0_134, %c38_135] : memref<4x326xbf16, #tpu.memory_space<vmem>>, vector<4x288xbf16>
    %c32_136 = arith.constant 32 : index
    %c0_137 = arith.constant 0 : index
    %206 = vector.load %arg18[%c32_136, %c0_137] : memref<36x288xbf16, #tpu.memory_space<vmem>>, vector<4x288xbf16>
    tpu.vector_store %arg18[%c32_136, %c0_137], %205 {strides = array<i32>} : memref<36x288xbf16, #tpu.memory_space<vmem>>, vector<4x288xbf16>,
    %c0_138 = arith.constant 0 : index
    %c0_139 = arith.constant 0 : index
    %207 = vector.load %arg7[%c0_138, %c0_139] : memref<4x36xbf16, #tpu.memory_space<vmem>>, vector<4x36xbf16>
    %c0_140 = arith.constant 0 : index
    %c0_141 = arith.constant 0 : index
    %208 = vector.load %arg18[%c0_140, %c0_141] : memref<36x288xbf16, #tpu.memory_space<vmem>>, vector<36x288xbf16>
    %cst_142 = arith.constant dense<0.000000e+00> : vector<4x288xf32>
    %209 = tpu.matmul %207, %208, %cst_142 {dimension_numbers = #tpu.dot_dimension_numbers<[1], [0], [0], [1], [0, 0, 1, 1], [], []>} : vector<4x36xbf16>, vector<36x288xbf16>, vector<4x288xf32> -> vector<4x288xf32>
    %c0_143 = arith.constant 0 : index
    %c0_144 = arith.constant 0 : index
    %210 = vector.load %arg8[%c0_143, %c0_144] : memref<4x1xf32, #tpu.memory_space<vmem>>, vector<4x1xf32>
    %211 = vector.broadcast %210 : vector<4x1xf32> to vector<4x288xf32>
    %212 = arith.addf %209, %211 : vector<4x288xf32>
    %213 = vector.broadcast %92 : vector<1x288xf32> to vector<4x288xf32>
    %214 = arith.mulf %212, %213 : vector<4x288xf32>
    %cst_145 = arith.constant dense<0.000000e+00> : vector<4xf32>
    %215 = vector.multi_reduction <add>, %214, %cst_145 [1] : vector<4x288xf32> to vector<4xf32>
    %216 = vector.shape_cast %215 : vector<4xf32> to vector<4x1xf32>
    %cst_146 = arith.constant 3.906250e-03 : f32
    %217 = vector.broadcast %cst_146 : f32 to vector<4x1xf32>
    %218 = arith.mulf %216, %217 : vector<4x1xf32>
    %219 = vector.broadcast %218 : vector<4x1xf32> to vector<4x288xf32>
    %220 = arith.subf %212, %219 : vector<4x288xf32>
    %221 = arith.mulf %220, %220 : vector<4x288xf32>
    %222 = vector.broadcast %92 : vector<1x288xf32> to vector<4x288xf32>
    %223 = arith.mulf %221, %222 : vector<4x288xf32>
    %cst_147 = arith.constant dense<0.000000e+00> : vector<4xf32>
    %224 = vector.multi_reduction <add>, %223, %cst_147 [1] : vector<4x288xf32> to vector<4xf32>
    %225 = vector.shape_cast %224 : vector<4xf32> to vector<4x1xf32>
    %cst_148 = arith.constant 3.906250e-03 : f32
    %226 = vector.broadcast %cst_148 : f32 to vector<4x1xf32>
    %227 = arith.mulf %225, %226 : vector<4x1xf32>
    %cst_149 = arith.constant 9.99999974E-6 : f32
    %228 = vector.broadcast %cst_149 : f32 to vector<4x1xf32>
    %229 = arith.addf %227, %228 : vector<4x1xf32>
    %230 = math.rsqrt %229 : vector<4x1xf32>
    %231 = vector.broadcast %230 : vector<4x1xf32> to vector<4x288xf32>
    %232 = arith.mulf %220, %231 : vector<4x288xf32>
    %cst_150 = arith.constant 0.707106769 : f32
    %233 = vector.broadcast %cst_150 : f32 to vector<4x288xf32>
    %234 = arith.mulf %232, %233 : vector<4x288xf32>
    %cst_151 = arith.constant -3.8325069 : f32
    %cst_152 = arith.constant 3.8325069 : f32
    %235 = vector.broadcast %cst_151 : f32 to vector<4x288xf32>
    %236 = arith.maximumf %235, %234 : vector<4x288xf32>
    %237 = vector.broadcast %cst_152 : f32 to vector<4x288xf32>
    %238 = arith.minimumf %237, %236 : vector<4x288xf32>
    %239 = arith.mulf %238, %238 : vector<4x288xf32>
    %cst_153 = arith.constant 2.29050653E-4 : f32
    %240 = vector.broadcast %cst_153 : f32 to vector<4x288xf32>
    %241 = arith.mulf %240, %239 : vector<4x288xf32>
    %cst_154 = arith.constant 0.00340829091 : f32
    %242 = vector.broadcast %cst_154 : f32 to vector<4x288xf32>
    %243 = arith.addf %241, %242 : vector<4x288xf32>
    %244 = arith.mulf %243, %239 : vector<4x288xf32>
    %cst_155 = arith.constant 0.0509556942 : f32
    %245 = vector.broadcast %cst_155 : f32 to vector<4x288xf32>
    %246 = arith.addf %244, %245 : vector<4x288xf32>
    %247 = arith.mulf %246, %239 : vector<4x288xf32>
    %cst_156 = arith.constant 0.185208321 : f32
    %248 = vector.broadcast %cst_156 : f32 to vector<4x288xf32>
    %249 = arith.addf %247, %248 : vector<4x288xf32>
    %250 = arith.mulf %249, %239 : vector<4x288xf32>
    %cst_157 = arith.constant 1.12837911 : f32
    %251 = vector.broadcast %cst_157 : f32 to vector<4x288xf32>
    %252 = arith.addf %250, %251 : vector<4x288xf32>
    %cst_158 = arith.constant -1.17916031E-7 : f32
    %253 = vector.broadcast %cst_158 : f32 to vector<4x288xf32>
    %254 = arith.mulf %253, %239 : vector<4x288xf32>
    %cst_159 = arith.constant 2.35479656E-5 : f32
    %255 = vector.broadcast %cst_159 : f32 to vector<4x288xf32>
    %256 = arith.addf %254, %255 : vector<4x288xf32>
    %257 = arith.mulf %256, %239 : vector<4x288xf32>
    %cst_160 = arith.constant 0.00101796258 : f32
    %258 = vector.broadcast %cst_160 : f32 to vector<4x288xf32>
    %259 = arith.addf %257, %258 : vector<4x288xf32>
    %260 = arith.mulf %259, %239 : vector<4x288xf32>
    %cst_161 = arith.constant 0.0140704699 : f32
    %261 = vector.broadcast %cst_161 : f32 to vector<4x288xf32>
    %262 = arith.addf %260, %261 : vector<4x288xf32>
    %263 = arith.mulf %262, %239 : vector<4x288xf32>
    %cst_162 = arith.constant 0.110985048 : f32
    %264 = vector.broadcast %cst_162 : f32 to vector<4x288xf32>
    %265 = arith.addf %263, %264 : vector<4x288xf32>
    %266 = arith.mulf %265, %239 : vector<4x288xf32>
    %cst_163 = arith.constant 0.497469246 : f32
    %267 = vector.broadcast %cst_163 : f32 to vector<4x288xf32>
    %268 = arith.addf %266, %267 : vector<4x288xf32>
    %269 = arith.mulf %268, %239 : vector<4x288xf32>
    %cst_164 = arith.constant 1.000000e+00 : f32
    %270 = vector.broadcast %cst_164 : f32 to vector<4x288xf32>
    %271 = arith.addf %269, %270 : vector<4x288xf32>
    %272 = arith.mulf %238, %252 : vector<4x288xf32>
    %273 = tpu.reciprocal %271 {approx = true} : vector<4x288xf32> -> vector<4x288xf32>
    %274 = arith.mulf %272, %273 : vector<4x288xf32>
    %cst_165 = arith.constant 5.000000e-01 : f32
    %275 = vector.broadcast %cst_165 : f32 to vector<4x288xf32>
    %276 = arith.mulf %275, %232 : vector<4x288xf32>
    %cst_166 = arith.constant 1.000000e+00 : f32
    %277 = vector.broadcast %cst_166 : f32 to vector<4x288xf32>
    %278 = arith.addf %277, %274 : vector<4x288xf32>
    %279 = arith.mulf %276, %278 : vector<4x288xf32>
    %280 = vector.extract_strided_slice %279 {offsets = [0, 0], sizes = [4, 16], strides = [1, 1]} : vector<4x288xf32> to vector<4x16xf32>
    %c0_167 = arith.constant 0 : index
    %c0_168 = arith.constant 0 : index
    %c0_169 = arith.constant 0 : index
    %c0_170 = arith.constant 0 : index
    %281 = vector.load %arg13[%c0_167, %c0_168, %c0_169, %c0_170] : memref<1x4x16x16xf32, #tpu.memory_space<vmem>>, vector<1x4x1x16xf32>
    %282 = vector.shape_cast %281 : vector<1x4x1x16xf32> to vector<4x16xf32>
    %283 = vector.shape_cast %280 : vector<4x16xf32> to vector<1x4x1x16xf32>
    tpu.vector_store %arg13[%c0_167, %c0_168, %c0_169, %c0_170], %283 {strides = array<i32>} : memref<1x4x16x16xf32, #tpu.memory_space<vmem>>, vector<1x4x1x16xf32>,
    %284 = vector.extract_strided_slice %279 {offsets = [0, 18], sizes = [4, 16], strides = [1, 1]} : vector<4x288xf32> to vector<4x16xf32>
    %c0_171 = arith.constant 0 : index
    %c0_172 = arith.constant 0 : index
    %c1_173 = arith.constant 1 : index
    %c0_174 = arith.constant 0 : index
    %285 = vector.load %arg13[%c0_171, %c0_172, %c1_173, %c0_174] : memref<1x4x16x16xf32, #tpu.memory_space<vmem>>, vector<1x4x1x16xf32>
    %286 = vector.shape_cast %285 : vector<1x4x1x16xf32> to vector<4x16xf32>
    %287 = vector.shape_cast %284 : vector<4x16xf32> to vector<1x4x1x16xf32>
    tpu.vector_store %arg13[%c0_171, %c0_172, %c1_173, %c0_174], %287 {strides = array<i32>} : memref<1x4x16x16xf32, #tpu.memory_space<vmem>>, vector<1x4x1x16xf32>,
    %288 = vector.extract_strided_slice %279 {offsets = [0, 36], sizes = [4, 16], strides = [1, 1]} : vector<4x288xf32> to vector<4x16xf32>
    %c0_175 = arith.constant 0 : index
    %c0_176 = arith.constant 0 : index
    %c2_177 = arith.constant 2 : index
    %c0_178 = arith.constant 0 : index
    %289 = vector.load %arg13[%c0_175, %c0_176, %c2_177, %c0_178] : memref<1x4x16x16xf32, #tpu.memory_space<vmem>>, vector<1x4x1x16xf32>
    %290 = vector.shape_cast %289 : vector<1x4x1x16xf32> to vector<4x16xf32>
    %291 = vector.shape_cast %288 : vector<4x16xf32> to vector<1x4x1x16xf32>
    tpu.vector_store %arg13[%c0_175, %c0_176, %c2_177, %c0_178], %291 {strides = array<i32>} : memref<1x4x16x16xf32, #tpu.memory_space<vmem>>, vector<1x4x1x16xf32>,
    %292 = vector.extract_strided_slice %279 {offsets = [0, 54], sizes = [4, 16], strides = [1, 1]} : vector<4x288xf32> to vector<4x16xf32>
    %c0_179 = arith.constant 0 : index
    %c0_180 = arith.constant 0 : index
    %c3 = arith.constant 3 : index
    %c0_181 = arith.constant 0 : index
    %293 = vector.load %arg13[%c0_179, %c0_180, %c3, %c0_181] : memref<1x4x16x16xf32, #tpu.memory_space<vmem>>, vector<1x4x1x16xf32>
    %294 = vector.shape_cast %293 : vector<1x4x1x16xf32> to vector<4x16xf32>
    %295 = vector.shape_cast %292 : vector<4x16xf32> to vector<1x4x1x16xf32>
    tpu.vector_store %arg13[%c0_179, %c0_180, %c3, %c0_181], %295 {strides = array<i32>} : memref<1x4x16x16xf32, #tpu.memory_space<vmem>>, vector<1x4x1x16xf32>,
    %296 = vector.extract_strided_slice %279 {offsets = [0, 72], sizes = [4, 16], strides = [1, 1]} : vector<4x288xf32> to vector<4x16xf32>
    %c0_182 = arith.constant 0 : index
    %c0_183 = arith.constant 0 : index
    %c4_184 = arith.constant 4 : index
    %c0_185 = arith.constant 0 : index
    %297 = vector.load %arg13[%c0_182, %c0_183, %c4_184, %c0_185] : memref<1x4x16x16xf32, #tpu.memory_space<vmem>>, vector<1x4x1x16xf32>
    %298 = vector.shape_cast %297 : vector<1x4x1x16xf32> to vector<4x16xf32>
    %299 = vector.shape_cast %296 : vector<4x16xf32> to vector<1x4x1x16xf32>
    tpu.vector_store %arg13[%c0_182, %c0_183, %c4_184, %c0_185], %299 {strides = array<i32>} : memref<1x4x16x16xf32, #tpu.memory_space<vmem>>, vector<1x4x1x16xf32>,
    %300 = vector.extract_strided_slice %279 {offsets = [0, 90], sizes = [4, 16], strides = [1, 1]} : vector<4x288xf32> to vector<4x16xf32>
    %c0_186 = arith.constant 0 : index
    %c0_187 = arith.constant 0 : index
    %c5 = arith.constant 5 : index
    %c0_188 = arith.constant 0 : index
    %301 = vector.load %arg13[%c0_186, %c0_187, %c5, %c0_188] : memref<1x4x16x16xf32, #tpu.memory_space<vmem>>, vector<1x4x1x16xf32>
    %302 = vector.shape_cast %301 : vector<1x4x1x16xf32> to vector<4x16xf32>
    %303 = vector.shape_cast %300 : vector<4x16xf32> to vector<1x4x1x16xf32>
    tpu.vector_store %arg13[%c0_186, %c0_187, %c5, %c0_188], %303 {strides = array<i32>} : memref<1x4x16x16xf32, #tpu.memory_space<vmem>>, vector<1x4x1x16xf32>,
    %304 = vector.extract_strided_slice %279 {offsets = [0, 108], sizes = [4, 16], strides = [1, 1]} : vector<4x288xf32> to vector<4x16xf32>
    %c0_189 = arith.constant 0 : index
    %c0_190 = arith.constant 0 : index
    %c6 = arith.constant 6 : index
    %c0_191 = arith.constant 0 : index
    %305 = vector.load %arg13[%c0_189, %c0_190, %c6, %c0_191] : memref<1x4x16x16xf32, #tpu.memory_space<vmem>>, vector<1x4x1x16xf32>
    %306 = vector.shape_cast %305 : vector<1x4x1x16xf32> to vector<4x16xf32>
    %307 = vector.shape_cast %304 : vector<4x16xf32> to vector<1x4x1x16xf32>
    tpu.vector_store %arg13[%c0_189, %c0_190, %c6, %c0_191], %307 {strides = array<i32>} : memref<1x4x16x16xf32, #tpu.memory_space<vmem>>, vector<1x4x1x16xf32>,
    %308 = vector.extract_strided_slice %279 {offsets = [0, 126], sizes = [4, 16], strides = [1, 1]} : vector<4x288xf32> to vector<4x16xf32>
    %c0_192 = arith.constant 0 : index
    %c0_193 = arith.constant 0 : index
    %c7 = arith.constant 7 : index
    %c0_194 = arith.constant 0 : index
    %309 = vector.load %arg13[%c0_192, %c0_193, %c7, %c0_194] : memref<1x4x16x16xf32, #tpu.memory_space<vmem>>, vector<1x4x1x16xf32>
    %310 = vector.shape_cast %309 : vector<1x4x1x16xf32> to vector<4x16xf32>
    %311 = vector.shape_cast %308 : vector<4x16xf32> to vector<1x4x1x16xf32>
    tpu.vector_store %arg13[%c0_192, %c0_193, %c7, %c0_194], %311 {strides = array<i32>} : memref<1x4x16x16xf32, #tpu.memory_space<vmem>>, vector<1x4x1x16xf32>,
    %312 = vector.extract_strided_slice %279 {offsets = [0, 144], sizes = [4, 16], strides = [1, 1]} : vector<4x288xf32> to vector<4x16xf32>
    %c0_195 = arith.constant 0 : index
    %c0_196 = arith.constant 0 : index
    %c8_197 = arith.constant 8 : index
    %c0_198 = arith.constant 0 : index
    %313 = vector.load %arg13[%c0_195, %c0_196, %c8_197, %c0_198] : memref<1x4x16x16xf32, #tpu.memory_space<vmem>>, vector<1x4x1x16xf32>
    %314 = vector.shape_cast %313 : vector<1x4x1x16xf32> to vector<4x16xf32>
    %315 = vector.shape_cast %312 : vector<4x16xf32> to vector<1x4x1x16xf32>
    tpu.vector_store %arg13[%c0_195, %c0_196, %c8_197, %c0_198], %315 {strides = array<i32>} : memref<1x4x16x16xf32, #tpu.memory_space<vmem>>, vector<1x4x1x16xf32>,
    %316 = vector.extract_strided_slice %279 {offsets = [0, 162], sizes = [4, 16], strides = [1, 1]} : vector<4x288xf32> to vector<4x16xf32>
    %c0_199 = arith.constant 0 : index
    %c0_200 = arith.constant 0 : index
    %c9 = arith.constant 9 : index
    %c0_201 = arith.constant 0 : index
    %317 = vector.load %arg13[%c0_199, %c0_200, %c9, %c0_201] : memref<1x4x16x16xf32, #tpu.memory_space<vmem>>, vector<1x4x1x16xf32>
    %318 = vector.shape_cast %317 : vector<1x4x1x16xf32> to vector<4x16xf32>
    %319 = vector.shape_cast %316 : vector<4x16xf32> to vector<1x4x1x16xf32>
    tpu.vector_store %arg13[%c0_199, %c0_200, %c9, %c0_201], %319 {strides = array<i32>} : memref<1x4x16x16xf32, #tpu.memory_space<vmem>>, vector<1x4x1x16xf32>,
    %320 = vector.extract_strided_slice %279 {offsets = [0, 180], sizes = [4, 16], strides = [1, 1]} : vector<4x288xf32> to vector<4x16xf32>
    %c0_202 = arith.constant 0 : index
    %c0_203 = arith.constant 0 : index
    %c10 = arith.constant 10 : index
    %c0_204 = arith.constant 0 : index
    %321 = vector.load %arg13[%c0_202, %c0_203, %c10, %c0_204] : memref<1x4x16x16xf32, #tpu.memory_space<vmem>>, vector<1x4x1x16xf32>
    %322 = vector.shape_cast %321 : vector<1x4x1x16xf32> to vector<4x16xf32>
    %323 = vector.shape_cast %320 : vector<4x16xf32> to vector<1x4x1x16xf32>
    tpu.vector_store %arg13[%c0_202, %c0_203, %c10, %c0_204], %323 {strides = array<i32>} : memref<1x4x16x16xf32, #tpu.memory_space<vmem>>, vector<1x4x1x16xf32>,
    %324 = vector.extract_strided_slice %279 {offsets = [0, 198], sizes = [4, 16], strides = [1, 1]} : vector<4x288xf32> to vector<4x16xf32>
    %c0_205 = arith.constant 0 : index
    %c0_206 = arith.constant 0 : index
    %c11 = arith.constant 11 : index
    %c0_207 = arith.constant 0 : index
    %325 = vector.load %arg13[%c0_205, %c0_206, %c11, %c0_207] : memref<1x4x16x16xf32, #tpu.memory_space<vmem>>, vector<1x4x1x16xf32>
    %326 = vector.shape_cast %325 : vector<1x4x1x16xf32> to vector<4x16xf32>
    %327 = vector.shape_cast %324 : vector<4x16xf32> to vector<1x4x1x16xf32>
    tpu.vector_store %arg13[%c0_205, %c0_206, %c11, %c0_207], %327 {strides = array<i32>} : memref<1x4x16x16xf32, #tpu.memory_space<vmem>>, vector<1x4x1x16xf32>,
    %328 = vector.extract_strided_slice %279 {offsets = [0, 216], sizes = [4, 16], strides = [1, 1]} : vector<4x288xf32> to vector<4x16xf32>
    %c0_208 = arith.constant 0 : index
    %c0_209 = arith.constant 0 : index
    %c12_210 = arith.constant 12 : index
    %c0_211 = arith.constant 0 : index
    %329 = vector.load %arg13[%c0_208, %c0_209, %c12_210, %c0_211] : memref<1x4x16x16xf32, #tpu.memory_space<vmem>>, vector<1x4x1x16xf32>
    %330 = vector.shape_cast %329 : vector<1x4x1x16xf32> to vector<4x16xf32>
    %331 = vector.shape_cast %328 : vector<4x16xf32> to vector<1x4x1x16xf32>
    tpu.vector_store %arg13[%c0_208, %c0_209, %c12_210, %c0_211], %331 {strides = array<i32>} : memref<1x4x16x16xf32, #tpu.memory_space<vmem>>, vector<1x4x1x16xf32>,
    %332 = vector.extract_strided_slice %279 {offsets = [0, 234], sizes = [4, 16], strides = [1, 1]} : vector<4x288xf32> to vector<4x16xf32>
    %c0_212 = arith.constant 0 : index
    %c0_213 = arith.constant 0 : index
    %c13 = arith.constant 13 : index
    %c0_214 = arith.constant 0 : index
    %333 = vector.load %arg13[%c0_212, %c0_213, %c13, %c0_214] : memref<1x4x16x16xf32, #tpu.memory_space<vmem>>, vector<1x4x1x16xf32>
    %334 = vector.shape_cast %333 : vector<1x4x1x16xf32> to vector<4x16xf32>
    %335 = vector.shape_cast %332 : vector<4x16xf32> to vector<1x4x1x16xf32>
    tpu.vector_store %arg13[%c0_212, %c0_213, %c13, %c0_214], %335 {strides = array<i32>} : memref<1x4x16x16xf32, #tpu.memory_space<vmem>>, vector<1x4x1x16xf32>,
    %336 = vector.extract_strided_slice %279 {offsets = [0, 252], sizes = [4, 16], strides = [1, 1]} : vector<4x288xf32> to vector<4x16xf32>
    %c0_215 = arith.constant 0 : index
    %c0_216 = arith.constant 0 : index
    %c14 = arith.constant 14 : index
    %c0_217 = arith.constant 0 : index
    %337 = vector.load %arg13[%c0_215, %c0_216, %c14, %c0_217] : memref<1x4x16x16xf32, #tpu.memory_space<vmem>>, vector<1x4x1x16xf32>
    %338 = vector.shape_cast %337 : vector<1x4x1x16xf32> to vector<4x16xf32>
    %339 = vector.shape_cast %336 : vector<4x16xf32> to vector<1x4x1x16xf32>
    tpu.vector_store %arg13[%c0_215, %c0_216, %c14, %c0_217], %339 {strides = array<i32>} : memref<1x4x16x16xf32, #tpu.memory_space<vmem>>, vector<1x4x1x16xf32>,
    %340 = vector.extract_strided_slice %279 {offsets = [0, 270], sizes = [4, 16], strides = [1, 1]} : vector<4x288xf32> to vector<4x16xf32>
    %c0_218 = arith.constant 0 : index
    %c0_219 = arith.constant 0 : index
    %c15 = arith.constant 15 : index
    %c0_220 = arith.constant 0 : index
    %341 = vector.load %arg13[%c0_218, %c0_219, %c15, %c0_220] : memref<1x4x16x16xf32, #tpu.memory_space<vmem>>, vector<1x4x1x16xf32>
    %342 = vector.shape_cast %341 : vector<1x4x1x16xf32> to vector<4x16xf32>
    %343 = vector.shape_cast %340 : vector<4x16xf32> to vector<1x4x1x16xf32>
    tpu.vector_store %arg13[%c0_218, %c0_219, %c15, %c0_220], %343 {strides = array<i32>} : memref<1x4x16x16xf32, #tpu.memory_space<vmem>>, vector<1x4x1x16xf32>,
    return
  }
  func.func @transform_0(%arg0: i32) -> (i32, i32, i32) {
    %c0_i32 = arith.constant 0 : i32
    %c0_i32_0 = arith.constant 0 : i32
    %c0_i32_1 = arith.constant 0 : i32
    return %arg0, %c0_i32, %c0_i32_0 : i32, i32, i32
  }
  func.func @transform_1(%arg0: i32) -> (i32, i32, i32) {
    %c0_i32 = arith.constant 0 : i32
    %c0_i32_0 = arith.constant 0 : i32
    %c0_i32_1 = arith.constant 0 : i32
    return %arg0, %c0_i32, %c0_i32_0 : i32, i32, i32
  }
  func.func @transform_2(%arg0: i32) -> (i32, i32) {
    %c0_i32 = arith.constant 0 : i32
    %c0_i32_0 = arith.constant 0 : i32
    %c0_i32_1 = arith.constant 0 : i32
    return %c0_i32, %c0_i32_0 : i32, i32
  }
  func.func @transform_3(%arg0: i32) -> (i32, i32) {
    %c0_i32 = arith.constant 0 : i32
    %c0_i32_0 = arith.constant 0 : i32
    %c0_i32_1 = arith.constant 0 : i32
    return %c0_i32, %c0_i32_0 : i32, i32
  }
  func.func @transform_4(%arg0: i32) -> (i32, i32) {
    %c0_i32 = arith.constant 0 : i32
    %c0_i32_0 = arith.constant 0 : i32
    %c0_i32_1 = arith.constant 0 : i32
    return %c0_i32, %c0_i32_0 : i32, i32
  }
  func.func @transform_5(%arg0: i32) -> (i32, i32) {
    %c0_i32 = arith.constant 0 : i32
    %c0_i32_0 = arith.constant 0 : i32
    %c0_i32_1 = arith.constant 0 : i32
    return %c0_i32, %c0_i32_0 : i32, i32
  }
  func.func @transform_6(%arg0: i32) -> (i32, i32) {
    %c0_i32 = arith.constant 0 : i32
    %c0_i32_0 = arith.constant 0 : i32
    %c0_i32_1 = arith.constant 0 : i32
    return %c0_i32, %c0_i32_0 : i32, i32
  }
  func.func @transform_7(%arg0: i32) -> (i32, i32) {
    %c0_i32 = arith.constant 0 : i32
    %c0_i32_0 = arith.constant 0 : i32
    %c0_i32_1 = arith.constant 0 : i32
    return %c0_i32, %c0_i32_0 : i32, i32
  }
  func.func @transform_8(%arg0: i32) -> (i32, i32) {
    %c0_i32 = arith.constant 0 : i32
    %c0_i32_0 = arith.constant 0 : i32
    %c0_i32_1 = arith.constant 0 : i32
    return %c0_i32, %c0_i32_0 : i32, i32
  }
  func.func @transform_9(%arg0: i32) -> (i32, i32) {
    %c0_i32 = arith.constant 0 : i32
    %c0_i32_0 = arith.constant 0 : i32
    %c0_i32_1 = arith.constant 0 : i32
    return %c0_i32, %c0_i32_0 : i32, i32
  }
  func.func @transform_10(%arg0: i32) -> (i32, i32) {
    %c0_i32 = arith.constant 0 : i32
    %c0_i32_0 = arith.constant 0 : i32
    %c0_i32_1 = arith.constant 0 : i32
    return %c0_i32, %c0_i32_0 : i32, i32
  }
  func.func @transform_11(%arg0: i32) -> (i32, i32) {
    %c0_i32 = arith.constant 0 : i32
    %c0_i32_0 = arith.constant 0 : i32
    %c0_i32_1 = arith.constant 0 : i32
    return %c0_i32, %c0_i32_0 : i32, i32
  }
  func.func @transform_12(%arg0: i32) -> (i32, i32, i32, i32) {
    %c0_i32 = arith.constant 0 : i32
    %c0_i32_0 = arith.constant 0 : i32
    %c0_i32_1 = arith.constant 0 : i32
    %c0_i32_2 = arith.constant 0 : i32
    return %arg0, %c0_i32, %c0_i32_0, %c0_i32_1 : i32, i32, i32, i32
  }
}

</mosaic_0001>

<bundles_post_ra>
// kernel: decoder_forward.1
= control target key start
LH: loop header
LB: loop body
LE: loop exit
PB: predicated region body
PF: predicated region fallthrough
CT: control target
= control target key end

     0   :  { %s5288_s0 = inlined_call_operand.vmem [shape: f32[2,8,64], index: 0, kind: input, shape index: {}]   ;;  %s5289_s1 = inlined_call_operand.vmem [shape: f32[2,4,256], index: 1, kind: input, shape index: {}]   ;;  %s5290_s2 = inlined_call_operand.vmem [shape: bf16[16,8], index: 2, kind: input, shape index: {}]   ;;  %s5291_s3 = inlined_call_operand.vmem [shape: f32[4,1], index: 3, kind: input, shape index: {}]   ;;  %s5292_s4 = inlined_call_operand.vmem [shape: bf16[4,72], index: 4, kind: input, shape index: {}]   ;;  %s5293_s5 = inlined_call_operand.vmem [shape: f32[4,1], index: 5, kind: input, shape index: {}]   ;;  %s5294_s6 = inlined_call_operand.vmem [shape: bf16[4,36], index: 6, kind: input, shape index: {}]   ;;  %s5295_s7 = inlined_call_operand.vmem [shape: f32[4,1], index: 7, kind: input, shape index: {}]   ;;  %s5296_s8 = inlined_call_operand.hbm [shape: bf16[256,326], index: 8, kind: input, shape index: {}]   ;;  %s5297_s9 = inlined_call_operand.hbm [shape: bf16[256,326], index: 9, kind: input, shape index: {}]   ;;  %s5298_s10 = inlined_call_operand.hbm [shape: bf16[288,326], index: 10, kind: input, shape index: {}]   ;;  %s5299_s11 = inlined_call_operand.vmem [shape: f32[1,288], index: 11, kind: input, shape index: {}]   ;;  %s5300_s12 = inlined_call_operand.hbm [shape: f32[2,4,16,16], index: 12, kind: output, shape index: {}]  }
   0x1   :  { %5306 = sst [smem:[#allocation21_spill]] %s5296_s8 }
   0x2   :  { %5307 = sst [smem:[#allocation22_spill]] %s5297_s9 }
   0x3   :  { %17 = vsyncpa [#allocation8], 0 }
   0x4   :  { %18 = vsyncpa [#allocation11], 0 }
   0x5   :  { %19 = vsyncpa [#allocation9], 0 }
   0x6   :  { %21 = vsyncpa [#allocation9 + $0x1], 0  ;;  %s4513_s21 = smov 0   ;;  %s4515_s22 = smov 0  }
   0x7   :  { %s4517_s23 = smov 0   ;;  %s4519_s24 = smov 0  }
   0x8 LB: > { %5308 = sst [smem:[#allocation17_spill]] %s4411_s23  ;;  %s4534_s25 = sadd.s32 4294967295, %s4415_s24   ;;  %s4415_s24 = sphi %s4519_s24, %s5325_s24   ;;  %s4411_s23 = sphi %s4517_s23, %s5327_s23   ;;  %s4407_s22 = sphi %s4515_s22, %s5329_s22   ;;  %s4403_s21 = sphi %s4513_s21, %s5328_s21  }
   0x9   : > { %s3252_s26 = sadd.s32 4294967294, %s4415_s24   ;;  %s4538_s27 = sadd.s32 1, %s4415_s24  }
   0xa   : > { %5309 = sst [smem:[#allocation18_spill]] %s4538_s27  ;;  %s296_s28 = sadd.s32 1, %s4411_s23 }
   0xb   : > { %s293_s29 = ssub.s32 %s4415_s24, %s4538_s27  ;;  %p306_p0 = scmp.ne.s32.totalorder %s4411_s23, %s4407_s22 }
   0xc   : > { %p294_p1 = scmp.eq.s32.totalorder %s293_s29, 0  ;;  %p307_p2 = scmp.eq.s32.totalorder %s4534_s25, 1 }
   0xd   : > { %p312_p3 = scmp.ne.s32.totalorder %s4407_s22, %s4403_s21  ;;  %p313_p4 = scmp.eq.s32.totalorder %s3252_s26, 1 }
   0xe   : > { %s4549_s30 = scalar_select %p294_p1, %s4411_s23, %s296_s28  }
   0xf   : > { %p4551_p5 = por %p307_p2, %p306_p0  ;;  %p4555_p6 = por %p313_p4, %p312_p3 }
  0x10   : > { %5310 = sst [smem:[#allocation19_spill]] %s4549_s30  ;;  %p3253_p7 = scmp.ge.s32.totalorder %s4415_s24, 1 }
  0x11   : > { %s5312_s14 = scalar_select %p4555_p6, 1, 0 }
  0x12   : > { %p320_p8 = scmp.lt.s32.totalorder %s4415_s24, 3  ;;  %p4163_p9 = scmp.eq.s32.totalorder %s4534_s25, 0 }
  0x13   : > { %5313 = sst [smem:[#allocation20_spill]] %s5312_s14  ;;  %s4417_s29 = smov [#allocation10]  }
  0x14   : > { %p4562_p10 = pnand %p3253_p7, %p320_p8  ;;  %s5315_s9 = sld [smem:[#allocation22_spill]] }
  0x15   : > { %s5316_s8 = sld [smem:[#allocation21_spill]]  ;;  %s365_s30 = sshll.u32 %s4417_s29, 4  ;;  %s366_s30 = int_to_ptr.vmem [resolvable:$true] %s365_s30 }
  0x16   : > { %p4149_p11 = pneg %p4562_p10  ;;  %s4418_s16 = smov 192  }
  0x17   : > { %s4419_s17 = smov 12   ;;  %s4421_s27 = smov [#allocation12]  }
  0x18   : > { %p4576_p12 = pnand %p4163_p9, %p4149_p11  ;;  %s379_s14 = sshll.u32 %s4421_s27, 4  ;;  %s380_s14 = int_to_ptr.vmem [resolvable:$true] %s379_s14 }
  0x1a   : > { %s363_s18 = sshll.u32 %s5315_s9, 4  ;;  %s4420_s9 = smov [#allocation7]   ;;  %s364_s18 = int_to_ptr.hbm [resolvable:$true] %s363_s18 }
  0x1b   : > { %s349_s26 = sshll.u32 %s5316_s8, 4  ;;  %s351_s23 = sshll.u32 %s4420_s9, 4  ;;  %s350_s26 = int_to_ptr.hbm [resolvable:$true] %s349_s26  ;;  %s352_s23 = int_to_ptr.vmem [resolvable:$true] %s351_s23 }
  0x1c   : > { %4155 = dma.hbm_to_vmem [thread:$0]  (!%p4576_p12), %s364_s18, 6144, %s366_s30, [#allocation11], %s4418_s16, %s4418_s16, %s4419_s17  }
  0x1d   : > { %s377_s8 = sshll.u32 %s5298_s10, 4  ;;  %413 = sbr.rel (%p4562_p10) target bundleno = 2703 (0xa8f), region = 68  ;;  %s378_s8 = int_to_ptr.hbm [resolvable:$true] %s377_s8 }
  0x1e   : > { %4152 = dma.hbm_to_vmem [thread:$0]  (!%p4576_p12), %s350_s26, 6144, %s352_s23, [#allocation8], %s4418_s16, %s4418_s16, %s4419_s17  }
  0x1f   : > { %4158 = dma.hbm_to_vmem [thread:$0]  (!%p4576_p12), %s378_s8, 6912, %s380_s14, [#allocation11], %s4418_s16, %s4418_s16, %s4419_s17  }
  0x22   : > { %4390 = dma.done.wait (%p4163_p9), [#allocation8], 6144  }
  0x23   : > { %4392 = vsyncadd (%p4163_p9), [#allocation8], 4294961152 }
  0x24   : > { %4394 = dma.done.wait (%p4163_p9), [#allocation11], 13056  }
  0x25   : > { %4396 = vsyncadd (%p4163_p9), [#allocation11], 4294954240  ;;  %p470_p13 = scmp.lt.s32.totalorder %s4534_s25, 1  ;;  %vm493_vm0 = vcmask 1043456   ;;  %v3965_v3 = vld [vmem:[%s5290_s2] sm:$0xff]  ;;  %vm489_vm1 = vcmask 64512  }
  0x26   : > { %v532_v4 = vld [vmem:[%s5291_s3] sm:$0xf]  ;;  %v4422_v5 = vmov 0   ;;  %vm511_vm2 = vcmask 519168   ;;  %s4423_s28 = smov 64   ;;  %vm520_vm3 = vcmask 1043968  }
  0x27   : > { %s4601_s9 = scalar_select %p470_p13, %s4534_s25, 1  ;;  %4233 = vset.pattern.permute.xlu1 %v4422_v5  ;;  %4234 = vset.pattern.permute.xlu0 %v4422_v5  ;;  %v4424_v11 = vmov 839922192   ;;  %v3358_v34 = vld [vmem:[#allocation7 + $0xa8] sm:$0xf]  ;;  %vm1032_vm7 = vcmask 566272  }
  0x28   : > { %535 = vperm.xlu1 %4233, %v532_v4   ;;  %v538_v12 = vunpack.c.l.s4 %v4424_v11  ;;  %v3988_v35 = vld [vmem:[#allocation7 + $0xb0] sm:$0xf0]  ;;  %v3454_v36 = vld [vmem:[#allocation7 + $0x168] sm:$0xf]  ;;  %v3987_v39 = vld [vmem:[#allocation7 + $0xac] sm:$0xf] }
  0x29   : > { %s3263_s8 = sshll.u32 %s4601_s9, 3  ;;  %v3359_v37 = vor.u32 %v3988_v35, %v3358_v34  ;;  %v4012_v38 = vld [vmem:[#allocation7 + $0x170] sm:$0xf0]  ;;  %v3360_v40 = vld [vmem:[#allocation7 + $0xb4] sm:$0xf0]  ;;  %vm1450_vm8 = vcmask 568322  }
  0x2a   : > { %s473_s30 = scalar_lea.vmem %s5288_s0, %s3263_s8  ;;  %v4616_v14 = vunpack.c.0.s8 %v538_v12  ;;  %v3455_v41 = vor.u32 %v4012_v38, %v3454_v36  ;;  %v3363_v42 = vor.u32 %v3987_v39, %v3360_v40  ;;  %v4011_v43 = vld [vmem:[#allocation7 + $0x16c] sm:$0xf]  ;;  %v3456_v44 = vld [vmem:[#allocation7 + $0x174] sm:$0xf0]  ;;  %v3346_v46 = vld [vmem:[#allocation7 + $0x90] sm:$0xf]  ;;  %s478_s17 = scalar_lea.vmem %s5289_s1, %s3263_s8 }
  0x2b   : > { %v480_v0 = vld [vmem:[%s473_s30] sm:$0xff]  ;;  %v3459_v45 = vor.u32 %v4011_v43, %v3456_v44  ;;  %v3442_v48 = vld [vmem:[#allocation7 + $0x150] sm:$0xf]  ;;  %v3348_v52 = vld [vmem:[#allocation7 + $0x9c] sm:$0xf0]  ;;  %s4425_s19 = smov 90  }
  0x2c   : > { %v481_v1 = vpack.c.bf16 %v480_v0, %v480_v0  ;;  %964 = vmatpush.bf16.msra.mxu2 %v3455_v41  ;;  %977 = vmatpush.bf16.msra.mxu3 %v3363_v42  ;;  %v3985_v47 = vld [vmem:[#allocation7 + $0x98] sm:$0xf0]  ;;  %v3984_v51 = vld [vmem:[#allocation7 + $0x94] sm:$0xf]  ;;  %v3444_v56 = vld [vmem:[#allocation7 + $0x15c] sm:$0xf0] }
  0x2d   : > { %990 = vmatpush.bf16.msra.mxu0 %v3459_v45  ;;  %v3347_v49 = vor.u32 %v3985_v47, %v3346_v46  ;;  %v4009_v50 = vld [vmem:[#allocation7 + $0x158] sm:$0xf0]  ;;  %v3351_v54 = vor.u32 %v3984_v51, %v3348_v52  ;;  %v4008_v55 = vld [vmem:[#allocation7 + $0x154] sm:$0xf]  ;;  %v3334_v58 = vld [vmem:[#allocation7 + $0x78] sm:$0xf] }
  0x2e   : > { %v495_v2 = vsel %vm493_vm0, %v481_v1, 0  ;;  %v3443_v53 = vor.u32 %v4009_v50, %v3442_v48  ;;  %v3447_v57 = vor.u32 %v4008_v55, %v3444_v56  ;;  %v3982_v59 = vld [vmem:[#allocation7 + $0x80] sm:$0xf0]  ;;  %v3430_v60 = vld [vmem:[#allocation7 + $0x138] sm:$0xf]  ;;  %vm5305_vm9 = vcmask 257024  }
  0x2f   : > { %504 = vmatpush.bf16.msra.mxu1 %v495_v2  ;;  %v3335_v61 = vor.u32 %v3982_v59, %v3334_v58  ;;  %v4006_v62 = vld [vmem:[#allocation7 + $0x140] sm:$0xf0]  ;;  %v3981_v63 = vld [vmem:[#allocation7 + $0x7c] sm:$0xf]  ;;  %v3336_v0 = vld [vmem:[#allocation7 + $0x84] sm:$0xf0] }
  0x30   : > { %965 = vmatpush.bf16.msra.mxu2 %v3443_v53  ;;  %978 = vmatpush.bf16.msra.mxu3 %v3351_v54  ;;  %v3431_v1 = vor.u32 %v4006_v62, %v3430_v60  ;;  %v3339_v2 = vor.u32 %v3981_v63, %v3336_v0  ;;  %v3432_v4 = vld [vmem:[#allocation7 + $0x144] sm:$0xf0]  ;;  %v4003_v12 = vld [vmem:[#allocation7 + $0x128] sm:$0xf0]  ;;  %v3298_v35 = vld [vmem:[#allocation7 + $0x30] sm:$0xf] }
  0x31   : > { %991 = vmatpush.bf16.msra.mxu0 %v3447_v57  ;;  %v3973_v36 = vld [vmem:[#allocation7 + $0x38] sm:$0xf0]  ;;  %v3972_v40 = vld [vmem:[#allocation7 + $0x34] sm:$0xf]  ;;  %v3300_v41 = vld [vmem:[#allocation7 + $0x3c] sm:$0xf0] }
  0x32   : > { %3270 = vmatmul.msk.bf16.vlgmr.msra.gmra.mxu1 %vm489_vm1, %v3965_v3  ;;  %v4005_v3 = vld [vmem:[#allocation7 + $0x13c] sm:$0xf]  ;;  %v3299_v38 = vor.u32 %v3973_v36, %v3298_v35  ;;  %v3303_v43 = vor.u32 %v3972_v40, %v3300_v41  ;;  %v3996_v44 = vld [vmem:[#allocation7 + $0xf4] sm:$0xf]  ;;  %v3396_v45 = vld [vmem:[#allocation7 + $0xfc] sm:$0xf0] }
  0x33   : > { %951 = vmatpush.bf16.msrb.mxu1 %v3359_v37  ;;  %v3435_v5 = vor.u32 %v4005_v3, %v3432_v4  ;;  %v3394_v37 = vld [vmem:[#allocation7 + $0xf0] sm:$0xf]  ;;  %v3997_v39 = vld [vmem:[#allocation7 + $0xf8] sm:$0xf0]  ;;  %v3399_v47 = vor.u32 %v3996_v44, %v3396_v45  ;;  %v3970_v50 = vld [vmem:[#allocation7 + $0x20] sm:$0xf0] }
  0x34   : > { %966 = vmatpush.bf16.msra.mxu2 %v3431_v1  ;;  %979 = vmatpush.bf16.msra.mxu3 %v3339_v2  ;;  %v3395_v42 = vor.u32 %v3997_v39, %v3394_v37  ;;  %v3382_v51 = vld [vmem:[#allocation7 + $0xd8] sm:$0xf]  ;;  %v3994_v53 = vld [vmem:[#allocation7 + $0xe0] sm:$0xf0]  ;;  %v3969_v54 = vld [vmem:[#allocation7 + $0x1c] sm:$0xf] }
  0x35   : > { %992 = vmatpush.bf16.msra.mxu0 %v3435_v5  ;;  %v3383_v56 = vor.u32 %v3994_v53, %v3382_v51  ;;  %v3288_v57 = vld [vmem:[#allocation7 + $0x24] sm:$0xf0]  ;;  %v3993_v58 = vld [vmem:[#allocation7 + $0xdc] sm:$0xf]  ;;  %v3274_v63 = vld [vmem:[#allocation7] sm:$0xf] }
  0x36   : > { %v3384_v59 = vld [vmem:[#allocation7 + $0xe4] sm:$0xf0]  ;;  %v3291_v60 = vor.u32 %v3969_v54, %v3288_v57  ;;  %v3967_v0 = vld [vmem:[#allocation7 + $0x8] sm:$0xf0]  ;;  %v3370_v2 = vld [vmem:[#allocation7 + $0xc0] sm:$0xf] }
  0x37   : > { %952 = vmatpush.bf16.msrb.mxu1 %v3347_v49  ;;  %v3286_v49 = vld [vmem:[#allocation7 + $0x18] sm:$0xf]  ;;  %v3275_v1 = vor.u32 %v3967_v0, %v3274_v63  ;;  %v3991_v3 = vld [vmem:[#allocation7 + $0xc8] sm:$0xf0]  ;;  %v3966_v4 = vld [vmem:[#allocation7 + $0x4] sm:$0xf] }
  0x38   : > { %v3287_v52 = vor.u32 %v3970_v50, %v3286_v49  ;;  %v3538_v35 = vld [vmem:[#allocation10 + $0x90] sm:$0xf]  ;;  %v4033_v36 = vld [vmem:[#allocation10 + $0x98] sm:$0xf0]  ;;  %v3983_v44 = vld [vmem:[#allocation7 + $0x88] sm:$0xf0] }
  0x39   : > { %v3634_v39 = vld [vmem:[#allocation10 + $0x150] sm:$0xf]  ;;  %v4057_v40 = vld [vmem:[#allocation10 + $0x158] sm:$0xf0]  ;;  %v3438_v45 = vld [vmem:[#allocation7 + $0x140] sm:$0xf] }
  0x3a   : > { %v3622_v51 = vld [vmem:[#allocation10 + $0x138] sm:$0xf]  ;;  %v4054_v53 = vld [vmem:[#allocation10 + $0x140] sm:$0xf0]  ;;  %v4027_v63 = vld [vmem:[#allocation10 + $0x68] sm:$0xf0] }
  0x3b   : > { %953 = vmatpush.bf16.msrb.mxu1 %v3335_v61  ;;  %v3387_v61 = vor.u32 %v3993_v58, %v3384_v59  ;;  %v3623_v54 = vor.u32 %v4054_v53, %v3622_v51  ;;  %v3426_v58 = vld [vmem:[#allocation7 + $0x128] sm:$0xf]  ;;  %v4004_v59 = vld [vmem:[#allocation7 + $0x130] sm:$0xf0]  ;;  %v3610_v0 = vld [vmem:[#allocation10 + $0x120] sm:$0xf] }
  0x3c   : > { %s4426_s20 = smov 108   ;;  %s4427_s23 = smov 91   ;;  %vm1589_vm10 = vcmask 736256   ;;  %vm1538_vm11 = vcmask 883712   ;;  %vm1555_vm12 = vcmask 752640   ;;  %vm1572_vm13 = vcmask 744448  }
  0x3d   : > { %s4428_s27 = smov 92   ;;  %s4429_s30 = smov 109   ;;  %vm1521_vm14 = vcmask 891904   ;;  %vm1487_vm15 = vcmask 1031168   ;;  %vm1504_vm1 = vcmask 900096  }
  0x3e   : > { %s4430_s14 = smov 126   ;;  %s4431_s15 = smov 110  }
  0x3f   : > { %s4432_s18 = smov 127   ;;  %s467_s8 = sand.u32 1, %s4407_s22  }
  0x40   : > { %s4435_s26 = smov 56   ;;  %s4437_s29 = smov 58  }
  0x41   : > { %s4438_s16 = smov 94   ;;  %s4442_s9 = smov 22  }
  0x9a   : > { %v536_v15 = vpop.permute.xlu1 %535 }
  0x9b   : > { %v540_v16 = vperm.slane %v536_v15, %v4616_v14 }
  0xaf   : > { %v506_v6 = vpop.f32.mrf.mxu1 }
  0xb0   : > { %512 = vst.msk [vmem:[#allocation2] sm:$0xf] %vm511_vm2, %v506_v6 }
  0xb1   : > { %514 = vst.sshfl [vmem:[#allocation1] sm:$0xff pattern:$0x75316420] %v506_v6 }
  0xb7   : > { %v508_v7 = vpop.f32.mrf.mxu1 }
  0xb8   : > { %v516_v8 = vld [vmem:[#allocation1 + $0x1] ss:$2 sm:$0xff]  ;;  %522 = vst.msk [vmem:[#allocation2 + $0x4] sm:$0xf] %vm511_vm2, %v508_v7  ;;  %vm1692_vm2 = vcmask 588800  }
  0xb9   : > { %524 = vst.sshfl [vmem:[#allocation1] sm:$0xff pattern:$0x75316420] %v508_v7  ;;  %517 = vrot.lane.b32.xlu0 %v516_v8, %s4423_s28  ;;  %v3322_v7 = vld [vmem:[#allocation7 + $0x60] sm:$0xf] }
  0xba   : > { %v3979_v8 = vld [vmem:[#allocation7 + $0x68] sm:$0xf0] }
  0xbb   : > { %v3323_v11 = vor.u32 %v3979_v8, %v3322_v7  ;;  %v3371_v7 = vor.u32 %v3991_v3, %v3370_v2  ;;  %v3276_v8 = vld [vmem:[#allocation7 + $0xc] sm:$0xf0] }
  0xbd   : > { %954 = vmatpush.bf16.msrb.mxu1 %v3323_v11  ;;  %v3372_v11 = vld [vmem:[#allocation7 + $0xcc] sm:$0xf0] }
  0xc0   : > { %v526_v9 = vld [vmem:[#allocation1 + $0x1] ss:$2 sm:$0xff] }
  0xc1   : > { %527 = vrot.lane.b32.xlu0 %v526_v9, %s4423_s28  ;;  %v3418_v9 = vld [vmem:[#allocation7 + $0x120] sm:$0xf]  ;;  %s4436_s28 = smov 74  }
  0xc2   : > { %v3419_v15 = vor.u32 %v4003_v12, %v3418_v9  ;;  %v3990_v9 = vld [vmem:[#allocation7 + $0xc4] sm:$0xf]  ;;  %v3366_v12 = vld [vmem:[#allocation7 + $0xb0] sm:$0xf] }
  0xc4   : > { %967 = vmatpush.bf16.msra.mxu2 %v3419_v15 }
 0x12b   : > { %v518_v10 = vpop.permute.xlu0 %517 }
 0x12c   : > { %521 = vst.msk [vmem:[#allocation2] sm:$0xf] %vm520_vm3, %v518_v10 }
 0x133   : > { %v528_v13 = vpop.permute.xlu0 %527 }
 0x134   : > { %530 = vst.msk [vmem:[#allocation2 + $0x4] sm:$0xf] %vm520_vm3, %v528_v13  ;;  %v3978_v13 = vld [vmem:[#allocation7 + $0x64] sm:$0xf]  ;;  %vm1470_vm3 = vcmask 1039360  }
 0x13b   : > { %v531_v17 = vld [vmem:[#allocation2] sm:$0xff] }
 0x13c   : > { %v542_v18 = vadd.f32 %v540_v16, %v531_v17  ;;  %v3324_v16 = vld [vmem:[#allocation7 + $0x6c] sm:$0xf0]  ;;  %v4002_v17 = vld [vmem:[#allocation7 + $0x124] sm:$0xf] }
 0x13e   : > { %544 = vst [vmem:[#allocation1] ss:$2 sm:$0xff] %v542_v18 }
 0x145   : > { %v545_v19 = vld.sshfl [vmem:[#allocation1] sm:$0xff pattern:$0x75316420]  ;;  %v546_v20 = vld.sshfl [vmem:[#allocation1 + $0x8] sm:$0xff pattern:$0x75316420] }
 0x146   : > { %v549_v21 = vsel %vm493_vm0, %v545_v19, 0.0  ;;  %v550_v22 = vsel %vm493_vm0, %v546_v20, 0.0  ;;  %v3327_v20 = vor.u32 %v3978_v13, %v3324_v16  ;;  %v3989_v13 = vld [vmem:[#allocation7 + $0xb8] sm:$0xf0]  ;;  %v3375_v16 = vor.u32 %v3990_v9, %v3372_v11 }
 0x147   : > { %v551_v23 = vadd.f32 %v550_v22, %v549_v21  ;;  %v3310_v22 = vld [vmem:[#allocation7 + $0x48] sm:$0xf]  ;;  %v4001_v9 = vld [vmem:[#allocation7 + $0x118] sm:$0xf0] }
 0x148   : > { %980 = vmatpush.bf16.msra.mxu3 %v3327_v20  ;;  %v3550_v20 = vld [vmem:[#allocation10 + $0xa8] sm:$0xf] }
 0x149   : > { %552 = vadd.xlane.f32.xlu1 %v551_v23  ;;  %v3976_v23 = vld [vmem:[#allocation7 + $0x50] sm:$0xf0] }
 0x1bc   : > { %v553_v24 = vpop.xlane.xlu1 %552 }
 0x1bd   : > { %v554_v25 = vmul.f32 0.00390625, %v553_v24  ;;  %v3406_v24 = vld [vmem:[#allocation7 + $0x108] sm:$0xf] }
 0x1bf   : > { %v559_v26 = vperm.slane %v554_v25, %v4616_v14  ;;  %v3311_v25 = vor.u32 %v3976_v23, %v3310_v22  ;;  %v4036_v22 = vld [vmem:[#allocation10 + $0xb0] sm:$0xf0]  ;;  %v3646_v23 = vld [vmem:[#allocation10 + $0x168] sm:$0xf] }
 0x1c1   : > { %v4622_v27 = vsub.f32 %v542_v18, %v559_v26  ;;  %v3420_v18 = vld [vmem:[#allocation7 + $0x12c] sm:$0xf0]  ;;  %v4000_v26 = vld [vmem:[#allocation7 + $0x110] sm:$0xf0]  ;;  %955 = vmatpush.bf16.msrb.mxu1 %v3311_v25 }
 0x1c2   : > { %v3423_v21 = vor.u32 %v4002_v17, %v3420_v18  ;;  %v3367_v17 = vor.u32 %v3989_v13, %v3366_v12  ;;  %v3462_v18 = vld [vmem:[#allocation7 + $0x170] sm:$0xf] }
 0x1c3   : > { %v562_v28 = vmul.f32 %v4622_v27, %v4622_v27 }
 0x1c4   : > { %993 = vmatpush.bf16.msra.mxu0 %v3423_v21 }
 0x1c5   : > { %564 = vst [vmem:[#allocation1] ss:$2 sm:$0xff] %v562_v28  ;;  %v3975_v28 = vld [vmem:[#allocation7 + $0x4c] sm:$0xf]  ;;  %956 = vmatpush.bf16.msrb.mxu1 %v3299_v38  ;;  %v3539_v38 = vor.u32 %v4033_v36, %v3538_v35  ;;  %v4045_v36 = vld [vmem:[#allocation10 + $0xf8] sm:$0xf0] }
 0x1c9   : > { %957 = vmatpush.bf16.msrb.mxu1 %v3287_v52 }
 0x1cc   : > { %v565_v29 = vld.sshfl [vmem:[#allocation1] sm:$0xff pattern:$0x75316420]  ;;  %v566_v30 = vld.sshfl [vmem:[#allocation1 + $0x8] sm:$0xff pattern:$0x75316420] }
 0x1cd   : > { %v569_v31 = vsel %vm493_vm0, %v565_v29, 0.0  ;;  %v570_v32 = vsel %vm493_vm0, %v566_v30, 0.0  ;;  %v3312_v29 = vld [vmem:[#allocation7 + $0x54] sm:$0xf0]  ;;  %v3407_v30 = vor.u32 %v4000_v26, %v3406_v24  ;;  %958 = vmatpush.bf16.msrb.mxu1 %v3275_v1  ;;  %v4060_v24 = vld [vmem:[#allocation10 + $0x170] sm:$0xf0]  ;;  %v3551_v26 = vor.u32 %v4036_v22, %v3550_v20 }
 0x1ce   : > { %v571_v33 = vadd.f32 %v570_v32, %v569_v31  ;;  %v3315_v31 = vor.u32 %v3975_v28, %v3312_v29  ;;  %v3999_v32 = vld [vmem:[#allocation7 + $0x10c] sm:$0xf]  ;;  %v3647_v28 = vor.u32 %v4060_v24, %v3646_v23  ;;  %v3354_v29 = vld [vmem:[#allocation7 + $0x98] sm:$0xf]  ;;  %v3974_v24 = vld [vmem:[#allocation7 + $0x40] sm:$0xf0] }
 0x1cf   : > { %968 = vmatpush.bf16.msra.mxu2 %v3407_v30  ;;  %v3986_v30 = vld [vmem:[#allocation7 + $0xa0] sm:$0xf0]  ;;  %v4051_v1 = vld [vmem:[#allocation10 + $0x128] sm:$0xf0]  ;;  %v3306_v23 = vld [vmem:[#allocation7 + $0x38] sm:$0xf] }
 0x1d0   : > { %572 = vadd.xlane.f32.xlu2 %v571_v33  ;;  %v3408_v33 = vld [vmem:[#allocation7 + $0x114] sm:$0xf0]  ;;  %981 = vmatpush.bf16.msra.mxu3 %v3315_v31  ;;  %v3611_v3 = vor.u32 %v4051_v1, %v3610_v0  ;;  %v3562_v0 = vld [vmem:[#allocation10 + $0xc0] sm:$0xf] }
 0x1d1   : > { %v3411_v34 = vor.u32 %v3999_v32, %v3408_v33  ;;  %1003 = vmatpush.bf16.msra.mxu1 %v3367_v17  ;;  %v3450_v31 = vld [vmem:[#allocation7 + $0x158] sm:$0xf]  ;;  %v3355_v33 = vor.u32 %v3986_v30, %v3354_v29  ;;  %v3598_v17 = vld [vmem:[#allocation10 + $0x108] sm:$0xf]  ;;  %v3490_v29 = vld [vmem:[#allocation10 + $0x30] sm:$0xf] }
 0x1d2   : > { %v4021_v30 = vld [vmem:[#allocation10 + $0x38] sm:$0xf0] }
 0x1d3   : > { %994 = vmatpush.bf16.msra.mxu0 %v3411_v34  ;;  %969 = vmatpush.bf16.msra.mxu2 %v3395_v42  ;;  %v4010_v34 = vld [vmem:[#allocation7 + $0x160] sm:$0xf0]  ;;  %v3635_v42 = vor.u32 %v4057_v40, %v3634_v39  ;;  %v3491_v35 = vor.u32 %v4021_v30, %v3490_v29 }
 0x1d4   : > { %982 = vmatpush.bf16.msra.mxu3 %v3303_v43  ;;  %v3451_v37 = vor.u32 %v4010_v34, %v3450_v31  ;;  %v3342_v43 = vld [vmem:[#allocation7 + $0x80] sm:$0xf]  ;;  %v3586_v34 = vld [vmem:[#allocation10 + $0xf0] sm:$0xf] }
 0x1d5   : > { %1004 = vmatpush.bf16.msra.mxu1 %v3355_v33  ;;  %v3587_v40 = vor.u32 %v4045_v36, %v3586_v34  ;;  %v3636_v36 = vld [vmem:[#allocation10 + $0x15c] sm:$0xf0] }
 0x1d7   : > { %995 = vmatpush.bf16.msra.mxu0 %v3399_v47  ;;  %970 = vmatpush.bf16.msra.mxu2 %v3383_v56  ;;  %v3526_v47 = vld [vmem:[#allocation10 + $0x78] sm:$0xf]  ;;  %v3980_v56 = vld [vmem:[#allocation7 + $0x70] sm:$0xf0] }
 0x1d8   : > { %983 = vmatpush.bf16.msra.mxu3 %v3291_v60  ;;  %v3514_v60 = vld [vmem:[#allocation10 + $0x60] sm:$0xf] }
 0x1d9   : > { %v3515_v2 = vor.u32 %v4027_v63, %v3514_v60  ;;  %v4015_v63 = vld [vmem:[#allocation10 + $0x8] sm:$0xf0] }
 0x1db   : > { %996 = vmatpush.bf16.msra.mxu0 %v3387_v61  ;;  %971 = vmatpush.bf16.msra.mxu2 %v3371_v7  ;;  %v3977_v7 = vld [vmem:[#allocation7 + $0x58] sm:$0xf0] }
 0x1df   : > { %997 = vmatpush.bf16.msra.mxu0 %v3375_v16  ;;  %v4024_v16 = vld [vmem:[#allocation10 + $0x50] sm:$0xf0] }
 0x1e3   : > { %1376 = vmatpush.bf16.msrb.mxu0 %v3647_v28  ;;  %v3998_v28 = vld [vmem:[#allocation7 + $0x100] sm:$0xf0] }
 0x1e7   : > { %1377 = vmatpush.bf16.msrb.mxu0 %v3635_v42  ;;  %v3390_v42 = vld [vmem:[#allocation7 + $0xe0] sm:$0xf] }
 0x1eb   : > { %1378 = vmatpush.bf16.msrb.mxu0 %v3623_v54  ;;  %v3282_v54 = vld [vmem:[#allocation7 + $0x8] sm:$0xf] }
 0x1ef   : > { %1379 = vmatpush.bf16.msrb.mxu0 %v3611_v3  ;;  %v4039_v3 = vld [vmem:[#allocation10 + $0xc8] sm:$0xf0] }
 0x243   : > { %v573_v6 = vpop.xlane.xlu2 %572 }
 0x244   : > { %v574_v10 = vmul.f32 0.00390625, %v573_v6  ;;  %v3318_v6 = vld [vmem:[#allocation7 + $0x50] sm:$0xf] }
 0x245   : > { %v3319_v12 = vor.u32 %v3977_v7, %v3318_v6 }
 0x246   : > { %v4628_v19 = vadd.f32 1e-05, %v574_v10  ;;  %v3279_v10 = vor.u32 %v3966_v4, %v3276_v8  ;;  %v3414_v8 = vld [vmem:[#allocation7 + $0x110] sm:$0xf] }
 0x247   : > { %v3415_v13 = vor.u32 %v4001_v9, %v3414_v8 }
 0x248   : > { %4235 = vrsqrt.f32 %v4628_v19  ;;  %vm582_vm5 = vweird.f32 %v4628_v19  ;;  %984 = vmatpush.bf16.msra.mxu3 %v3279_v10 }
 0x24c   : > { %1363 = vmatpush.bf16.msrb.mxu3 %v3551_v26  ;;  %v3307_v26 = vor.u32 %v3974_v24, %v3306_v23  ;;  %v4037_v23 = vld [vmem:[#allocation10 + $0xb8] sm:$0xf0] }
 0x24d   : > { %v4061_v24 = vld [vmem:[#allocation10 + $0x178] sm:$0xf0] }
 0x24e   : > { %v4631_v46 = vpop.eup %4235 }
 0x24f   : > { %v577_v48 = vmul.f32 %v4631_v46, %v4628_v19  ;;  %vm583_vm4 = vweird.f32 %v4631_v46  ;;  %v4013_v19 = vld [vmem:[#allocation7 + $0x178] sm:$0xf0] }
 0x250   : > { %vm4640_vm6 = vmor %vm582_vm5, %vm583_vm4  ;;  %v3463_v21 = vor.u32 %v4013_v19, %v3462_v18  ;;  %1364 = vmatpush.bf16.msrb.mxu3 %v3539_v38  ;;  %v4048_v18 = vld [vmem:[#allocation10 + $0x110] sm:$0xf0]  ;;  %v3971_v38 = vld [vmem:[#allocation7 + $0x28] sm:$0xf0] }
 0x251   : > { %v578_v55 = vmul.f32 %v4631_v46, %v577_v48  ;;  %v4030_v48 = vld [vmem:[#allocation10 + $0x80] sm:$0xf0]  ;;  %v3599_v22 = vor.u32 %v4048_v18, %v3598_v17  ;;  %v1034_v18 = vld [vmem:[%s478_s17] sm:$0xff]  ;;  %s4439_s17 = smov 38  }
 0x252   : > { %1016 = vmatpush.bf16.msrb.mxu2 %v3463_v21  ;;  %v3527_v52 = vor.u32 %v4030_v48, %v3526_v47  ;;  %v4042_v47 = vld [vmem:[#allocation10 + $0xe0] sm:$0xf0] }
 0x253   : > { %v579_v62 = vmul.f32 0.5, %v578_v55  ;;  %v3330_v55 = vld [vmem:[#allocation7 + $0x68] sm:$0xf]  ;;  %1380 = vmatpush.bf16.msrb.mxu0 %v3599_v22  ;;  %v3558_v22 = vld [vmem:[#allocation10 + $0xb0] sm:$0xf] }
 0x254   : > { %v3331_v57 = vor.u32 %v3980_v56, %v3330_v55  ;;  %1365 = vmatpush.bf16.msrb.mxu3 %v3527_v52  ;;  %v3968_v55 = vld [vmem:[#allocation7 + $0x10] sm:$0xf0]  ;;  %v3378_v56 = vld [vmem:[#allocation7 + $0xc8] sm:$0xf] }
 0x255   : > { %v580_v5 = vsub.f32 1.5, %v579_v62  ;;  %v3427_v62 = vor.u32 %v4004_v59, %v3426_v58  ;;  %v3283_v58 = vor.u32 %v3968_v55, %v3282_v54  ;;  %v3992_v59 = vld [vmem:[#allocation7 + $0xd0] sm:$0xf0]  ;;  %v4026_v55 = vld [vmem:[#allocation10 + $0x64] sm:$0xf] }
 0x256   : > { %1017 = vmatpush.bf16.msrb.mxu2 %v3451_v37  ;;  %v3294_v37 = vld [vmem:[#allocation7 + $0x20] sm:$0xf]  ;;  %v3379_v60 = vor.u32 %v3992_v59, %v3378_v56  ;;  %v3516_v56 = vld [vmem:[#allocation10 + $0x6c] sm:$0xf0]  ;;  %v4050_v59 = vld [vmem:[#allocation10 + $0x124] sm:$0xf] }
 0x257   : > { %v581_v15 = vmul.f32 %v4631_v46, %v580_v5  ;;  %1381 = vmatpush.bf16.msrb.mxu0 %v3587_v40  ;;  %v4058_v40 = vld [vmem:[#allocation10 + $0x160] sm:$0xf0] }
 0x258   : > { %1366 = vmatpush.bf16.msrb.mxu3 %v3515_v2 }
 0x259   : > { %v585_v25 = vsel %vm4640_vm6, %v4631_v46, %v581_v15  ;;  %v4007_v46 = vld [vmem:[#allocation7 + $0x148] sm:$0xf0]  ;;  %v3502_v15 = vld [vmem:[#allocation10 + $0x48] sm:$0xf] }
 0x25a   : > { %v590_v32 = vperm.slane %v585_v25, %v4616_v14  ;;  %v3343_v14 = vor.u32 %v3983_v44, %v3342_v43  ;;  %v3439_v50 = vor.u32 %v4007_v46, %v3438_v45  ;;  %v3503_v21 = vor.u32 %v4024_v16, %v3502_v15  ;;  %v3402_v25 = vld [vmem:[#allocation7 + $0xf8] sm:$0xf]  ;;  %v3995_v43 = vld [vmem:[#allocation7 + $0xe8] sm:$0xf0] }
 0x25b   : > { %v3403_v33 = vor.u32 %v3998_v28, %v3402_v25  ;;  %v3478_v44 = vld [vmem:[#allocation10 + $0x18] sm:$0xf]  ;;  %v3295_v45 = vor.u32 %v3971_v38, %v3294_v37  ;;  %v4034_v38 = vld [vmem:[#allocation10 + $0xa0] sm:$0xf0] }
 0x25c   : > { %v4650_v41 = vmul.f32 %v590_v32, %v4622_v27  ;;  %1005 = vmatpush.bf16.msra.mxu1 %v3343_v14  ;;  %1018 = vmatpush.bf16.msrb.mxu2 %v3439_v50  ;;  %v4018_v14 = vld [vmem:[#allocation10 + $0x20] sm:$0xf0]  ;;  %v3574_v46 = vld [vmem:[#allocation10 + $0xd8] sm:$0xf] }
 0x25d   : > { %1367 = vmatpush.bf16.msrb.mxu3 %v3503_v21  ;;  %v3479_v50 = vor.u32 %v4018_v14, %v3478_v44  ;;  %v3575_v51 = vor.u32 %v4042_v47, %v3574_v46  ;;  %v3648_v21 = vld [vmem:[#allocation10 + $0x174] sm:$0xf0]  ;;  %v4029_v44 = vld [vmem:[#allocation10 + $0x7c] sm:$0xf] }
 0x25e   : > { %v593_v49 = vmul.f32 0.70710677, %v4650_v41  ;;  %v620_v15 = vmul.f32 0.5, %v4650_v41  ;;  %v3546_v37 = vld [vmem:[#allocation10 + $0x98] sm:$0xf] }
 0x25f   : > { %1382 = vmatpush.bf16.msrb.mxu0 %v3575_v51  ;;  %v3547_v14 = vor.u32 %v4034_v38, %v3546_v37  ;;  %v4053_v47 = vld [vmem:[#allocation10 + $0x13c] sm:$0xf]  ;;  %v3630_v51 = vld [vmem:[#allocation10 + $0x140] sm:$0xf] }
 0x260   : > { %v4653_v27 = vclamps-f32 %v593_v49, 3.832507  ;;  %1006 = vmatpush.bf16.msra.mxu1 %v3331_v57  ;;  %1019 = vmatpush.bf16.msrb.mxu2 %v3427_v62  ;;  %v3391_v49 = vor.u32 %v3995_v43, %v3390_v42  ;;  %v3466_v62 = vld [vmem:[#allocation10] sm:$0xf]  ;;  %v4041_v37 = vld [vmem:[#allocation10 + $0xdc] sm:$0xf] }
 0x261   : > { %1368 = vmatpush.bf16.msrb.mxu3 %v3491_v35  ;;  %v3467_v2 = vor.u32 %v4015_v63, %v3466_v62  ;;  %v4056_v35 = vld [vmem:[#allocation10 + $0x154] sm:$0xf]  ;;  %v3522_v62 = vld [vmem:[#allocation10 + $0x68] sm:$0xf]  ;;  %v3486_v38 = vld [vmem:[#allocation10 + $0x20] sm:$0xf] }
 0x262   : > { %v4657_v61 = vmul.f32 %v4653_v27, %v4653_v27  ;;  %v3639_v43 = vor.u32 %v4056_v35, %v3636_v36  ;;  %v4028_v63 = vld [vmem:[#allocation10 + $0x70] sm:$0xf0] }
 0x264   : > { %v597_v4 = vmul.f32 0.00022905065, %v4657_v61  ;;  %v605_v5 = vmul.f32 -1.1791603e-07, %v4657_v61  ;;  %1007 = vmatpush.bf16.msra.mxu1 %v3319_v12  ;;  %1020 = vmatpush.bf16.msrb.mxu2 %v3415_v13 }
 0x265   : > { %1369 = vmatpush.bf16.msrb.mxu3 %v3479_v50  ;;  %v4031_v50 = vld [vmem:[#allocation10 + $0x88] sm:$0xf0] }
 0x266   : > { %v598_v10 = vadd.f32 0.003408291, %v597_v4  ;;  %v606_v11 = vadd.f32 2.3547966e-05, %v605_v5  ;;  %v3563_v5 = vor.u32 %v4039_v3, %v3562_v0  ;;  %v3618_v0 = vld [vmem:[#allocation10 + $0x128] sm:$0xf] }
 0x267   : > { %v3504_v3 = vld [vmem:[#allocation10 + $0x54] sm:$0xf0] }
 0x268   : > { %v599_v19 = vmul.f32 %v598_v10, %v4657_v61  ;;  %v607_v20 = vmul.f32 %v606_v11, %v4657_v61  ;;  %1008 = vmatpush.bf16.msra.mxu1 %v3307_v26  ;;  %1021 = vmatpush.bf16.msrb.mxu2 %v3403_v33  ;;  %v3559_v33 = vor.u32 %v4037_v23, %v3558_v22 }
 0x269   : > { %1370 = vmatpush.bf16.msrb.mxu3 %v3467_v2  ;;  %1383 = vmatpush.bf16.msrb.mxu0 %v3563_v5  ;;  %v4023_v2 = vld [vmem:[#allocation10 + $0x4c] sm:$0xf]  ;;  %v3519_v5 = vor.u32 %v4026_v55, %v3516_v56 }
 0x26a   : > { %v600_v31 = vadd.f32 0.050955694, %v599_v19  ;;  %v608_v32 = vadd.f32 0.0010179626, %v607_v20  ;;  %v4035_v19 = vld [vmem:[#allocation10 + $0xac] sm:$0xf] }
 0x26b   : > { %v4059_v20 = vld [vmem:[#allocation10 + $0x16c] sm:$0xf] }
 0x26c   : > { %v609_v39 = vmul.f32 %v608_v32, %v4657_v61  ;;  %v601_v53 = vmul.f32 %v600_v31, %v4657_v61  ;;  %1009 = vmatpush.bf16.msra.mxu1 %v3295_v45  ;;  %1022 = vmatpush.bf16.msrb.mxu2 %v3391_v49  ;;  %v3651_v30 = vor.u32 %v4059_v20, %v3648_v21  ;;  %v4032_v31 = vld [vmem:[#allocation10 + $0x94] sm:$0xf]  ;;  %v3540_v32 = vld [vmem:[#allocation10 + $0x9c] sm:$0xf0]  ;;  %v3528_v45 = vld [vmem:[#allocation10 + $0x84] sm:$0xf0] }
 0x26d   : > { %v3543_v42 = vor.u32 %v4032_v31, %v3540_v32  ;;  %v3534_v49 = vld [vmem:[#allocation10 + $0x80] sm:$0xf] }
 0x26e   : > { %v610_v48 = vadd.f32 0.01407047, %v609_v39  ;;  %v602_v4 = vadd.f32 0.18520832, %v601_v53  ;;  %v3642_v39 = vld [vmem:[#allocation10 + $0x158] sm:$0xf]  ;;  %v3531_v53 = vor.u32 %v4029_v44, %v3528_v45 }
 0x26f   : > { %v3643_v46 = vor.u32 %v4058_v40, %v3642_v39  ;;  %v3492_v20 = vld [vmem:[#allocation10 + $0x3c] sm:$0xf0]  ;;  %v4043_v40 = vld [vmem:[#allocation10 + $0xe8] sm:$0xf0]  ;;  %v4014_v44 = vld [vmem:[#allocation10 + $0x4] sm:$0xf] }
 0x270   : > { %v611_v52 = vmul.f32 %v610_v48, %v4657_v61  ;;  %1010 = vmatpush.bf16.msra.mxu1 %v3283_v58  ;;  %1023 = vmatpush.bf16.msrb.mxu2 %v3379_v60  ;;  %v603_v8 = vmul.f32 %v602_v4, %v4657_v61  ;;  %v3624_v48 = vld [vmem:[#allocation10 + $0x144] sm:$0xf0]  ;;  %v3612_v60 = vld [vmem:[#allocation10 + $0x12c] sm:$0xf0]  ;;  %v4047_v4 = vld [vmem:[#allocation10 + $0x10c] sm:$0xf] }
 0x271   : > { %v3627_v54 = vor.u32 %v4053_v47, %v3624_v48  ;;  %v3582_v39 = vld [vmem:[#allocation10 + $0xe0] sm:$0xf]  ;;  %v3468_v45 = vld [vmem:[#allocation10 + $0xc] sm:$0xf0]  ;;  %v4038_v47 = vld [vmem:[#allocation10 + $0xc4] sm:$0xf] }
 0x272   : > { %v612_v57 = vadd.f32 0.11098505, %v611_v52  ;;  %v604_v10 = vadd.f32 1.1283791, %v603_v8  ;;  %v4055_v52 = vld [vmem:[#allocation10 + $0x148] sm:$0xf0] }
 0x273   : > { %v3631_v58 = vor.u32 %v4055_v52, %v3630_v51  ;;  %v3600_v8 = vld [vmem:[#allocation10 + $0x114] sm:$0xf0]  ;;  %v3564_v48 = vld [vmem:[#allocation10 + $0xcc] sm:$0xf0]  ;;  %v3570_v51 = vld [vmem:[#allocation10 + $0xc8] sm:$0xf] }
 0x274   : > { %v613_v1 = vmul.f32 %v612_v57, %v4657_v61  ;;  %v617_v11 = vmul.f32 %v4653_v27, %v604_v10  ;;  %v3654_v27 = vld [vmem:[#allocation10 + $0x170] sm:$0xf]  ;;  %v3535_v57 = vor.u32 %v4031_v50, %v3534_v49  ;;  %v3474_v49 = vld [vmem:[#allocation10 + $0x8] sm:$0xf]  ;;  %v4016_v50 = vld [vmem:[#allocation10 + $0x10] sm:$0xf0] }
 0x275   : > { %v3655_v34 = vor.u32 %v4061_v24, %v3654_v27  ;;  %v4044_v27 = vld [vmem:[#allocation10 + $0xf4] sm:$0xf]  ;;  %v3588_v24 = vld [vmem:[#allocation10 + $0xfc] sm:$0xf0]  ;;  %v3475_v55 = vor.u32 %v4016_v50, %v3474_v49 }
 0x276   : > { %v614_v6 = vadd.f32 0.49746925, %v613_v1  ;;  %v4052_v1 = vld [vmem:[#allocation10 + $0x130] sm:$0xf0]  ;;  %v3591_v32 = vor.u32 %v4044_v27, %v3588_v24 }
 0x277   : > { %v3619_v10 = vor.u32 %v4052_v1, %v3618_v0  ;;  %v4040_v52 = vld [vmem:[#allocation10 + $0xd0] sm:$0xf0] }
 0x278   : > { %v615_v7 = vmul.f32 %v614_v6, %v4657_v61  ;;  %v3552_v61 = vld [vmem:[#allocation10 + $0xb4] sm:$0xf0]  ;;  %v3615_v6 = vor.u32 %v4050_v59, %v3612_v60  ;;  %v3571_v56 = vor.u32 %v4040_v52, %v3570_v51 }
 0x279   : > { %v3555_v29 = vor.u32 %v4035_v19, %v3552_v61  ;;  %v3603_v19 = vor.u32 %v4047_v4, %v3600_v8  ;;  %v4020_v61 = vld [vmem:[#allocation10 + $0x34] sm:$0xf] }
 0x27a   : > { %v616_v9 = vadd.f32 1.0, %v615_v7  ;;  %v3495_v31 = vor.u32 %v4020_v61, %v3492_v20 }
 0x27c   : > { %4237 = vrcp.f32 %v616_v9  ;;  %v3523_v9 = vor.u32 %v4028_v63, %v3522_v62 }
 0x282   : > { %v4238_v12 = vpop.eup %4237 }
 0x283   : > { %v619_v13 = vmul.f32 %v4238_v12, %v617_v11  ;;  %v3510_v11 = vld [vmem:[#allocation10 + $0x50] sm:$0xf]  ;;  %v4025_v12 = vld [vmem:[#allocation10 + $0x58] sm:$0xf0] }
 0x284   : > { %v3511_v22 = vor.u32 %v4025_v12, %v3510_v11 }
 0x285   : > { %v621_v16 = vadd.f32 1.0, %v619_v13  ;;  %v3606_v13 = vld [vmem:[#allocation10 + $0x110] sm:$0xf] }
 0x287   : > { %v622_v17 = vmul.f32 %v621_v16, %v620_v15  ;;  %v4049_v16 = vld [vmem:[#allocation10 + $0x118] sm:$0xf0] }
 0x288   : > { %v3607_v23 = vor.u32 %v4049_v16, %v3606_v13 }
 0x289   : > { %624 = vst [vmem:[#allocation1] ss:$2 sm:$0xff] %v622_v17 }
 0x290   : > { %v625_v25 = vld.sshfl [vmem:[#allocation1] sm:$0xff pattern:$0x75316420]  ;;  %v626_v26 = vld.sshfl [vmem:[#allocation1 + $0x8] sm:$0xff pattern:$0x75316420] }
 0x291   : > { %v4676_v41 = vpack.c.bf16 %v625_v25, %v625_v25  ;;  %v4678_v28 = vpack.c.bf16 %v626_v26, %v626_v26  ;;  %1036 = vst [vmem:[#allocation1] ss:$2 sm:$0xff] %v1034_v18  ;;  %v3507_v18 = vor.u32 %v4023_v2, %v3504_v3  ;;  %v3498_v25 = vld [vmem:[#allocation10 + $0x38] sm:$0xf]  ;;  %v4022_v26 = vld [vmem:[#allocation10 + $0x40] sm:$0xf0] }
 0x292   : > { %v3499_v35 = vor.u32 %v4022_v26, %v3498_v25 }
 0x293   : > { %959 = vmatmul.bf16.vlgmr.msrb.gmra.mxu1 %v4676_v41  ;;  %972 = vmatmul.bf16.vlgmr.msra.gmra.mxu2 %v4678_v28 }
 0x294   : > { %985 = vmatmul.bf16.vlgmr.msra.gmra.mxu3 %v4676_v41  ;;  %998 = vmatmul.bf16.vlgmr.msra.gmra.mxu0 %v4678_v28 }
 0x295   : > { %1389 = vmatpush.bf16.msrb.mxu1 %v3555_v29  ;;  %1402 = vmatpush.bf16.msra.mxu2 %v3651_v30  ;;  %v3594_v29 = vld [vmem:[#allocation10 + $0xf8] sm:$0xf]  ;;  %v4046_v30 = vld [vmem:[#allocation10 + $0x100] sm:$0xf0] }
 0x296   : > { %1415 = vmatpush.bf16.msra.mxu3 %v3559_v33  ;;  %1428 = vmatpush.bf16.msra.mxu0 %v3655_v34  ;;  %v4017_v33 = vld [vmem:[#allocation10 + $0x1c] sm:$0xf]  ;;  %v3480_v34 = vld [vmem:[#allocation10 + $0x24] sm:$0xf0]  ;;  %v3595_v36 = vor.u32 %v4046_v30, %v3594_v29 }
 0x298   : > { %v1038_v7 = vld.sshfl [vmem:[#allocation1 + $0x8] sm:$0xff pattern:$0x75316420]  ;;  %v1037_v15 = vld.sshfl [vmem:[#allocation1] sm:$0xff pattern:$0x75316420] }
 0x299   : > { %1390 = vmatpush.bf16.msrb.mxu1 %v3543_v42  ;;  %1403 = vmatpush.bf16.msra.mxu2 %v3639_v43  ;;  %v4684_v17 = vpack.c.bf16 %v1038_v7, %v1038_v7  ;;  %v1041_v21 = vpack.c.bf16 %v1037_v15, %v1037_v15  ;;  %v3483_v42 = vor.u32 %v4017_v33, %v3480_v34 }
 0x29a   : > { %1416 = vmatpush.bf16.msra.mxu3 %v3547_v14  ;;  %1429 = vmatpush.bf16.msra.mxu0 %v3643_v46  ;;  %v3583_v46 = vor.u32 %v4043_v40, %v3582_v39 }
 0x29d   : > { %1391 = vmatpush.bf16.msrb.mxu1 %v3531_v53  ;;  %1404 = vmatpush.bf16.msra.mxu2 %v3627_v54  ;;  %v3471_v53 = vor.u32 %v4014_v44, %v3468_v45  ;;  %v3567_v54 = vor.u32 %v4038_v47, %v3564_v48 }
 0x29e   : > { %1417 = vmatpush.bf16.msra.mxu3 %v3535_v57  ;;  %1430 = vmatpush.bf16.msra.mxu0 %v3631_v58 }
 0x2a1   : > { %1392 = vmatpush.bf16.msrb.mxu1 %v3519_v5  ;;  %1405 = vmatpush.bf16.msra.mxu2 %v3615_v6 }
 0x2a2   : > { %1418 = vmatpush.bf16.msra.mxu3 %v3523_v9  ;;  %1431 = vmatpush.bf16.msra.mxu0 %v3619_v10 }
 0x2a3   : > { %1011 = vmatmul.bf16.vlgmr.msra.gmra.mxu1 %v4676_v41  ;;  %1024 = vmatmul.bf16.vlgmr.msrb.gmra.mxu2 %v4678_v28  ;;  %v3576_v41 = vld [vmem:[#allocation10 + $0xe4] sm:$0xf0]  ;;  %v4019_v28 = vld [vmem:[#allocation10 + $0x28] sm:$0xf0] }
 0x2a4   : > { %1371 = vmatmul.bf16.vlgmr.msrb.gmra.mxu3 %v1041_v21  ;;  %1384 = vmatmul.bf16.vlgmr.msrb.gmra.mxu0 %v4684_v17  ;;  %v3579_v43 = vor.u32 %v4041_v37, %v3576_v41  ;;  %v3487_v14 = vor.u32 %v4019_v28, %v3486_v38 }
 0x2a5   : > { %1393 = vmatpush.bf16.msrb.mxu1 %v3507_v18  ;;  %1406 = vmatpush.bf16.msra.mxu2 %v3603_v19 }
 0x2a6   : > { %1419 = vmatpush.bf16.msra.mxu3 %v3511_v22  ;;  %1432 = vmatpush.bf16.msra.mxu0 %v3607_v23 }
 0x2a9   : > { %1394 = vmatpush.bf16.msrb.mxu1 %v3495_v31  ;;  %1407 = vmatpush.bf16.msra.mxu2 %v3591_v32 }
 0x2aa   : > { %1420 = vmatpush.bf16.msra.mxu3 %v3499_v35  ;;  %1433 = vmatpush.bf16.msra.mxu0 %v3595_v36  ;;  %v1614_v35 = vld [vmem:[%s5293_s5] sm:$0xf] }
 0x2ad   : > { %1395 = vmatpush.bf16.msrb.mxu1 %v3483_v42  ;;  %1408 = vmatpush.bf16.msra.mxu2 %v3579_v43 }
 0x2ae   : > { %1421 = vmatpush.bf16.msra.mxu3 %v3487_v14  ;;  %1434 = vmatpush.bf16.msra.mxu0 %v3583_v46 }
 0x2b1   : > { %1396 = vmatpush.bf16.msrb.mxu1 %v3471_v53  ;;  %1409 = vmatpush.bf16.msra.mxu2 %v3567_v54 }
 0x2b2   : > { %1422 = vmatpush.bf16.msra.mxu3 %v3475_v55  ;;  %1435 = vmatpush.bf16.msra.mxu0 %v3571_v56 }
 0x2b4   : > { %1397 = vmatmul.bf16.vlgmr.msrb.gmra.mxu1 %v1041_v21  ;;  %1410 = vmatmul.bf16.vlgmr.msra.gmra.mxu2 %v4684_v17 }
 0x2b5   : > { %1423 = vmatmul.bf16.vlgmr.msra.gmra.mxu3 %v1041_v21  ;;  %1436 = vmatmul.bf16.vlgmr.msra.gmra.mxu0 %v4684_v17 }
 0x310   : > { %v960_v57 = vpop.f32.mrf.mxu1 }
 0x311   : > { %v999_v58 = vpop.f32.mrf.mxu0 }
 0x316   : > { %v973_v59 = vpop.f32.mrf.mxu2 }
 0x317   : > { %v974_v60 = vadd.f32 %v973_v59, %v960_v57  ;;  %v986_v62 = vpop.f32.mrf.mxu3 }
 0x318   : > { %v1000_v63 = vadd.f32 %v999_v58, %v986_v62  ;;  %v962_v0 = vpop.f32.mrf.mxu1 }
 0x319   : > { %v1001_v1 = vpop.f32.mrf.mxu0 }
 0x31a   : > { %v1029_v2 = vpack.c.bf16 %v1000_v63, %v974_v60 }
 0x31c   : > { %1031 = vst [vmem:[#allocation3] sm:$0x33] %v1029_v2 }
 0x31e   : > { %v975_v3 = vpop.f32.mrf.mxu2 }
 0x31f   : > { %v988_v4 = vpop.f32.mrf.mxu3 }
 0x320   : > { %v1012_v5 = vpop.f32.mrf.mxu1 }
 0x321   : > { %v1385_v6 = vpop.f32.mrf.mxu0 }
 0x326   : > { %v1025_v7 = vpop.f32.mrf.mxu2 }
 0x327   : > { %v1026_v8 = vadd.f32 %v1025_v7, %v1012_v5  ;;  %v1372_v9 = vpop.f32.mrf.mxu3 }
 0x328   : > { %v1014_v10 = vpop.f32.mrf.mxu1  ;;  %v1386_v19 = vadd.f32 %v1385_v6, %v1372_v9 }
 0x329   : > { %v1030_v11 = vpack.c.bf16 %v1026_v8, %v1026_v8  ;;  %v1387_v12 = vpop.f32.mrf.mxu0 }
 0x32b   : > { %1033 = vst.msk [vmem:[#allocation3 + $0x8] sm:$0x3] %vm1032_vm7, %v1030_v11  ;;  %vm2246_vm7 = vcmask 261120  }
 0x32e   : > { %v1027_v13 = vpop.f32.mrf.mxu2 }
 0x32f   : > { %v1374_v15 = vpop.f32.mrf.mxu3 }
 0x331   : > { %v1398_v16 = vpop.f32.mrf.mxu1 }
 0x332   : > { %v1437_v17 = vpop.f32.mrf.mxu0 }
 0x337   : > { %v1411_v18 = vpop.f32.mrf.mxu2 }
 0x338   : > { %v1412_v61 = vadd.f32 %v1411_v18, %v1398_v16  ;;  %v1424_v20 = vpop.f32.mrf.mxu3 }
 0x339   : > { %v1438_v21 = vadd.f32 %v1437_v17, %v1424_v20  ;;  %v1400_v22 = vpop.f32.mrf.mxu1 }
 0x33a   : > { %v1441_v23 = vpack.c.bf16 %v1412_v61, %v1386_v19  ;;  %v1439_v27 = vpop.f32.mrf.mxu0 }
 0x33b   : > { %v1442_v24 = vpack.c.bf16 %v1438_v21, %v1438_v21 }
 0x33c   : > { %v1445_v25 = vrot.slane %v1441_v23, 6 }
 0x33d   : > { %v1446_v26 = vrot.slane %v1442_v24, 6 }
 0x33e   : > { %1449 = vst [vmem:[#allocation3] sm:$0xcc] %v1445_v25 }
 0x33f   : > { %1451 = vst.msk [vmem:[#allocation3 + $0x8] sm:$0xc] %vm1450_vm8, %v1446_v26  ;;  %v1413_v29 = vpop.f32.mrf.mxu2  ;;  %vm2384_vm8 = vcmask 1043458  }
 0x340   : > { %v1426_v30 = vpop.f32.mrf.mxu3 }
 0x345   : > { %v1453_v31 = vld [vmem:[#allocation3] sm:$0xff] }
 0x346   : > { %1455 = vst [vmem:[#allocation5] sm:$0xff] %v1453_v31  ;;  %v1454_v32 = vld [vmem:[#allocation3 + $0x8] sm:$0xf]  ;;  %1582 = vrot.lane.b32.xlu2 %v1453_v31, %s4425_s19 }
 0x347   : > { %v1579_v33 = vld [vmem:[#allocation3 + $0x8] sm:$0xf]  ;;  %1457 = vst.msk [vmem:[#allocation5 + $0x8] sm:$0xf] %vm5305_vm9, %v1454_v32 }
 0x348   : > { %1584 = vrot.lane.b32.xlu0 %v1579_v33, %s4425_s19  ;;  %v1528_v34 = vld [vmem:[#allocation3 + $0x8] sm:$0xf] }
 0x349   : > { %1533 = vrot.lane.b32.xlu1 %v1528_v34, %s4426_s20  ;;  %v1545_v36 = vld [vmem:[#allocation3 + $0x8] sm:$0xf] }
 0x34a   : > { %v1562_v37 = vld [vmem:[#allocation3 + $0x8] sm:$0xf] }
 0x34b   : > { %v1477_v41 = vld [vmem:[#allocation3 + $0x8] sm:$0xf] }
 0x34c   : > { %v1511_v38 = vld [vmem:[#allocation3 + $0x8] sm:$0xf] }
 0x34d   : > { %v1494_v28 = vld [vmem:[#allocation3 + $0x8] sm:$0xf] }
 0x34e   : > { %1565 = vrot.lane.b32.xlu2 %v1453_v31, %s4427_s23  ;;  %v1459_v39 = vld [vmem:[#allocation3 + $0x8] sm:$0xf] }
 0x350   : > { %1548 = vrot.lane.b32.xlu0 %v1453_v31, %s4428_s27 }
 0x351   : > { %1617 = vperm.xlu1 %4233, %v1614_v35  }
 0x356   : > { %1514 = vrot.lane.b32.xlu2 %v1453_v31, %s4429_s30 }
 0x358   : > { %1550 = vrot.lane.b32.xlu0 %v1545_v36, %s4428_s27 }
 0x35e   : > { %1531 = vrot.lane.b32.xlu2 %v1453_v31, %s4426_s20 }
 0x360   : > { %1567 = vrot.lane.b32.xlu0 %v1562_v37, %s4427_s23 }
 0x366   : > { %1482 = vrot.lane.b32.xlu2 %v1477_v41, %s4430_s14 }
 0x368   : > { %1516 = vrot.lane.b32.xlu0 %v1511_v38, %s4429_s30 }
 0x36e   : > { %1499 = vrot.lane.b32.xlu2 %v1494_v28, %s4431_s15 }
 0x370   : > { %1480 = vrot.lane.b32.xlu0 %v1453_v31, %s4430_s14 }
 0x376   : > { %1464 = vrot.lane.b32.xlu2 %v1459_v39, %s4432_s18 }
 0x378   : > { %1497 = vrot.lane.b32.xlu0 %v1453_v31, %s4431_s15 }
 0x380   : > { %1462 = vrot.lane.b32.xlu0 %v1453_v31, %s4432_s18 }
 0x3a0   : > { %v1583_v40 = vpop.permute.xlu2 %1582 }
 0x3a1   : > { %v1586_v46 = vrot.slane %v1583_v40, 4 }
 0x3a8   : > { %v1566_v42 = vpop.permute.xlu2 %1565 }
 0x3a9   : > { %v1569_v11 = vrot.slane %v1566_v42, 4 }
 0x3b0   : > { %v4711_v43 = vpop.permute.xlu2 %1514 }
 0x3b1   : > { %v1518_v19 = vrot.slane %v4711_v43, 4 }
 0x3b8   : > { %v1532_v44 = vpop.permute.xlu2 %1531 }
 0x3b9   : > { %v1535_v14 = vrot.slane %v1532_v44, 4 }
 0x3ba   : > { %v1585_v45 = vpop.permute.xlu0 %1584 }
 0x3bb   : > { %v1587_v47 = vrot.slane %v1585_v45, 4  ;;  %1594 = vst.msk [vmem:[#allocation5 + $0x68] sm:$0xf] %vm5305_vm9, %v1585_v45  ;;  %v1534_v48 = vpop.permute.xlu1 %1533 }
 0x3bc   : > { %v1536_v49 = vrot.slane %v1534_v48, 4  ;;  %1543 = vst.msk [vmem:[#allocation5 + $0x44] sm:$0xf] %vm5305_vm9, %v1534_v48 }
 0x3bd   : > { %v1588_v50 = vsel %vm493_vm0, %v1586_v46, %v1587_v47 }
 0x3be   : > { %v1590_v51 = vsel %vm1589_vm10, %v1583_v40, %v1588_v50  ;;  %v1537_v52 = vsel %vm493_vm0, %v1535_v14, %v1536_v49  ;;  %v3666_v49 = vld [vmem:[#allocation5 + $0x8] sm:$0xf] }
 0x3bf   : > { %v1539_v53 = vsel %vm1538_vm11, %v1532_v44, %v1537_v52  ;;  %v1662_v54 = vunpack.c.l.b16 %v1590_v51  ;;  %v1663_v55 = vunpack.c.h.b16 %v1590_v51 }
 0x3c0   : > { %1542 = vst [vmem:[#allocation5 + $0x3c] sm:$0xff] %v1539_v53  ;;  %v4719_v56 = vpop.permute.xlu2 %1482  ;;  %v1595_v53 = vld [vmem:[%s5292_s4] sm:$0x3] }
 0x3c1   : > { %v1677_v57 = vpack.c.b16 %v1662_v54, %v1662_v54  ;;  %v1678_v58 = vpack.c.b16 %v1663_v55, %v1663_v55  ;;  %1492 = vst.msk [vmem:[#allocation5 + $0x20] sm:$0xf] %vm5305_vm9, %v4719_v56  ;;  %v1485_v33 = vrot.slane %v4719_v56, 4 }
 0x3c2   : > { %v1549_v59 = vpop.permute.xlu0 %1548  ;;  %v1613_v60 = vld [vmem:[#allocation5 + $0x68] sm:$0xf] }
 0x3c3   : > { %v1664_v62 = vunpack.c.l.b16 %v1613_v60  ;;  %v1697_v63 = vsel %vm493_vm0, %v1677_v57, 0  ;;  %v1700_v0 = vsel %vm493_vm0, %v1678_v58, 0  ;;  %v1552_v5 = vrot.slane %v1549_v59, 4  ;;  %v4070_v32 = vld [vmem:[#allocation5 + $0x40] sm:$0xf0] }
 0x3c4   : > { %1708 = vmatpush.bf16.msra.mxu1 %v1697_v63  ;;  %1721 = vmatpush.bf16.msrb.mxu2 %v1700_v0 }
 0x3c5   : > { %v1679_v1 = vpack.c.b16 %v1664_v62, %v1664_v62 }
 0x3c7   : > { %v1703_v2 = vsel %vm493_vm0, %v1679_v1, 0  ;;  %v4069_v37 = vld [vmem:[#allocation5 + $0x38] sm:$0xf0]  ;;  %v3684_v40 = vld [vmem:[#allocation5 + $0x3c] sm:$0xf0] }
 0x3c8   : > { %1734 = vmatpush.bf16.msrb.mxu3 %v1703_v2  ;;  %v4726_v3 = vpop.permute.xlu2 %1499  ;;  %v3678_v44 = vld [vmem:[#allocation5 + $0x20] sm:$0xf] }
 0x3c9   : > { %1509 = vst.msk [vmem:[#allocation5 + $0x2c] sm:$0xf] %vm5305_vm9, %v4726_v3  ;;  %v1502_v47 = vrot.slane %v4726_v3, 4  ;;  %v3658_v2 = vld [vmem:[#allocation5] sm:$0xf] }
 0x3ca   : > { %v1551_v4 = vpop.permute.xlu0 %1550 }
 0x3cb   : > { %v1553_v6 = vrot.slane %v1551_v4, 4  ;;  %1560 = vst.msk [vmem:[#allocation5 + $0x50] sm:$0xf] %vm5305_vm9, %v1551_v4  ;;  %v4062_v4 = vld [vmem:[#allocation5 + $0x4] sm:$0xf] }
 0x3cd   : > { %v1554_v7 = vsel %vm493_vm0, %v1552_v5, %v1553_v6 }
 0x3ce   : > { %v1556_v8 = vsel %vm1555_vm12, %v1549_v59, %v1554_v7 }
 0x3cf   : > { %1559 = vst [vmem:[#allocation5 + $0x48] sm:$0xff] %v1556_v8 }
 0x3d0   : > { %v4733_v9 = vpop.permute.xlu2 %1464  ;;  %v4067_v41 = vld [vmem:[#allocation5 + $0x28] sm:$0xf0] }
 0x3d1   : > { %1475 = vst.msk [vmem:[#allocation5 + $0x14] sm:$0xf] %vm5305_vm9, %v4733_v9  ;;  %v3679_v45 = vor.u32 %v4067_v41, %v3678_v44  ;;  %v1467_v55 = vrot.slane %v4733_v9, 4 }
 0x3d2   : > { %v1568_v10 = vpop.permute.xlu0 %1567  ;;  %v3702_v17 = vld [vmem:[#allocation5 + $0x50] sm:$0xf] }
 0x3d3   : > { %v1570_v12 = vrot.slane %v1568_v10, 4  ;;  %1577 = vst.msk [vmem:[#allocation5 + $0x5c] sm:$0xf] %vm5305_vm9, %v1568_v10 }
 0x3d5   : > { %v1571_v13 = vsel %vm493_vm0, %v1569_v11, %v1570_v12  ;;  %v1618_v11 = vpop.permute.xlu1 %1617  ;;  %v1452_v12 = vld [vmem:[%s5299_s11] sm:$0x7] }
 0x3d6   : > { %v1573_v15 = vsel %vm1572_vm13, %v1566_v42, %v1571_v13  ;;  %v3694_v22 = vld [vmem:[#allocation5 + $0x48] sm:$0xf]  ;;  %v4071_v24 = vld [vmem:[#allocation5 + $0x4c] sm:$0xf] }
 0x3d7   : > { %1576 = vst [vmem:[#allocation5 + $0x54] sm:$0xff] %v1573_v15  ;;  %v4763_v15 = vperm.slane %v1452_v12, 0 }
 0x3d8   : > { %v4064_v14 = vld [vmem:[#allocation5 + $0x10] sm:$0xf0] }
 0x3d9   : > { %v3667_v50 = vor.u32 %v4064_v14, %v3666_v49  ;;  %v3796_v14 = vld [vmem:[#allocation12 + $0xa8] sm:$0xf]  ;;  %v4120_v49 = vld [vmem:[#allocation12 + $0x170] sm:$0xf0] }
 0x3da   : > { %v1517_v16 = vpop.permute.xlu0 %1516  ;;  %v4073_v18 = vld [vmem:[#allocation5 + $0x58] sm:$0xf0] }
 0x3db   : > { %v1519_v61 = vrot.slane %v1517_v16, 4  ;;  %1526 = vst.msk [vmem:[#allocation5 + $0x38] sm:$0xf] %vm5305_vm9, %v1517_v16  ;;  %v3703_v20 = vor.u32 %v4073_v18, %v3702_v17  ;;  %v4765_v17 = vperm.slane %v1452_v12, 2  ;;  %v4767_v18 = vperm.slane %v1452_v12, 1 }
 0x3dc   : > { %v3748_v12 = vld [vmem:[#allocation12 + $0x48] sm:$0xf] }
 0x3dd   : > { %v1520_v21 = vsel %vm493_vm0, %v1518_v19, %v1519_v61  ;;  %1735 = vmatpush.bf16.msrb.mxu3 %v3703_v20 }
 0x3de   : > { %v1522_v23 = vsel %vm1521_vm14, %v4711_v43, %v1520_v21  ;;  %v4072_v27 = vld [vmem:[#allocation5 + $0x50] sm:$0xf0]  ;;  %v3696_v25 = vld [vmem:[#allocation5 + $0x54] sm:$0xf0] }
 0x3df   : > { %1525 = vst [vmem:[#allocation5 + $0x30] sm:$0xff] %v1522_v23  ;;  %v3695_v26 = vor.u32 %v4072_v27, %v3694_v22  ;;  %v3699_v29 = vor.u32 %v4071_v24, %v3696_v25 }
 0x3e1   : > { %1709 = vmatpush.bf16.msra.mxu1 %v3695_v26  ;;  %1722 = vmatpush.bf16.msrb.mxu2 %v3699_v29 }
 0x3e2   : > { %v1481_v30 = vpop.permute.xlu0 %1480  ;;  %v3690_v31 = vld [vmem:[#allocation5 + $0x38] sm:$0xf] }
 0x3e3   : > { %v1484_v34 = vrot.slane %v1481_v30, 4  ;;  %v3691_v35 = vor.u32 %v4070_v32, %v3690_v31 }
 0x3e5   : > { %v1486_v36 = vsel %vm493_vm0, %v1484_v34, %v1485_v33  ;;  %1736 = vmatpush.bf16.msrb.mxu3 %v3691_v35 }
 0x3e6   : > { %v1488_v38 = vsel %vm1487_vm15, %v1481_v30, %v1486_v36  ;;  %v3682_v28 = vld [vmem:[#allocation5 + $0x30] sm:$0xf]  ;;  %v4068_v39 = vld [vmem:[#allocation5 + $0x34] sm:$0xf] }
 0x3e7   : > { %1491 = vst [vmem:[#allocation5 + $0x18] sm:$0xff] %v1488_v38  ;;  %v3683_v42 = vor.u32 %v4069_v37, %v3682_v28  ;;  %v3687_v43 = vor.u32 %v4068_v39, %v3684_v40 }
 0x3e9   : > { %1710 = vmatpush.bf16.msra.mxu1 %v3683_v42  ;;  %1723 = vmatpush.bf16.msrb.mxu2 %v3687_v43 }
 0x3ea   : > { %1737 = vmatpush.bf16.msrb.mxu3 %v3679_v45  ;;  %v1498_v46 = vpop.permute.xlu0 %1497 }
 0x3eb   : > { %v1501_v48 = vrot.slane %v1498_v46, 4 }
 0x3ed   : > { %v1503_v51 = vsel %vm493_vm0, %v1501_v48, %v1502_v47  ;;  %v3892_v47 = vld [vmem:[#allocation12 + $0x168] sm:$0xf] }
 0x3ee   : > { %v1505_v52 = vsel %vm1504_vm1, %v1498_v46, %v1503_v51  ;;  %1738 = vmatpush.bf16.msrb.mxu3 %v3667_v50  ;;  %v3670_v58 = vld [vmem:[#allocation5 + $0x18] sm:$0xf]  ;;  %v4065_v62 = vld [vmem:[#allocation5 + $0x1c] sm:$0xf]  ;;  %v3893_v50 = vor.u32 %v4120_v49, %v3892_v47  ;;  %v3712_v49 = vld [vmem:[#allocation12] sm:$0xf] }
 0x3ef   : > { %1508 = vst [vmem:[#allocation5 + $0x24] sm:$0xff] %v1505_v52  ;;  %v4096_v46 = vld [vmem:[#allocation12 + $0xb0] sm:$0xf0]  ;;  %v3784_v51 = vld [vmem:[#allocation12 + $0x90] sm:$0xf] }
 0x3f0   : > { %v3797_v48 = vor.u32 %v4096_v46, %v3796_v14  ;;  %v4093_v52 = vld [vmem:[#allocation12 + $0x98] sm:$0xf0] }
 0x3f1   : > { %3706 = vmatmul.msk.bf16.vlgmr.msrb.gmra.mxu3 %vm1692_vm2, %v1595_v53 }
 0x3f2   : > { %v1463_v54 = vpop.permute.xlu0 %1462  ;;  %2250 = vmatpush.bf16.msrb.mxu0 %v3797_v48  ;;  %v3762_v48 = vld [vmem:[#allocation12 + $0x6c] sm:$0xf0] }
 0x3f3   : > { %v1466_v56 = vrot.slane %v1463_v54, 4 }
 0x3f5   : > { %v1469_v57 = vsel %vm493_vm0, %v1466_v56, %v1467_v55  ;;  %v4117_v55 = vld [vmem:[#allocation12 + $0x158] sm:$0xf0] }
 0x3f6   : > { %v1471_v59 = vsel %vm1470_vm3, %v1463_v54, %v1469_v57  ;;  %v4066_v60 = vld [vmem:[#allocation5 + $0x20] sm:$0xf0]  ;;  %v3672_v63 = vld [vmem:[#allocation5 + $0x24] sm:$0xf0]  ;;  %v3785_v54 = vor.u32 %v4093_v52, %v3784_v51  ;;  %v4075_v51 = vld [vmem:[#allocation12 + $0x8] sm:$0xf0] }
 0x3f7   : > { %1474 = vst [vmem:[#allocation5 + $0xc] sm:$0xff] %v1471_v59  ;;  %v3671_v0 = vor.u32 %v4066_v60, %v3670_v58  ;;  %v3675_v1 = vor.u32 %v4065_v62, %v3672_v63  ;;  %v3772_v59 = vld [vmem:[#allocation12 + $0x78] sm:$0xf]  ;;  %v4090_v60 = vld [vmem:[#allocation12 + $0x80] sm:$0xf0] }
 0x3f8   : > { %2251 = vmatpush.bf16.msrb.mxu0 %v3785_v54  ;;  %v3868_v62 = vld [vmem:[#allocation12 + $0x138] sm:$0xf]  ;;  %v3808_v52 = vld [vmem:[#allocation12 + $0xc0] sm:$0xf] }
 0x3f9   : > { %1711 = vmatpush.bf16.msra.mxu1 %v3671_v0  ;;  %1724 = vmatpush.bf16.msrb.mxu2 %v3675_v1  ;;  %v3773_v0 = vor.u32 %v4090_v60, %v3772_v59  ;;  %v4114_v1 = vld [vmem:[#allocation12 + $0x140] sm:$0xf0] }
 0x3fc   : > { %2252 = vmatpush.bf16.msrb.mxu0 %v3773_v0  ;;  %v4097_v0 = vld [vmem:[#allocation12 + $0xb8] sm:$0xf0] }
 0x3fe   : > { %v4063_v3 = vld [vmem:[#allocation5 + $0x8] sm:$0xf0]  ;;  %v3660_v5 = vld [vmem:[#allocation5 + $0xc] sm:$0xf0] }
 0x3ff   : > { %v3659_v6 = vor.u32 %v4063_v3, %v3658_v2  ;;  %v3663_v7 = vor.u32 %v4062_v4, %v3660_v5  ;;  %v3869_v2 = vor.u32 %v4114_v1, %v3868_v62  ;;  %v3760_v3 = vld [vmem:[#allocation12 + $0x60] sm:$0xf]  ;;  %v4087_v4 = vld [vmem:[#allocation12 + $0x68] sm:$0xf0]  ;;  %v3894_v62 = vld [vmem:[#allocation12 + $0x174] sm:$0xf0] }
 0x400   : > { %v3856_v5 = vld [vmem:[#allocation12 + $0x120] sm:$0xf] }
 0x401   : > { %1712 = vmatpush.bf16.msra.mxu1 %v3659_v6  ;;  %1725 = vmatpush.bf16.msrb.mxu2 %v3663_v7  ;;  %v3761_v6 = vor.u32 %v4087_v4, %v3760_v3  ;;  %v4111_v7 = vld [vmem:[#allocation12 + $0x128] sm:$0xf0]  ;;  %v3916_v4 = vld [vmem:[#allocation12 + $0x198] sm:$0xf] }
 0x403   : > { %2253 = vmatpush.bf16.msrb.mxu0 %v3761_v6  ;;  %v4080_v6 = vld [vmem:[#allocation12 + $0x34] sm:$0xf] }
 0x404   : > { %3704 = vmatmul.msk.bf16.vlgmr.msra.gmra.mxu1 %vm1692_vm2, %v1595_v53  ;;  %3705 = vmatmul.msk.bf16.vlgmr.msrb.gmra.mxu2 %vm1692_vm2, %v1595_v53  ;;  %v3880_v53 = vld [vmem:[#allocation12 + $0x150] sm:$0xf]  ;;  %vm2374_vm2 = vcmask 1041408  }
 0x405   : > { %2263 = vmatpush.bf16.msrb.mxu1 %v3893_v50  ;;  %v3881_v57 = vor.u32 %v4117_v55, %v3880_v53  ;;  %v4099_v53 = vld [vmem:[#allocation12 + $0xc8] sm:$0xf0] }
 0x406   : > { %v4083_v55 = vld [vmem:[#allocation12 + $0x4c] sm:$0xf]  ;;  %v3809_v59 = vor.u32 %v4099_v53, %v3808_v52 }
 0x409   : > { %2264 = vmatpush.bf16.msrb.mxu1 %v3881_v57  ;;  %v4119_v57 = vld [vmem:[#allocation12 + $0x16c] sm:$0xf] }
 0x40d   : > { %2265 = vmatpush.bf16.msrb.mxu1 %v3869_v2  ;;  %v3897_v2 = vor.u32 %v4119_v57, %v3894_v62 }
 0x474   : > { %v1740_v8 = vpop.f32.mrf.mxu3 }
 0x475   : > { %v1741_v16 = vadd.f32 %v1740_v8, %v1618_v11  ;;  %v4095_v8 = vld [vmem:[#allocation12 + $0xac] sm:$0xf] }
 0x477   : > { %v1753_v22 = vmul.f32 %v4765_v17, %v1741_v16 }
 0x479   : > { %v1757_v26 = vsel %vm5305_vm9, %v1753_v22, 0.0  ;;  %v3786_v22 = vld [vmem:[#allocation12 + $0x9c] sm:$0xf0] }
 0x47c   : > { %v1742_v9 = vpop.f32.mrf.mxu3 }
 0x47d   : > { %v3798_v9 = vld [vmem:[#allocation12 + $0xb4] sm:$0xf0] }
 0x481   : > { %v1714_v10 = vpop.f32.mrf.mxu1 }
 0x482   : > { %v1715_v13 = vadd.f32 %v1714_v10, %v1618_v11  ;;  %v3857_v10 = vor.u32 %v4111_v7, %v3856_v5  ;;  %v4126_v5 = vld [vmem:[#allocation12 + $0x1a0] sm:$0xf0] }
 0x484   : > { %v1751_v61 = vmul.f32 %v4763_v15, %v1715_v13  ;;  %2266 = vmatpush.bf16.msrb.mxu1 %v3857_v10  ;;  %v3917_v10 = vor.u32 %v4126_v5, %v3916_v4 }
 0x486   : > { %v1754_v27 = vsel %vm493_vm0, %v1751_v61, 0.0  ;;  %2282 = vmatpush.bf16.msra.mxu2 %v3917_v10 }
 0x487   : > { %v1727_v19 = vpop.f32.mrf.mxu2 }
 0x488   : > { %v1728_v20 = vadd.f32 %v1727_v19, %v1618_v11  ;;  %v3801_v11 = vor.u32 %v4095_v8, %v3798_v9 }
 0x489   : > { %v1716_v21 = vpop.f32.mrf.mxu1 }
 0x48a   : > { %v1752_v23 = vmul.f32 %v4767_v18, %v1728_v20  ;;  %2289 = vmatpush.bf16.msra.mxu3 %v3801_v11  ;;  %v4092_v21 = vld [vmem:[#allocation12 + $0x94] sm:$0xf]  ;;  %v3738_v11 = vld [vmem:[#allocation12 + $0x3c] sm:$0xf0] }
 0x48c   : > { %v1755_v24 = vsel %vm493_vm0, %v1752_v23, 0.0 }
 0x48d   : > { %v1756_v25 = vadd.f32 %v1755_v24, %v1754_v27  ;;  %v3789_v24 = vor.u32 %v4092_v21, %v3786_v22  ;;  %v3726_v22 = vld [vmem:[#allocation12 + $0x24] sm:$0xf0] }
 0x48f   : > { %v1729_v29 = vpop.f32.mrf.mxu2  ;;  %v1758_v30 = vadd.f32 %v1757_v26, %v1756_v25  ;;  %2290 = vmatpush.bf16.msra.mxu3 %v3789_v24  ;;  %v3736_v26 = vld [vmem:[#allocation12 + $0x30] sm:$0xf] }
 0x490   : > { %v4081_v29 = vld [vmem:[#allocation12 + $0x38] sm:$0xf0] }
 0x491   : > { %1759 = vadd.xlane.f32.xlu0 %v1758_v30  ;;  %v3832_v30 = vld [vmem:[#allocation12 + $0xf0] sm:$0xf] }
 0x504   : > { %v1760_v31 = vpop.xlane.xlu0 %1759 }
 0x505   : > { %v1761_v32 = vmul.f32 0.00390625, %v1760_v31  ;;  %v3737_v31 = vor.u32 %v4081_v29, %v3736_v26  ;;  %v3870_v29 = vld [vmem:[#allocation12 + $0x144] sm:$0xf0] }
 0x507   : > { %v4775_v33 = vsub.f32 %v1715_v13, %v1761_v32  ;;  %v4777_v34 = vsub.f32 %v1728_v20, %v1761_v32  ;;  %v4779_v35 = vsub.f32 %v1741_v16, %v1761_v32  ;;  %v4084_v13 = vld [vmem:[#allocation12 + $0x50] sm:$0xf0]  ;;  %v3844_v16 = vld [vmem:[#allocation12 + $0x108] sm:$0xf]  ;;  %v4105_v32 = vld [vmem:[#allocation12 + $0xf8] sm:$0xf0] }
 0x508   : > { %v3749_v61 = vor.u32 %v4084_v13, %v3748_v12  ;;  %v4108_v20 = vld [vmem:[#allocation12 + $0x110] sm:$0xf0]  ;;  %v3882_v13 = vld [vmem:[#allocation12 + $0x15c] sm:$0xf0] }
 0x509   : > { %v1765_v36 = vmul.f32 %v4775_v33, %v4775_v33  ;;  %v1766_v37 = vmul.f32 %v4777_v34, %v4777_v34  ;;  %v1767_v41 = vmul.f32 %v4779_v35, %v4779_v35  ;;  %v3845_v27 = vor.u32 %v4108_v20, %v3844_v16  ;;  %v4116_v12 = vld [vmem:[#allocation12 + $0x154] sm:$0xf]  ;;  %v3792_v16 = vld [vmem:[#allocation12 + $0x98] sm:$0xf] }
 0x50a   : > { %2254 = vmatpush.bf16.msrb.mxu0 %v3749_v61 }
 0x50b   : > { %v1768_v38 = vmul.f32 %v1765_v36, %v4763_v15  ;;  %v1769_v28 = vmul.f32 %v1766_v37, %v4767_v18  ;;  %v1770_v39 = vmul.f32 %v1767_v41, %v4765_v17  ;;  %2267 = vmatpush.bf16.msrb.mxu1 %v3845_v27  ;;  %v4089_v36 = vld [vmem:[#allocation12 + $0x7c] sm:$0xf]  ;;  %v3774_v37 = vld [vmem:[#allocation12 + $0x84] sm:$0xf0] }
 0x50d   : > { %v1771_v40 = vsel %vm493_vm0, %v1768_v38, 0.0  ;;  %v1772_v42 = vsel %vm493_vm0, %v1769_v28, 0.0  ;;  %v1774_v44 = vsel %vm5305_vm9, %v1770_v39, 0.0  ;;  %v3833_v38 = vor.u32 %v4105_v32, %v3832_v30  ;;  %v3724_v39 = vld [vmem:[#allocation12 + $0x18] sm:$0xf] }
 0x50e   : > { %v1773_v43 = vadd.f32 %v1772_v42, %v1771_v40  ;;  %v3777_v28 = vor.u32 %v4089_v36, %v3774_v37  ;;  %v4078_v40 = vld [vmem:[#allocation12 + $0x20] sm:$0xf0]  ;;  %2255 = vmatpush.bf16.msrb.mxu0 %v3737_v31  ;;  %v3780_v30 = vld [vmem:[#allocation12 + $0x80] sm:$0xf]  ;;  %v4091_v31 = vld [vmem:[#allocation12 + $0x88] sm:$0xf0] }
 0x50f   : > { %v3725_v42 = vor.u32 %v4078_v40, %v3724_v39  ;;  %2268 = vmatpush.bf16.msrb.mxu1 %v3833_v38  ;;  %v4123_v38 = vld [vmem:[#allocation12 + $0x188] sm:$0xf0]  ;;  %v3781_v46 = vor.u32 %v4091_v31, %v3780_v30  ;;  %v3846_v31 = vld [vmem:[#allocation12 + $0x114] sm:$0xf0]  ;;  %vm2397_vm9 = vcmask 254976  }
 0x510   : > { %v1775_v45 = vadd.f32 %v1774_v44, %v1773_v43  ;;  %v3820_v43 = vld [vmem:[#allocation12 + $0xd8] sm:$0xf]  ;;  %v4102_v44 = vld [vmem:[#allocation12 + $0xe0] sm:$0xf0]  ;;  %2291 = vmatpush.bf16.msra.mxu3 %v3777_v28  ;;  %v4125_v28 = vld [vmem:[#allocation12 + $0x19c] sm:$0xf] }
 0x511   : > { %v3821_v47 = vor.u32 %v4102_v44, %v3820_v43  ;;  %v4074_v43 = vld [vmem:[#allocation12 + $0x4] sm:$0xf]  ;;  %v3714_v44 = vld [vmem:[#allocation12 + $0xc] sm:$0xf0]  ;;  %v4107_v30 = vld [vmem:[#allocation12 + $0x10c] sm:$0xf] }
 0x512   : > { %1776 = vadd.xlane.f32.xlu2 %v1775_v45  ;;  %v4086_v45 = vld [vmem:[#allocation12 + $0x64] sm:$0xf]  ;;  %2256 = vmatpush.bf16.msrb.mxu0 %v3725_v42  ;;  %v3918_v42 = vld [vmem:[#allocation12 + $0x1a4] sm:$0xf0]  ;;  %v3717_v53 = vor.u32 %v4074_v43, %v3714_v44  ;;  %v3849_v43 = vor.u32 %v4107_v30, %v3846_v31  ;;  %v4085_v44 = vld [vmem:[#allocation12 + $0x58] sm:$0xf0] }
 0x513   : > { %v3765_v50 = vor.u32 %v4086_v45, %v3762_v48  ;;  %2269 = vmatpush.bf16.msrb.mxu1 %v3821_v47  ;;  %v3921_v47 = vor.u32 %v4125_v28, %v3918_v42  ;;  %v4110_v48 = vld [vmem:[#allocation12 + $0x124] sm:$0xf]  ;;  %v3756_v28 = vld [vmem:[#allocation12 + $0x50] sm:$0xf]  ;;  %v3912_v31 = vld [vmem:[#allocation12 + $0x188] sm:$0xf] }
 0x515   : > { %2292 = vmatpush.bf16.msra.mxu3 %v3765_v50  ;;  %v3768_v50 = vld [vmem:[#allocation12 + $0x68] sm:$0xf] }
 0x517   : > { %2270 = vmatpush.bf16.msrb.mxu1 %v3809_v59 }
 0x585   : > { %v1777_v56 = vpop.xlane.xlu2 %1776 }
 0x586   : > { %v1778_v58 = vmul.f32 0.00390625, %v1777_v56  ;;  %v3750_v56 = vld [vmem:[#allocation12 + $0x54] sm:$0xf0] }
 0x587   : > { %v3753_v60 = vor.u32 %v4083_v55, %v3750_v56 }
 0x588   : > { %v1779_v63 = vadd.f32 1e-05, %v1778_v58  ;;  %v3713_v58 = vor.u32 %v4075_v51, %v3712_v49  ;;  %v3858_v49 = vld [vmem:[#allocation12 + $0x12c] sm:$0xf0]  ;;  %v4088_v51 = vld [vmem:[#allocation12 + $0x70] sm:$0xf0] }
 0x589   : > { %2293 = vmatpush.bf16.msra.mxu3 %v3753_v60  ;;  %v3861_v57 = vor.u32 %v4110_v48, %v3858_v49  ;;  %v3769_v60 = vor.u32 %v4088_v51, %v3768_v50  ;;  %v3757_v48 = vor.u32 %v4085_v44, %v3756_v28  ;;  %v4104_v49 = vld [vmem:[#allocation12 + $0xf4] sm:$0xf]  ;;  %v3834_v50 = vld [vmem:[#allocation12 + $0xfc] sm:$0xf0] }
 0x58a   : > { %4239 = vrsqrt.f32 %v1779_v63  ;;  %vm1786_vm5 = vweird.f32 %v1779_v63  ;;  %2257 = vmatpush.bf16.msrb.mxu0 %v3713_v58 }
 0x58e   : > { %2302 = vmatpush.bf16.msra.mxu0 %v3897_v2 }
 0x590   : > { %v4240_v19 = vpop.eup %4239 }
 0x591   : > { %v1781_v23 = vmul.f32 %v4240_v19, %v1779_v63  ;;  %vm1787_vm4 = vweird.f32 %v4240_v19  ;;  %v3804_v63 = vld [vmem:[#allocation12 + $0xb0] sm:$0xf] }
 0x592   : > { %vm4794_vm6 = vmor %vm1786_vm5, %vm1787_vm4  ;;  %v3805_v3 = vor.u32 %v4097_v0, %v3804_v63  ;;  %vm2386_vm5 = vcmask 570372  }
 0x593   : > { %v1782_v25 = vmul.f32 %v4240_v19, %v1781_v23  ;;  %v4113_v23 = vld [vmem:[#allocation12 + $0x13c] sm:$0xf]  ;;  %vm2385_vm4 = vmor %vm2384_vm8, %vm2374_vm2  ;;  %vm2418_vm8 = vcmask 257026  }
 0x594   : > { %2328 = vmatpush.bf16.msra.mxu1 %v3805_v3 }
 0x595   : > { %v1783_v41 = vmul.f32 0.5, %v1782_v25 }
 0x597   : > { %v1784_v14 = vsub.f32 1.5, %v1783_v41  ;;  %v3904_v41 = vld [vmem:[#allocation12 + $0x180] sm:$0xf] }
 0x598   : > { %v3905_v40 = vor.u32 %v4123_v38, %v3904_v41 }
 0x599   : > { %v1785_v54 = vmul.f32 %v4240_v19, %v1784_v14  ;;  %v3873_v14 = vor.u32 %v4113_v23, %v3870_v29  ;;  %v3906_v23 = vld [vmem:[#allocation12 + $0x18c] sm:$0xf0] }
 0x59a   : > { %2283 = vmatpush.bf16.msra.mxu2 %v3905_v40 }
 0x59b   : > { %v1789_v1 = vsel %vm4794_vm6, %v4240_v19, %v1785_v54  ;;  %v4094_v19 = vld [vmem:[#allocation12 + $0xa0] sm:$0xf0]  ;;  %vm2378_vm6 = vcmask 1045508  }
 0x59c   : > { %v4801_v7 = vmul.f32 %v1789_v1, %v4775_v33  ;;  %v4804_v8 = vmul.f32 %v1789_v1, %v4777_v34  ;;  %v4807_v9 = vmul.f32 %v1789_v1, %v4779_v35  ;;  %v3741_v33 = vor.u32 %v4080_v6, %v3738_v11  ;;  %v4077_v35 = vld [vmem:[#allocation12 + $0x1c] sm:$0xf] }
 0x59d   : > { %v3885_v34 = vor.u32 %v4116_v12, %v3882_v13  ;;  %v3793_v26 = vor.u32 %v4094_v19, %v3792_v16  ;;  %v3729_v39 = vor.u32 %v4077_v35, %v3726_v22 }
 0x59e   : > { %v1793_v61 = vmul.f32 0.70710677, %v4801_v7  ;;  %v1794_v20 = vmul.f32 0.70710677, %v4804_v8  ;;  %v1795_v21 = vmul.f32 0.70710677, %v4807_v9  ;;  %2294 = vmatpush.bf16.msra.mxu3 %v3741_v33  ;;  %2321 = vmatpush.bf16.msrb.mxu2 %v3921_v47 }
 0x59f   : > { %2303 = vmatpush.bf16.msra.mxu0 %v3885_v34  ;;  %2329 = vmatpush.bf16.msra.mxu1 %v3793_v26  ;;  %v4122_v33 = vld [vmem:[#allocation12 + $0x184] sm:$0xf] }
 0x5a0   : > { %v4812_v27 = vclamps-f32 %v1793_v61, 3.832507  ;;  %v4814_v24 = vclamps-f32 %v1794_v20, 3.832507  ;;  %v4816_v25 = vclamps-f32 %v1795_v21, 3.832507  ;;  %v3909_v29 = vor.u32 %v4122_v33, %v3906_v23 }
 0x5a1   : > { %v4076_v23 = vld [vmem:[#allocation12 + $0x10] sm:$0xf0] }
 0x5a2   : > { %v4820_v32 = vmul.f32 %v4812_v27, %v4812_v27  ;;  %v4824_v36 = vmul.f32 %v4814_v24, %v4814_v24  ;;  %v4828_v37 = vmul.f32 %v4816_v25, %v4816_v25  ;;  %2295 = vmatpush.bf16.msra.mxu3 %v3729_v39  ;;  %2322 = vmatpush.bf16.msrb.mxu2 %v3909_v29 }
 0x5a3   : > { %2304 = vmatpush.bf16.msra.mxu0 %v3873_v14  ;;  %2330 = vmatpush.bf16.msra.mxu1 %v3781_v46 }
 0x5a4   : > { %v1807_v45 = vmul.f32 0.00022905065, %v4828_v37  ;;  %v1805_v52 = vmul.f32 0.00022905065, %v4820_v32  ;;  %v1829_v54 = vmul.f32 -1.1791603e-07, %v4820_v32 }
 0x5a5   : > { %v1806_v55 = vmul.f32 0.00022905065, %v4824_v36  ;;  %v1830_v59 = vmul.f32 -1.1791603e-07, %v4824_v36  ;;  %v1831_v0 = vmul.f32 -1.1791603e-07, %v4828_v37 }
 0x5a6   : > { %v1810_v56 = vadd.f32 0.003408291, %v1807_v45  ;;  %v1808_v58 = vadd.f32 0.003408291, %v1805_v52  ;;  %v1832_v62 = vadd.f32 2.3547966e-05, %v1829_v54  ;;  %2296 = vmatpush.bf16.msra.mxu3 %v3717_v53  ;;  %v3837_v53 = vor.u32 %v4104_v49, %v3834_v50 }
 0x5a7   : > { %v1809_v63 = vadd.f32 0.003408291, %v1806_v55  ;;  %v1833_v1 = vadd.f32 2.3547966e-05, %v1830_v59  ;;  %v1834_v3 = vadd.f32 2.3547966e-05, %v1831_v0  ;;  %2305 = vmatpush.bf16.msra.mxu0 %v3861_v57  ;;  %2331 = vmatpush.bf16.msra.mxu1 %v3769_v60 }
 0x5a8   : > { %v1835_v2 = vmul.f32 %v1832_v62, %v4820_v32  ;;  %v1811_v4 = vmul.f32 %v1808_v58, %v4820_v32  ;;  %v1813_v10 = vmul.f32 %v1810_v56, %v4828_v37  ;;  %v3744_v54 = vld [vmem:[#allocation12 + $0x38] sm:$0xf]  ;;  %v4082_v55 = vld [vmem:[#allocation12 + $0x40] sm:$0xf0]  ;;  %v4101_v60 = vld [vmem:[#allocation12 + $0xdc] sm:$0xf] }
 0x5a9   : > { %v1812_v5 = vmul.f32 %v1809_v63, %v4824_v36  ;;  %v1836_v6 = vmul.f32 %v1833_v1, %v4824_v36  ;;  %v1837_v12 = vmul.f32 %v1834_v3, %v4828_v37  ;;  %v3745_v59 = vor.u32 %v4082_v55, %v3744_v54  ;;  %v3822_v0 = vld [vmem:[#allocation12 + $0xe4] sm:$0xf0]  ;;  %v3732_v1 = vld [vmem:[#allocation12 + $0x20] sm:$0xf]  ;;  %v3900_v55 = vld [vmem:[#allocation12 + $0x170] sm:$0xf] }
 0x5aa   : > { %v1838_v11 = vadd.f32 0.0010179626, %v1835_v2  ;;  %v1814_v61 = vadd.f32 0.050955694, %v1811_v4  ;;  %v1816_v34 = vadd.f32 0.050955694, %v1813_v10  ;;  %v3825_v4 = vor.u32 %v4101_v60, %v3822_v0 }
 0x5ab   : > { %v1839_v13 = vadd.f32 0.0010179626, %v1836_v6  ;;  %v1840_v19 = vadd.f32 0.0010179626, %v1837_v12  ;;  %v1815_v20 = vadd.f32 0.050955694, %v1812_v5  ;;  %2306 = vmatpush.bf16.msra.mxu0 %v3849_v43  ;;  %2332 = vmatpush.bf16.msra.mxu1 %v3757_v48 }
 0x5ac   : > { %v1841_v16 = vmul.f32 %v1838_v11, %v4820_v32  ;;  %v1817_v39 = vmul.f32 %v1814_v61, %v4820_v32  ;;  %v1819_v46 = vmul.f32 %v1816_v34, %v4828_v37  ;;  %v4079_v5 = vld [vmem:[#allocation12 + $0x28] sm:$0xf0]  ;;  %v3924_v11 = vld [vmem:[#allocation12 + $0x1a0] sm:$0xf]  ;;  %v4098_v61 = vld [vmem:[#allocation12 + $0xc4] sm:$0xf] }
 0x5ad   : > { %v1842_v21 = vmul.f32 %v1839_v13, %v4824_v36  ;;  %v1843_v22 = vmul.f32 %v1840_v19, %v4828_v37  ;;  %v1818_v40 = vmul.f32 %v1815_v20, %v4824_v36  ;;  %v4127_v19 = vld [vmem:[#allocation12 + $0x1a8] sm:$0xf0]  ;;  %v3810_v20 = vld [vmem:[#allocation12 + $0xcc] sm:$0xf0]  ;;  %v1874_v48 = vmul.f32 0.5, %v4801_v7 }
 0x5ae   : > { %v1844_v35 = vadd.f32 0.01407047, %v1841_v16  ;;  %v1820_v56 = vadd.f32 0.18520832, %v1817_v39  ;;  %v1822_v2 = vadd.f32 0.18520832, %v1819_v46  ;;  %v3733_v16 = vor.u32 %v4079_v5, %v3732_v1 }
 0x5af   : > { %v1845_v26 = vadd.f32 0.01407047, %v1842_v21  ;;  %v1846_v38 = vadd.f32 0.01407047, %v1843_v22  ;;  %v1821_v57 = vadd.f32 0.18520832, %v1818_v40  ;;  %2307 = vmatpush.bf16.msra.mxu0 %v3837_v53  ;;  %2333 = vmatpush.bf16.msra.mxu1 %v3745_v59 }
 0x5b0   : > { %v1847_v41 = vmul.f32 %v1844_v35, %v4820_v32  ;;  %v1823_v12 = vmul.f32 %v1820_v56, %v4820_v32  ;;  %v3925_v35 = vor.u32 %v4127_v19, %v3924_v11  ;;  %v3720_v22 = vld [vmem:[#allocation12 + $0x8] sm:$0xf]  ;;  %v1876_v53 = vmul.f32 0.5, %v4807_v9  ;;  %v4121_v56 = vld [vmem:[#allocation12 + $0x178] sm:$0xf0] }
 0x5b1   : > { %v1848_v42 = vmul.f32 %v1845_v26, %v4824_v36  ;;  %v1849_v14 = vmul.f32 %v1846_v38, %v4828_v37  ;;  %v1824_v33 = vmul.f32 %v1821_v57, %v4824_v36  ;;  %v1825_v26 = vmul.f32 %v1822_v2, %v4828_v37  ;;  %v3888_v7 = vld [vmem:[#allocation12 + $0x158] sm:$0xf]  ;;  %v3876_v9 = vld [vmem:[#allocation12 + $0x140] sm:$0xf]  ;;  %v3864_v1 = vld [vmem:[#allocation12 + $0x128] sm:$0xf] }
 0x5b2   : > { %v1850_v45 = vadd.f32 0.11098505, %v1847_v41  ;;  %2360 = vmatpush.bf16.msrb.mxu3 %v3925_v35  ;;  %v4124_v41 = vld [vmem:[#allocation12 + $0x190] sm:$0xf0]  ;;  %v1826_v38 = vadd.f32 1.1283791, %v1823_v12  ;;  %v3721_v28 = vor.u32 %v4076_v23, %v3720_v22  ;;  %v3901_v59 = vor.u32 %v4121_v56, %v3900_v55 }
 0x5b3   : > { %v1851_v47 = vadd.f32 0.11098505, %v1848_v42  ;;  %v1852_v52 = vadd.f32 0.11098505, %v1849_v14  ;;  %2308 = vmatpush.bf16.msra.mxu0 %v3825_v4  ;;  %2334 = vmatpush.bf16.msra.mxu1 %v3733_v16  ;;  %v1827_v39 = vadd.f32 1.1283791, %v1824_v33 }
 0x5b4   : > { %v1853_v51 = vmul.f32 %v1850_v45, %v4820_v32  ;;  %v1828_v40 = vadd.f32 1.1283791, %v1825_v26  ;;  %v4112_v2 = vld [vmem:[#allocation12 + $0x130] sm:$0xf0]  ;;  %v3852_v4 = vld [vmem:[#allocation12 + $0x110] sm:$0xf] }
 0x5b5   : > { %v1854_v58 = vmul.f32 %v1851_v47, %v4824_v36  ;;  %v1855_v63 = vmul.f32 %v1852_v52, %v4828_v37  ;;  %v1866_v43 = vmul.f32 %v4814_v24, %v1827_v39  ;;  %v4109_v5 = vld [vmem:[#allocation12 + $0x118] sm:$0xf0]  ;;  %v4106_v11 = vld [vmem:[#allocation12 + $0x100] sm:$0xf0]  ;;  %v4103_v16 = vld [vmem:[#allocation12 + $0xe8] sm:$0xf0] }
 0x5b6   : > { %v1856_v62 = vadd.f32 0.49746925, %v1853_v51  ;;  %v1867_v45 = vmul.f32 %v4816_v25, %v1828_v40  ;;  %v1875_v51 = vmul.f32 0.5, %v4804_v8 }
 0x5b7   : > { %v1857_v3 = vadd.f32 0.49746925, %v1854_v58  ;;  %v1858_v10 = vadd.f32 0.49746925, %v1855_v63  ;;  %2335 = vmatpush.bf16.msra.mxu1 %v3721_v28  ;;  %v4115_v63 = vld [vmem:[#allocation12 + $0x148] sm:$0xf0] }
 0x5b8   : > { %v1859_v6 = vmul.f32 %v1856_v62, %v4820_v32  ;;  %v3813_v32 = vor.u32 %v4098_v61, %v3810_v20  ;;  %v4118_v62 = vld [vmem:[#allocation12 + $0x160] sm:$0xf0]  ;;  %v3877_v0 = vor.u32 %v4115_v63, %v3876_v9  ;;  %v3816_v61 = vld [vmem:[#allocation12 + $0xc8] sm:$0xf]  ;;  %v4100_v20 = vld [vmem:[#allocation12 + $0xd0] sm:$0xf0] }
 0x5b9   : > { %v1860_v13 = vmul.f32 %v1857_v3, %v4824_v36  ;;  %v1861_v34 = vmul.f32 %v1858_v10, %v4828_v37  ;;  %v3913_v36 = vor.u32 %v4124_v41, %v3912_v31  ;;  %v1865_v37 = vmul.f32 %v4812_v27, %v1826_v38  ;;  %v3840_v10 = vld [vmem:[#allocation12 + $0xf8] sm:$0xf] }
 0x5ba   : > { %v1862_v21 = vadd.f32 1.0, %v1859_v6  ;;  %2309 = vmatpush.bf16.msra.mxu0 %v3813_v32  ;;  %v3889_v8 = vor.u32 %v4118_v62, %v3888_v7  ;;  %v3865_v3 = vor.u32 %v4112_v2, %v3864_v1  ;;  %v3853_v6 = vor.u32 %v4109_v5, %v3852_v4 }
 0x5bb   : > { %v1863_v29 = vadd.f32 1.0, %v1860_v13  ;;  %v1864_v30 = vadd.f32 1.0, %v1861_v34  ;;  %2361 = vmatpush.bf16.msrb.mxu3 %v3913_v36  ;;  %v3841_v12 = vor.u32 %v4106_v11, %v3840_v10  ;;  %v3828_v13 = vld [vmem:[#allocation12 + $0xe0] sm:$0xf] }
 0x5bc   : > { %4241 = vrcp.f32 %v1862_v21  ;;  %v3829_v19 = vor.u32 %v4103_v16, %v3828_v13  ;;  %v3817_v21 = vor.u32 %v4100_v20, %v3816_v61 }
 0x5bd   : > { %4243 = vrcp.f32 %v1863_v29 }
 0x5be   : > { %4245 = vrcp.f32 %v1864_v30 }
 0x5c2   : > { %v4242_v42 = vpop.eup %4241 }
 0x5c3   : > { %v4244_v44 = vpop.eup %4243  ;;  %v1871_v14 = vmul.f32 %v4242_v42, %v1865_v37 }
 0x5c4   : > { %v4246_v46 = vpop.eup %4245  ;;  %v1872_v47 = vmul.f32 %v4244_v44, %v1866_v43 }
 0x5c5   : > { %v1877_v49 = vadd.f32 1.0, %v1871_v14  ;;  %v1873_v50 = vmul.f32 %v4246_v46, %v1867_v45 }
 0x5c6   : > { %v1878_v52 = vadd.f32 1.0, %v1872_v47 }
 0x5c7   : > { %v1880_v27 = vmul.f32 %v1877_v49, %v1874_v48  ;;  %v1879_v54 = vadd.f32 1.0, %v1873_v50 }
 0x5c8   : > { %v1881_v24 = vmul.f32 %v1878_v52, %v1875_v51 }
 0x5c9   : > { %v1883_v57 = vpack.c.bf16 %v1880_v27, %v1880_v27  ;;  %v1882_v58 = vmul.f32 %v1879_v54, %v1876_v53 }
 0x5ca   : > { %v1884_v25 = vpack.c.bf16 %v1881_v24, %v1881_v24 }
 0x5cb   : > { %2258 = vmatmul.bf16.vlgmr.msrb.gmra.mxu0 %v1883_v57  ;;  %v1885_v60 = vpack.c.bf16 %v1882_v58, %v1882_v58  ;;  %2297 = vmatmul.bf16.vlgmr.msra.gmra.mxu3 %v1883_v57 }
 0x5cc   : > { %2271 = vmatmul.bf16.vlgmr.msrb.gmra.mxu1 %v1884_v25 }
 0x5cd   : > { %3926 = vmatmul.msk.bf16.vlgmr.msra.gmra.mxu2 %vm2246_vm7, %v1885_v60 }
 0x5ce   : > { %2341 = vmatpush.bf16.msra.mxu2 %v3901_v59 }
 0x5d2   : > { %2342 = vmatpush.bf16.msra.mxu2 %v3889_v8 }
 0x5d6   : > { %2343 = vmatpush.bf16.msra.mxu2 %v3877_v0 }
 0x5da   : > { %2344 = vmatpush.bf16.msra.mxu2 %v3865_v3 }
 0x5db   : > { %2310 = vmatmul.bf16.vlgmr.msra.gmra.mxu0 %v1884_v25  ;;  %3928 = vmatmul.msk.bf16.vlgmr.msrb.gmra.mxu3 %vm2246_vm7, %v1885_v60 }
 0x5dc   : > { %2336 = vmatmul.bf16.vlgmr.msra.gmra.mxu1 %v1883_v57 }
 0x5dd   : > { %3927 = vmatmul.msk.bf16.vlgmr.msrb.gmra.mxu2 %vm2246_vm7, %v1885_v60  ;;  %vm2387_vm7 = vmor %vm2386_vm5, %vm2385_vm4  ;;  %vm2946_vm4 = vcmask 15360   ;;  %vm3095_vm5 = vcmask 31744  }
 0x5de   : > { %2345 = vmatpush.bf16.msra.mxu2 %v3853_v6 }
 0x5e2   : > { %2346 = vmatpush.bf16.msra.mxu2 %v3841_v12 }
 0x5e6   : > { %2347 = vmatpush.bf16.msra.mxu2 %v3829_v19 }
 0x5ea   : > { %2348 = vmatpush.bf16.msra.mxu2 %v3817_v21 }
 0x5ed   : > { %2349 = vmatmul.bf16.vlgmr.msra.gmra.mxu2 %v1884_v25 }
 0x648   : > { %v2259_v33 = vpop.f32.mrf.mxu0 }
 0x649   : > { %v2272_v34 = vpop.f32.mrf.mxu1 }
 0x64a   : > { %v2273_v42 = vadd.f32 %v2272_v34, %v2259_v33 }
 0x64e   : > { %v2298_v35 = vpop.f32.mrf.mxu3 }
 0x650   : > { %v2285_v22 = vpop.f32.mrf.mxu2  ;;  %v2261_v23 = vpop.f32.mrf.mxu0 }
 0x651   : > { %v2274_v26 = vpop.f32.mrf.mxu1  ;;  %v2286_v44 = vadd.f32 %v2285_v22, %v2273_v42 }
 0x656   : > { %v2300_v29 = vpop.f32.mrf.mxu3 }
 0x658   : > { %v2287_v32 = vpop.f32.mrf.mxu2  ;;  %v2311_v30 = vpop.f32.mrf.mxu0 }
 0x659   : > { %v2337_v31 = vpop.f32.mrf.mxu1  ;;  %v2312_v37 = vadd.f32 %v2311_v30, %v2298_v35 }
 0x65e   : > { %v2363_v41 = vpop.f32.mrf.mxu3 }
 0x660   : > { %v2324_v38 = vpop.f32.mrf.mxu2  ;;  %v2313_v28 = vpop.f32.mrf.mxu0 }
 0x661   : > { %v2339_v36 = vpop.f32.mrf.mxu1  ;;  %v2325_v43 = vadd.f32 %v2324_v38, %v2312_v37 }
 0x663   : > { %v2367_v14 = vpack.c.bf16 %v2325_v43, %v2286_v44 }
 0x665   : > { %v2371_v48 = vrot.slane %v2367_v14, 2 }
 0x666   : > { %v2365_v39 = vpop.f32.mrf.mxu3 }
 0x667   : > { %v2377_v53 = vsel %vm2374_vm2, %v2367_v14, %v2371_v48 }
 0x668   : > { %v2326_v40 = vpop.f32.mrf.mxu2 }
 0x670   : > { %v2350_v45 = vpop.f32.mrf.mxu2 }
 0x671   : > { %v2351_v46 = vadd.f32 %v2350_v45, %v2337_v31 }
 0x673   : > { %v2364_v47 = vadd.f32 %v2363_v41, %v2351_v46 }
 0x675   : > { %v2368_v49 = vpack.c.bf16 %v2364_v47, %v2364_v47 }
 0x677   : > { %v2372_v50 = vrot.slane %v2368_v49, 4  ;;  %v2373_v51 = vrot.slane %v2368_v49, 6 }
 0x678   : > { %v2352_v52 = vpop.f32.mrf.mxu2 }
 0x679   : > { %v2381_v27 = vsel %vm2378_vm6, %v2372_v50, %v2373_v51 }
 0x67a   : > { %v2382_v54 = vsel %vm493_vm0, %v2377_v53, %v2381_v27 }
 0x67b   : > { %2388 = vst.msk [vmem:[#allocation4] sm:$0x3f] %vm2387_vm7, %v2382_v54 }
 0x682   : > { %v2389_v55 = vld [vmem:[#allocation4] sm:$0x3f] }
 0x683   : > { %2391 = vst [vmem:[#allocation1] ss:$2 sm:$0xff] %v2389_v55  ;;  %v2399_v56 = vld [vmem:[#allocation4] sm:$0x3f] }
 0x684   : > { %v2420_v58 = vld [vmem:[#allocation4] sm:$0x3f] }
 0x685   : > { %v2439_v60 = vld [vmem:[#allocation4] sm:$0x3f] }
 0x686   : > { %v2459_v8 = vld [vmem:[#allocation4] sm:$0x3f] }
 0x687   : > { %v2478_v0 = vld [vmem:[#allocation4] sm:$0x3f] }
 0x688   : > { %v2498_v3 = vld [vmem:[#allocation4] sm:$0x3f] }
 0x689   : > { %v2517_v6 = vld [vmem:[#allocation4] sm:$0x3f] }
 0x68a   : > { %v2392_v24 = vld.sshfl [vmem:[#allocation1] sm:$0xff pattern:$0x75643120]  ;;  %v2393_v57 = vld.sshfl [vmem:[#allocation1 + $0x8] sm:$0xff pattern:$0x75643120] }
 0x68b   : > { %2402 = vst [vmem:[#allocation1 + $0x1] ss:$2 sm:$0xff] %v2399_v56  ;;  %v2537_v12 = vld [vmem:[#allocation4] sm:$0x3f] }
 0x68c   : > { %2396 = vst [vmem:[#allocation6] sm:$0x33] %v2392_v24 }
 0x68d   : > { %2398 = vst.msk [vmem:[#allocation6 + $0x8] sm:$0x3] %vm2397_vm9, %v2393_v57 }
 0x692   : > { %v2405_v25 = vld.sshfl [vmem:[#allocation1 + $0x8] sm:$0xff pattern:$0x75643120]  ;;  %v2403_v59 = vld.sshfl [vmem:[#allocation1] sm:$0xff pattern:$0x75643120] }
 0x693   : > { %2409 = vrot.lane.b32.xlu2 %v2405_v25, %s4432_s18  ;;  %2407 = vrot.lane.b32.xlu0 %v2403_v59, %s4432_s18  ;;  %2422 = vst [vmem:[#allocation1] ss:$2 sm:$0xff] %v2420_v58  ;;  %v2567_v58 = vld [vmem:[%s5295_s7] sm:$0xf]  ;;  %s4434_s18 = smov 112  }
 0x69a   : > { %v2423_v7 = vld.sshfl [vmem:[#allocation1] sm:$0xff pattern:$0x75643120]  ;;  %v2425_v62 = vld.sshfl [vmem:[#allocation1 + $0x8] sm:$0xff pattern:$0x75643120] }
 0x69b   : > { %2442 = vst [vmem:[#allocation1 + $0x1] ss:$2 sm:$0xff] %v2439_v60 }
 0x6a2   : > { %v2443_v9 = vld.sshfl [vmem:[#allocation1] sm:$0xff pattern:$0x75643120]  ;;  %v2445_v63 = vld.sshfl [vmem:[#allocation1 + $0x8] sm:$0xff pattern:$0x75643120] }
 0x6a3   : > { %2461 = vst [vmem:[#allocation1] ss:$2 sm:$0xff] %v2459_v8 }
 0x6aa   : > { %v2462_v1 = vld.sshfl [vmem:[#allocation1] sm:$0xff pattern:$0x75643120]  ;;  %v2464_v2 = vld.sshfl [vmem:[#allocation1 + $0x8] sm:$0xff pattern:$0x75643120] }
 0x6ab   : > { %2466 = vrot.lane.b32.xlu1 %v2462_v1, %s4429_s30  ;;  %2481 = vst [vmem:[#allocation1 + $0x1] ss:$2 sm:$0xff] %v2478_v0 }
 0x6b2   : > { %v2484_v4 = vld.sshfl [vmem:[#allocation1 + $0x8] sm:$0xff pattern:$0x75643120]  ;;  %v2482_v5 = vld.sshfl [vmem:[#allocation1] sm:$0xff pattern:$0x75643120] }
 0x6b3   : > { %2468 = vrot.lane.b32.xlu1 %v2464_v2, %s4429_s30  ;;  %2488 = vrot.lane.b32.xlu2 %v2484_v4, %s4426_s20  ;;  %2500 = vst [vmem:[#allocation1] ss:$2 sm:$0xff] %v2498_v3 }
 0x6ba   : > { %v2501_v10 = vld.sshfl [vmem:[#allocation1] sm:$0xff pattern:$0x75643120]  ;;  %v2503_v11 = vld.sshfl [vmem:[#allocation1 + $0x8] sm:$0xff pattern:$0x75643120] }
 0x6bb   : > { %2447 = vrot.lane.b32.xlu2 %v2443_v9, %s4431_s15  ;;  %2486 = vrot.lane.b32.xlu1 %v2482_v5, %s4426_s20  ;;  %2520 = vst [vmem:[#allocation1 + $0x1] ss:$2 sm:$0xff] %v2517_v6  ;;  %s4441_s20 = smov 76  }
 0x6bc   : > { %2505 = vrot.lane.b32.xlu0 %v2501_v10, %s4428_s27 }
 0x6c2   : > { %v2521_v13 = vld.sshfl [vmem:[#allocation1] sm:$0xff pattern:$0x75643120]  ;;  %v2523_v16 = vld.sshfl [vmem:[#allocation1 + $0x8] sm:$0xff pattern:$0x75643120] }
 0x6c3   : > { %2507 = vrot.lane.b32.xlu1 %v2503_v11, %s4428_s27  ;;  %2539 = vst [vmem:[#allocation1] ss:$2 sm:$0xff] %v2537_v12 }
 0x6c4   : > { %2429 = vrot.lane.b32.xlu0 %v2425_v62, %s4430_s14 }
 0x6ca   : > { %v2540_v19 = vld.sshfl [vmem:[#allocation1] sm:$0xff pattern:$0x75643120]  ;;  %v2542_v61 = vld.sshfl [vmem:[#allocation1 + $0x8] sm:$0xff pattern:$0x75643120] }
 0x6cb   : > { %2525 = vrot.lane.b32.xlu1 %v2521_v13, %s4427_s23 }
 0x6cc   : > { %2570 = vperm.xlu0 %4234, %v2567_v58  }
 0x6d3   : > { %2527 = vrot.lane.b32.xlu1 %v2523_v16, %s4427_s23  ;;  %s3262_s23 = sshll.u32 %s467_s8, 6 }
 0x6d4   : > { %s4968_s30 = scalar_lea.vmem [#allocation13], %s3262_s23  ;;  %s4443_s23 = smov 114  }
 0x6db   : > { %2544 = vrot.lane.b32.xlu1 %v2540_v19, %s4425_s19 }
 0x6e3   : > { %2546 = vrot.lane.b32.xlu1 %v2542_v61, %s4425_s19  ;;  %s4440_s19 = smov 40  }
 0x6eb   : > { %2427 = vrot.lane.b32.xlu1 %v2423_v7, %s4430_s14  ;;  %s4433_s14 = smov 20  }
 0x6ed   : > { %v2410_v20 = vpop.permute.xlu2 %2409 }
 0x6ee   : > { %2419 = vst.msk [vmem:[#allocation6 + $0x8] sm:$0xc] %vm2418_vm8, %v2410_v20  ;;  %v2412_v33 = vrot.slane %v2410_v20, 4 }
 0x6f3   : > { %2449 = vrot.lane.b32.xlu1 %v2445_v63, %s4431_s15 }
 0x705   : > { %v2408_v21 = vpop.permute.xlu0 %2407 }
 0x706   : > { %v2411_v34 = vrot.slane %v2408_v21, 4 }
 0x708   : > { %v2413_v35 = vsel %vm493_vm0, %v2411_v34, %v2412_v33 }
 0x709   : > { %v2414_v22 = vsel %vm1470_vm3, %v2408_v21, %v2413_v35  ;;  %vm2916_vm3 = vcmask 1042434  }
 0x70a   : > { %2417 = vst [vmem:[#allocation6] sm:$0xcc] %v2414_v22 }
 0x70d   : > { %v2489_v23 = vpop.permute.xlu2 %2488 }
 0x70e   : > { %2497 = vst.msk [vmem:[#allocation6 + $0x20] sm:$0xc] %vm2418_vm8, %v2489_v23  ;;  %v2491_v28 = vrot.slane %v2489_v23, 4 }
 0x711   : > { %v3931_v34 = vld [vmem:[#allocation6] sm:$0xf]  ;;  %v4128_v23 = vld [vmem:[#allocation6 + $0x4] sm:$0xf] }
 0x715   : > { %v2448_v63 = vpop.permute.xlu2 %2447 }
 0x716   : > { %v2451_v5 = vrot.slane %v2448_v63, 4 }
 0x71d   : > { %v2467_v26 = vpop.permute.xlu1 %2466 }
 0x71e   : > { %v2470_v32 = vrot.slane %v2467_v26, 4 }
 0x725   : > { %v2469_v29 = vpop.permute.xlu1 %2468 }
 0x726   : > { %v2471_v30 = vrot.slane %v2469_v29, 4  ;;  %2477 = vst.msk [vmem:[#allocation6 + $0x20] sm:$0x3] %vm2397_vm9, %v2469_v29 }
 0x728   : > { %v2472_v31 = vsel %vm493_vm0, %v2470_v32, %v2471_v30 }
 0x729   : > { %v2473_v41 = vsel %vm1521_vm14, %v2467_v26, %v2472_v31  ;;  %v2556_v31 = vld [vmem:[%s5294_s6] sm:$0x3] }
 0x72a   : > { %2476 = vst [vmem:[#allocation6 + $0x18] sm:$0x33] %v2473_v41 }
 0x72d   : > { %v2487_v38 = vpop.permute.xlu1 %2486 }
 0x72e   : > { %v2490_v36 = vrot.slane %v2487_v38, 4  ;;  %v2506_v39 = vpop.permute.xlu0 %2505 }
 0x72f   : > { %v2509_v43 = vrot.slane %v2506_v39, 4 }
 0x730   : > { %v2492_v40 = vsel %vm493_vm0, %v2490_v36, %v2491_v28 }
 0x731   : > { %v2493_v37 = vsel %vm1538_vm11, %v2487_v38, %v2492_v40  ;;  %v3951_v38 = vld [vmem:[#allocation6 + $0x20] sm:$0xf] }
 0x732   : > { %2496 = vst [vmem:[#allocation6 + $0x18] sm:$0xcc] %v2493_v37 }
 0x735   : > { %v2508_v42 = vpop.permute.xlu1 %2507 }
 0x736   : > { %v2510_v44 = vrot.slane %v2508_v42, 4  ;;  %2516 = vst.msk [vmem:[#allocation6 + $0x2c] sm:$0x3] %vm2397_vm9, %v2508_v42  ;;  %v2430_v45 = vpop.permute.xlu0 %2429 }
 0x737   : > { %2438 = vst.msk [vmem:[#allocation6 + $0x14] sm:$0x3] %vm2397_vm9, %v2430_v45  ;;  %v2432_v25 = vrot.slane %v2430_v45, 4 }
 0x738   : > { %v2511_v14 = vsel %vm493_vm0, %v2509_v43, %v2510_v44 }
 0x739   : > { %v2512_v46 = vsel %vm1555_vm12, %v2506_v39, %v2511_v14  ;;  %v3943_v13 = vld [vmem:[#allocation6 + $0x18] sm:$0xf]  ;;  %v4131_v16 = vld [vmem:[#allocation6 + $0x1c] sm:$0xf]  ;;  %v3939_v39 = vld [vmem:[#allocation6 + $0x8] sm:$0xf] }
 0x73a   : > { %2515 = vst [vmem:[#allocation6 + $0x24] sm:$0x33] %v2512_v46 }
 0x73d   : > { %v2526_v47 = vpop.permute.xlu1 %2525 }
 0x73e   : > { %v2529_v49 = vrot.slane %v2526_v47, 4  ;;  %v2571_v43 = vpop.permute.xlu0 %2570 }
 0x745   : > { %v2528_v48 = vpop.permute.xlu1 %2527 }
 0x746   : > { %v2530_v50 = vrot.slane %v2528_v48, 4  ;;  %2536 = vst.msk [vmem:[#allocation6 + $0x2c] sm:$0xc] %vm2418_vm8, %v2528_v48 }
 0x748   : > { %v2531_v51 = vsel %vm493_vm0, %v2529_v49, %v2530_v50 }
 0x749   : > { %v2532_v52 = vsel %vm1572_vm13, %v2526_v47, %v2531_v51 }
 0x74a   : > { %2535 = vst [vmem:[#allocation6 + $0x24] sm:$0xcc] %v2532_v52 }
 0x74d   : > { %v2545_v53 = vpop.permute.xlu1 %2544  ;;  %v4133_v41 = vld [vmem:[#allocation6 + $0x28] sm:$0xf0] }
 0x74e   : > { %v2548_v54 = vrot.slane %v2545_v53, 4  ;;  %v3952_v28 = vor.u32 %v4133_v41, %v3951_v38 }
 0x751   : > { %v4132_v3 = vld [vmem:[#allocation6 + $0x20] sm:$0xf0]  ;;  %v3945_v4 = vld [vmem:[#allocation6 + $0x24] sm:$0xf0] }
 0x752   : > { %v3944_v61 = vor.u32 %v4132_v3, %v3943_v13  ;;  %v3948_v20 = vor.u32 %v4131_v16, %v3945_v4 }
 0x755   : > { %v2547_v27 = vpop.permute.xlu1 %2546 }
 0x756   : > { %v2549_v55 = vrot.slane %v2547_v27, 4  ;;  %2555 = vst.msk [vmem:[#allocation6 + $0x38] sm:$0x3] %vm2397_vm9, %v2547_v27  ;;  %vm2613_vm9 = vcmask 293888  }
 0x758   : > { %v2550_v56 = vsel %vm493_vm0, %v2548_v54, %v2549_v55 }
 0x759   : > { %v2551_v24 = vsel %vm1589_vm10, %v2545_v53, %v2550_v56  ;;  %vm5322_vm10 = vcmask 257024  }
 0x75a   : > { %2554 = vst [vmem:[#allocation6 + $0x30] sm:$0x33] %v2551_v24  ;;  %vm5323_vm11 = vmmov %vm5322_vm10 }
 0x75d   : > { %v2428_v57 = vpop.permute.xlu1 %2427  ;;  %v2566_v21 = vld [vmem:[#allocation6 + $0x38] sm:$0x3] }
 0x75e   : > { %v2431_v59 = vrot.slane %v2428_v57, 4  ;;  %v2597_v33 = vunpack.c.l.b16 %v2566_v21 }
 0x760   : > { %v2433_v60 = vsel %vm493_vm0, %v2431_v59, %v2432_v25  ;;  %v2606_v35 = vpack.c.b16 %v2597_v33, %v2597_v33 }
 0x761   : > { %v2434_v7 = vsel %vm1487_vm15, %v2428_v57, %v2433_v60  ;;  %v2565_v62 = vld [vmem:[#allocation6 + $0x30] sm:$0x33]  ;;  %vm2911_vm15 = vcmask 1040384  }
 0x762   : > { %2437 = vst [vmem:[#allocation6 + $0xc] sm:$0x33] %v2434_v7  ;;  %v2595_v8 = vunpack.c.l.b16 %v2565_v62  ;;  %v2596_v9 = vunpack.c.h.b16 %v2565_v62  ;;  %v2624_v30 = vsel %vm2374_vm2, %v2606_v35, 0 }
 0x764   : > { %v2604_v0 = vpack.c.b16 %v2595_v8, %v2595_v8  ;;  %v2605_v1 = vpack.c.b16 %v2596_v9, %v2596_v9 }
 0x765   : > { %v2450_v2 = vpop.permute.xlu1 %2449 }
 0x766   : > { %v2452_v6 = vrot.slane %v2450_v2, 4  ;;  %2458 = vst.msk [vmem:[#allocation6 + $0x14] sm:$0xc] %vm2418_vm8, %v2450_v2  ;;  %v2618_v10 = vsel %vm2374_vm2, %v2604_v0, 0  ;;  %v2621_v11 = vsel %vm2374_vm2, %v2605_v1, 0  ;;  %vm2919_vm2 = vcmask 1043459  }
 0x767   : > { %2631 = vmatpush.bf16.msrb.mxu0 %v2618_v10  ;;  %2644 = vmatpush.bf16.msra.mxu3 %v2621_v11 }
 0x768   : > { %v2453_v12 = vsel %vm493_vm0, %v2451_v5, %v2452_v6 }
 0x769   : > { %v2454_v19 = vsel %vm1504_vm1, %v2448_v63, %v2453_v12  ;;  %vm2913_vm1 = vcmask 1041409  }
 0x76a   : > { %2457 = vst [vmem:[#allocation6 + $0xc] sm:$0xcc] %v2454_v19 }
 0x76b   : > { %2632 = vmatpush.bf16.msrb.mxu0 %v3944_v61  ;;  %2645 = vmatpush.bf16.msra.mxu3 %v3948_v20 }
 0x76d   : > { %v4130_v36 = vld [vmem:[#allocation6 + $0x10] sm:$0xf0] }
 0x76e   : > { %v3940_v40 = vor.u32 %v4130_v36, %v3939_v39 }
 0x771   : > { %v4129_v22 = vld [vmem:[#allocation6 + $0x8] sm:$0xf0]  ;;  %v3933_v26 = vld [vmem:[#allocation6 + $0xc] sm:$0xf0] }
 0x772   : > { %v3932_v29 = vor.u32 %v4129_v22, %v3931_v34  ;;  %v3936_v32 = vor.u32 %v4128_v23, %v3933_v26 }
 0x774   : > { %2633 = vmatpush.bf16.msrb.mxu0 %v3932_v29  ;;  %2646 = vmatpush.bf16.msra.mxu3 %v3936_v32 }
 0x777   : > { %3953 = vmatmul.msk.bf16.vlgmr.msrb.gmra.mxu0 %vm2613_vm9, %v2556_v31  ;;  %3954 = vmatmul.msk.bf16.vlgmr.msra.gmra.mxu3 %vm2613_vm9, %v2556_v31 }
 0x778   : > { %2657 = vmatpush.bf16.msra.mxu0 %v2624_v30 }
 0x77c   : > { %2658 = vmatpush.bf16.msra.mxu0 %v3952_v28 }
 0x780   : > { %2659 = vmatpush.bf16.msra.mxu0 %v3940_v40 }
 0x787   : > { %3955 = vmatmul.msk.bf16.vlgmr.msra.gmra.mxu0 %vm2613_vm9, %v2556_v31 }
 0x7f4   : > { %v2635_v37 = vpop.f32.mrf.mxu0 }
 0x7f5   : > { %v2636_v14 = vadd.f32 %v2635_v37, %v2571_v43 }
 0x7f7   : > { %v2665_v48 = vmul.f32 %v2636_v14, %v4763_v15 }
 0x7f9   : > { %v2668_v53 = vsel %vm493_vm0, %v2665_v48, 0.0 }
 0x7fa   : > { %v2648_v42 = vpop.f32.mrf.mxu3 }
 0x7fb   : > { %v2649_v45 = vadd.f32 %v2648_v42, %v2571_v43 }
 0x7fc   : > { %v2637_v44 = vpop.f32.mrf.mxu0 }
 0x7fd   : > { %v2666_v46 = vmul.f32 %v2649_v45, %v4767_v18 }
 0x7ff   : > { %v2669_v51 = vsel %vm493_vm0, %v2666_v46, 0.0 }
 0x800   : > { %v2670_v27 = vadd.f32 %v2669_v51, %v2668_v53 }
 0x802   : > { %v2650_v47 = vpop.f32.mrf.mxu3 }
 0x804   : > { %v2661_v49 = vpop.f32.mrf.mxu0 }
 0x805   : > { %v2662_v50 = vadd.f32 %v2661_v49, %v2571_v43 }
 0x807   : > { %v2667_v52 = vmul.f32 %v2662_v50, %v4765_v17 }
 0x809   : > { %v2671_v54 = vsel %vm5322_vm10, %v2667_v52, 0.0 }
 0x80a   : > { %v2672_v55 = vadd.f32 %v2671_v54, %v2670_v27 }
 0x80c   : > { %v2663_v56 = vpop.f32.mrf.mxu0  ;;  %2673 = vadd.xlane.f32.xlu2 %v2672_v55 }
 0x87f   : > { %v2674_v24 = vpop.xlane.xlu2 %2673 }
 0x880   : > { %v2675_v57 = vmul.f32 0.00390625, %v2674_v24 }
 0x882   : > { %v2676_v58 = vsub.f32 %v2636_v14, %v2675_v57  ;;  %v2677_v25 = vsub.f32 %v2649_v45, %v2675_v57  ;;  %v2678_v59 = vsub.f32 %v2662_v50, %v2675_v57 }
 0x884   : > { %v2679_v60 = vmul.f32 %v2676_v58, %v2676_v58  ;;  %v2680_v7 = vmul.f32 %v2677_v25, %v2677_v25  ;;  %v2681_v62 = vmul.f32 %v2678_v59, %v2678_v59 }
 0x886   : > { %v2682_v8 = vmul.f32 %v2679_v60, %v4763_v15  ;;  %v2683_v9 = vmul.f32 %v2680_v7, %v4767_v18  ;;  %v2684_v63 = vmul.f32 %v2681_v62, %v4765_v17 }
 0x888   : > { %v2685_v0 = vsel %vm493_vm0, %v2682_v8, 0.0  ;;  %v2686_v1 = vsel %vm493_vm0, %v2683_v9, 0.0  ;;  %v2688_v3 = vsel %vm5323_vm11, %v2684_v63, 0.0  ;;  %vm2804_vm0 = vcmask 122880  }
 0x889   : > { %v2687_v2 = vadd.f32 %v2686_v1, %v2685_v0 }
 0x88b   : > { %v2689_v4 = vadd.f32 %v2688_v3, %v2687_v2 }
 0x88d   : > { %2690 = vadd.xlane.f32.xlu1 %v2689_v4 }
 0x900   : > { %v2691_v5 = vpop.xlane.xlu1 %2690 }
 0x901   : > { %v2692_v6 = vmul.f32 0.00390625, %v2691_v5 }
 0x903   : > { %v2693_v10 = vadd.f32 1e-05, %v2692_v6 }
 0x905   : > { %4247 = vrsqrt.f32 %v2693_v10  ;;  %vm2700_vm13 = vweird.f32 %v2693_v10 }
 0x90b   : > { %v4248_v11 = vpop.eup %4247 }
 0x90c   : > { %v2695_v12 = vmul.f32 %v4248_v11, %v2693_v10  ;;  %vm2701_vm12 = vweird.f32 %v4248_v11 }
 0x90d   : > { %vm2702_vm14 = vmor %vm2700_vm13, %vm2701_vm12 }
 0x90e   : > { %v2696_v15 = vmul.f32 %v4248_v11, %v2695_v12 }
 0x910   : > { %v2697_v13 = vmul.f32 0.5, %v2696_v15 }
 0x912   : > { %v2698_v18 = vsub.f32 1.5, %v2697_v13 }
 0x914   : > { %v2699_v17 = vmul.f32 %v4248_v11, %v2698_v18 }
 0x916   : > { %v2703_v16 = vsel %vm2702_vm14, %v4248_v11, %v2699_v17 }
 0x917   : > { %v4934_v19 = vmul.f32 %v2703_v16, %v2676_v58  ;;  %v4936_v61 = vmul.f32 %v2703_v16, %v2677_v25  ;;  %v4938_v20 = vmul.f32 %v2703_v16, %v2678_v59 }
 0x919   : > { %v2707_v21 = vmul.f32 0.70710677, %v4934_v19  ;;  %v2708_v33 = vmul.f32 0.70710677, %v4936_v61  ;;  %v2709_v34 = vmul.f32 0.70710677, %v4938_v20 }
 0x91b   : > { %v4943_v35 = vclamps-f32 %v2707_v21, 3.832507  ;;  %v4945_v22 = vclamps-f32 %v2708_v33, 3.832507  ;;  %v4947_v23 = vclamps-f32 %v2709_v34, 3.832507 }
 0x91d   : > { %v2716_v26 = vmul.f32 %v4943_v35, %v4943_v35  ;;  %v2717_v29 = vmul.f32 %v4945_v22, %v4945_v22  ;;  %v2718_v32 = vmul.f32 %v4947_v23, %v4947_v23 }
 0x91f   : > { %v2719_v30 = vmul.f32 0.00022905065, %v2716_v26  ;;  %v2720_v31 = vmul.f32 0.00022905065, %v2717_v29  ;;  %v2721_v41 = vmul.f32 0.00022905065, %v2718_v32 }
 0x920   : > { %v2743_v38 = vmul.f32 -1.1791603e-07, %v2716_v26  ;;  %v2744_v28 = vmul.f32 -1.1791603e-07, %v2717_v29  ;;  %v2745_v36 = vmul.f32 -1.1791603e-07, %v2718_v32 }
 0x921   : > { %v2722_v39 = vadd.f32 0.003408291, %v2719_v30  ;;  %v2723_v40 = vadd.f32 0.003408291, %v2720_v31  ;;  %v2724_v44 = vadd.f32 0.003408291, %v2721_v41 }
 0x922   : > { %v2746_v37 = vadd.f32 2.3547966e-05, %v2743_v38  ;;  %v2747_v42 = vadd.f32 2.3547966e-05, %v2744_v28  ;;  %v2748_v43 = vadd.f32 2.3547966e-05, %v2745_v36 }
 0x923   : > { %v2725_v47 = vmul.f32 %v2722_v39, %v2716_v26  ;;  %v2726_v48 = vmul.f32 %v2723_v40, %v2717_v29  ;;  %v2727_v52 = vmul.f32 %v2724_v44, %v2718_v32  ;;  %v2788_v44 = vmul.f32 0.5, %v4934_v19 }
 0x924   : > { %v2749_v45 = vmul.f32 %v2746_v37, %v2716_v26  ;;  %v2750_v14 = vmul.f32 %v2747_v42, %v2717_v29  ;;  %v2751_v46 = vmul.f32 %v2748_v43, %v2718_v32 }
 0x925   : > { %v2728_v55 = vadd.f32 0.050955694, %v2725_v47  ;;  %v2729_v56 = vadd.f32 0.050955694, %v2726_v48  ;;  %v2730_v25 = vadd.f32 0.050955694, %v2727_v52 }
 0x926   : > { %v2752_v49 = vadd.f32 0.0010179626, %v2749_v45  ;;  %v2753_v50 = vadd.f32 0.0010179626, %v2750_v14  ;;  %v2754_v51 = vadd.f32 0.0010179626, %v2751_v46 }
 0x927   : > { %v2731_v62 = vmul.f32 %v2728_v55, %v2716_v26  ;;  %v2732_v8 = vmul.f32 %v2729_v56, %v2717_v29  ;;  %v2733_v1 = vmul.f32 %v2730_v25, %v2718_v32  ;;  %v2789_v14 = vmul.f32 0.5, %v4936_v61 }
 0x928   : > { %v2755_v53 = vmul.f32 %v2752_v49, %v2716_v26  ;;  %v2756_v27 = vmul.f32 %v2753_v50, %v2717_v29  ;;  %v2757_v54 = vmul.f32 %v2754_v51, %v2718_v32 }
 0x929   : > { %v2734_v5 = vadd.f32 0.18520832, %v2731_v62  ;;  %v2735_v6 = vadd.f32 0.18520832, %v2732_v8  ;;  %v2736_v15 = vadd.f32 0.18520832, %v2733_v1 }
 0x92a   : > { %v2758_v24 = vadd.f32 0.01407047, %v2755_v53  ;;  %v2759_v57 = vadd.f32 0.01407047, %v2756_v27  ;;  %v2760_v58 = vadd.f32 0.01407047, %v2757_v54 }
 0x92b   : > { %v2737_v16 = vmul.f32 %v2734_v5, %v2716_v26  ;;  %v2738_v21 = vmul.f32 %v2735_v6, %v2717_v29  ;;  %v2739_v31 = vmul.f32 %v2736_v15, %v2718_v32 }
 0x92c   : > { %v2761_v59 = vmul.f32 %v2758_v24, %v2716_v26  ;;  %v2762_v60 = vmul.f32 %v2759_v57, %v2717_v29  ;;  %v2763_v7 = vmul.f32 %v2760_v58, %v2718_v32 }
 0x92d   : > { %v2740_v41 = vadd.f32 1.1283791, %v2737_v16  ;;  %v2741_v38 = vadd.f32 1.1283791, %v2738_v21  ;;  %v2742_v28 = vadd.f32 1.1283791, %v2739_v31 }
 0x92e   : > { %v2764_v9 = vadd.f32 0.11098505, %v2761_v59  ;;  %v2765_v63 = vadd.f32 0.11098505, %v2762_v60  ;;  %v2766_v0 = vadd.f32 0.11098505, %v2763_v7 }
 0x92f   : > { %v2779_v36 = vmul.f32 %v4943_v35, %v2740_v41  ;;  %v2780_v40 = vmul.f32 %v4945_v22, %v2741_v38  ;;  %v2790_v35 = vmul.f32 0.5, %v4938_v20 }
 0x930   : > { %v2767_v2 = vmul.f32 %v2764_v9, %v2716_v26  ;;  %v2768_v3 = vmul.f32 %v2765_v63, %v2717_v29  ;;  %v2769_v4 = vmul.f32 %v2766_v0, %v2718_v32 }
 0x932   : > { %v2770_v10 = vadd.f32 0.49746925, %v2767_v2  ;;  %v2771_v11 = vadd.f32 0.49746925, %v2768_v3  ;;  %v2772_v12 = vadd.f32 0.49746925, %v2769_v4 }
 0x934   : > { %v2773_v13 = vmul.f32 %v2770_v10, %v2716_v26  ;;  %v2774_v18 = vmul.f32 %v2771_v11, %v2717_v29  ;;  %v2775_v17 = vmul.f32 %v2772_v12, %v2718_v32  ;;  %v2781_v26 = vmul.f32 %v4947_v23, %v2742_v28 }
 0x936   : > { %v2776_v33 = vadd.f32 1.0, %v2773_v13  ;;  %v2777_v34 = vadd.f32 1.0, %v2774_v18  ;;  %v2778_v30 = vadd.f32 1.0, %v2775_v17 }
 0x938   : > { %4249 = vrcp.f32 %v2776_v33 }
 0x939   : > { %4251 = vrcp.f32 %v2777_v34 }
 0x93a   : > { %4253 = vrcp.f32 %v2778_v30 }
 0x93e   : > { %v4250_v39 = vpop.eup %4249 }
 0x93f   : > { %v4252_v37 = vpop.eup %4251  ;;  %v2785_v29 = vmul.f32 %v4250_v39, %v2779_v36 }
 0x940   : > { %v4254_v42 = vpop.eup %4253  ;;  %v2786_v32 = vmul.f32 %v4252_v37, %v2780_v40 }
 0x941   : > { %v2787_v43 = vmul.f32 %v4254_v42, %v2781_v26  ;;  %v2791_v45 = vadd.f32 1.0, %v2785_v29 }
 0x942   : > { %v2792_v46 = vadd.f32 1.0, %v2786_v32 }
 0x943   : > { %v2793_v47 = vadd.f32 1.0, %v2787_v43  ;;  %v2794_v22 = vmul.f32 %v2791_v45, %v2788_v44 }
 0x944   : > { %v4964_v48 = vmul.f32 %v2792_v46, %v2789_v14 }
 0x945   : > { %v4966_v49 = vmul.f32 %v2793_v47, %v2790_v35  ;;  %2805 = vst.msk [vmem:[%s4968_s30] sm:$0x1] %vm2804_vm0, %v2794_v22  ;;  %v2809_v19 = vperm.slane %v2794_v22, 0  ;;  %v2798_v23 = vrot.slane %v2794_v22, 1  ;;  %v2800_v61 = vrot.slane %v2794_v22, 3 }
 0x946   : > { %v2799_v50 = vrot.slane %v2794_v22, 2  ;;  %v2910_v51 = vrot.slane %v4964_v48, 7  ;;  %v2962_v58 = vperm.slane %v4964_v48, 0  ;;  %v2959_v62 = vrot.slane %v4964_v48, 1 }
 0x947   : > { %2893 = vrot.lane.b32.xlu1 %v2809_v19, %s4433_s14  ;;  %2829 = vrot.lane.b32.xlu2 %v2809_v19, %s4428_s27  ;;  %2806 = vst.msk [vmem:[%s4968_s30 + $0x10] sm:$0x1] %vm2804_vm0, %v2798_v23  ;;  %v3063_v20 = vrot.slane %v4966_v49, 7  ;;  %v2810_v25 = vperm.slane %v2798_v23, 0  ;;  %v2812_v59 = vperm.slane %v2800_v61, 0  ;;  %v3111_v7 = vperm.slane %v4966_v49, 0 }
 0x948   : > { %2813 = vrot.lane.b32.xlu0 %v2809_v19, %s4431_s15  ;;  %2808 = vst.msk [vmem:[%s4968_s30 + $0x30] sm:$0x1] %vm2804_vm0, %v2800_v61  ;;  %v4995_v55 = vsel %vm2911_vm15, %v2794_v22, %v2910_v51  ;;  %v4997_v56 = vsel %vm2913_vm1, %v2794_v22, %v2910_v51  ;;  %v4999_v24 = vsel %vm2916_vm3, %v2794_v22, %v2910_v51  ;;  %v2811_v60 = vperm.slane %v2799_v50, 0 }
 0x949   : > { %2807 = vst.msk [vmem:[%s4968_s30 + $0x20] sm:$0x1] %vm2804_vm0, %v2799_v50  ;;  %v4984_v52 = vsel %vm2911_vm15, %v4964_v48, %v3063_v20  ;;  %v4987_v53 = vsel %vm2916_vm3, %v4964_v48, %v3063_v20  ;;  %v4990_v27 = vsel %vm2913_vm1, %v4964_v48, %v3063_v20  ;;  %v4993_v54 = vsel %vm2919_vm2, %v4964_v48, %v3063_v20 }
 0x94a   : > { %v5001_v57 = vsel %vm2919_vm2, %v2794_v22, %v2910_v51  ;;  %v2961_v8 = vrot.slane %v4964_v48, 3  ;;  %v5028_v9 = vperm.slane %v2959_v62, 0  ;;  %v2960_v0 = vrot.slane %v4964_v48, 2 }
 0x94b   : > { %v3072_v5 = vperm.slane %v4984_v52, 1  ;;  %v2915_v11 = vrot.slane %v4997_v56, 1  ;;  %v2922_v15 = vperm.slane %v4995_v55, 0  ;;  %v2918_v16 = vrot.slane %v4999_v24, 2 }
 0x94c   : > { %v5030_v63 = vperm.slane %v2961_v8, 0  ;;  %v5038_v1 = vperm.slane %v2960_v0, 0  ;;  %v2921_v41 = vrot.slane %v5001_v57, 3  ;;  %v3068_v38 = vrot.slane %v4987_v53, 2 }
 0x94d   : > { %v2924_v13 = vperm.slane %v2915_v11, 0  ;;  %v2925_v33 = vperm.slane %v2915_v11, 1  ;;  %v2927_v34 = vperm.slane %v2918_v16, 1  ;;  %v3066_v26 = vrot.slane %v4990_v27, 1 }
 0x94e   : > { %v2928_v36 = vperm.slane %v2921_v41, 0  ;;  %v3075_v39 = vperm.slane %v3068_v38, 0  ;;  %v3070_v29 = vrot.slane %v4993_v54, 3  ;;  %v3108_v14 = vrot.slane %v4966_v49, 1 }
 0x94f   : > { %2966 = vrot.lane.b32.xlu1 %v2962_v58, %s4434_s18  ;;  %2861 = vrot.lane.b32.xlu2 %v2809_v19, %s4435_s26  ;;  %v3073_v32 = vperm.slane %v3066_v26, 0  ;;  %v3076_v35 = vperm.slane %v3068_v38, 1  ;;  %v2923_v50 = vperm.slane %v4995_v55, 1  ;;  %v3071_v56 = vperm.slane %v4984_v52, 0 }
 0x950   : > { %2845 = vrot.lane.b32.xlu0 %v2809_v19, %s4436_s28  ;;  %v3078_v43 = vperm.slane %v3070_v29, 1  ;;  %v3112_v47 = vperm.slane %v3108_v14, 0  ;;  %v2929_v62 = vperm.slane %v2921_v41, 1 }
 0x957   : > { %3014 = vrot.lane.b32.xlu1 %v2962_v58, %s4437_s29  ;;  %2982 = vrot.lane.b32.xlu2 %v2962_v58, %s4438_s16 }
 0x958   : > { %2877 = vrot.lane.b32.xlu0 %v2809_v19, %s4439_s17  ;;  %v3109_v19 = vrot.slane %v4966_v49, 2 }
 0x95a   : > { %v3113_v61 = vperm.slane %v3109_v19, 0 }
 0x95f   : > { %3030 = vrot.lane.b32.xlu2 %v2962_v58, %s4440_s19  ;;  %2831 = vrot.lane.b32.xlu1 %v2810_v25, %s4428_s27 }
 0x960   : > { %2998 = vrot.lane.b32.xlu0 %v2962_v58, %s4441_s20 }
 0x967   : > { %2847 = vrot.lane.b32.xlu2 %v2810_v25, %s4436_s28  ;;  %2851 = vrot.lane.b32.xlu1 %v2812_v59, %s4436_s28 }
 0x968   : > { %3046 = vrot.lane.b32.xlu0 %v2962_v58, %s4442_s9 }
 0x96f   : > { %2867 = vrot.lane.b32.xlu2 %v2812_v59, %s4435_s26  ;;  %2865 = vrot.lane.b32.xlu1 %v2811_v60, %s4435_s26 }
 0x970   : > { %3115 = vrot.lane.b32.xlu0 %v3111_v7, %s4443_s23 }
 0x977   : > { %2881 = vrot.lane.b32.xlu2 %v2811_v60, %s4439_s17  ;;  %2879 = vrot.lane.b32.xlu1 %v2810_v25, %s4439_s17 }
 0x978   : > { %2815 = vrot.lane.b32.xlu0 %v2810_v25, %s4431_s15 }
 0x97f   : > { %2895 = vrot.lane.b32.xlu2 %v2810_v25, %s4433_s14  ;;  %2899 = vrot.lane.b32.xlu1 %v2812_v59, %s4433_s14 }
 0x980   : > { %2817 = vrot.lane.b32.xlu0 %v2811_v60, %s4431_s15 }
 0x987   : > { %2968 = vrot.lane.b32.xlu2 %v5028_v9, %s4434_s18  ;;  %2972 = vrot.lane.b32.xlu1 %v5030_v63, %s4434_s18 }
 0x988   : > { %2819 = vrot.lane.b32.xlu0 %v2812_v59, %s4431_s15  ;;  %s4445_s15 = smov 2  }
 0x98f   : > { %2988 = vrot.lane.b32.xlu2 %v5030_v63, %s4438_s16  ;;  %2986 = vrot.lane.b32.xlu1 %v5038_v1, %s4438_s16 }
 0x990   : > { %2833 = vrot.lane.b32.xlu0 %v2811_v60, %s4428_s27 }
 0x997   : > { %3002 = vrot.lane.b32.xlu2 %v5038_v1, %s4441_s20  ;;  %3000 = vrot.lane.b32.xlu1 %v5028_v9, %s4441_s20 }
 0x998   : > { %2835 = vrot.lane.b32.xlu0 %v2812_v59, %s4428_s27  ;;  %s4444_s27 = smov 4  }
 0x99f   : > { %3016 = vrot.lane.b32.xlu2 %v5028_v9, %s4437_s29  ;;  %3020 = vrot.lane.b32.xlu1 %v5030_v63, %s4437_s29 }
 0x9a0   : > { %2849 = vrot.lane.b32.xlu0 %v2811_v60, %s4436_s28 }
 0x9a1   : > { %v2830_v2 = vpop.permute.xlu2 %2829 }
 0x9a2   : > { %2841 = vst.msk [vmem:[%s4968_s30 + $0x2] sm:$0x1] %vm2804_vm0, %v2830_v2  ;;  %v3077_v2 = vperm.slane %v3070_v29, 0 }
 0x9a7   : > { %3036 = vrot.lane.b32.xlu2 %v5030_v63, %s4440_s19  ;;  %3034 = vrot.lane.b32.xlu1 %v5038_v1, %s4440_s19 }
 0x9a8   : > { %2863 = vrot.lane.b32.xlu0 %v2810_v25, %s4435_s26 }
 0x9a9   : > { %v2862_v3 = vpop.permute.xlu2 %2861 }
 0x9aa   : > { %2873 = vst.msk [vmem:[%s4968_s30 + $0x4] sm:$0x1] %vm2804_vm0, %v2862_v3 }
 0x9af   : > { %3050 = vrot.lane.b32.xlu2 %v5038_v1, %s4442_s9  ;;  %3048 = vrot.lane.b32.xlu1 %v5028_v9, %s4442_s9 }
 0x9b0   : > { %2883 = vrot.lane.b32.xlu0 %v2812_v59, %s4439_s17  ;;  %v2926_v59 = vperm.slane %v2918_v16, 0  ;;  %s3132_s17 = scalar_lea.sflag [#allocation9], %s467_s8 }
 0x9b1   : > { %v2983_v4 = vpop.permute.xlu2 %2982 }
 0x9b2   : > { %2994 = vst.msk [vmem:[%s4968_s30 + $0x9] sm:$0x1] %vm2804_vm0, %v2983_v4 }
 0x9b7   : > { %3052 = vrot.lane.b32.xlu2 %v5030_v63, %s4442_s9  ;;  %3081 = vrot.lane.b32.xlu1 %v3072_v5, %s4444_s27  ;;  %v3110_v5 = vrot.slane %v4966_v49, 3 }
 0x9b8   : > { %2897 = vrot.lane.b32.xlu0 %v2811_v60, %s4433_s14  ;;  %s4134_s14 = sshll.u32 %s4534_s25, 6 }
 0x9b9   : > { %v2894_v6 = vpop.permute.xlu1 %2893  ;;  %v3031_v10 = vpop.permute.xlu2 %3030  ;;  %s3143_s28 = scalar_lea.hbm %s5300_s12, %s4134_s14 }
 0x9ba   : > { %2905 = vst.msk [vmem:[%s4968_s30 + $0x6] sm:$0x1] %vm2804_vm0, %v2894_v6  ;;  %v2814_v12 = vpop.permute.xlu0 %2813  ;;  %v3114_v6 = vperm.slane %v3110_v5, 0 }
 0x9bb   : > { %3042 = vst.msk [vmem:[%s4968_s30 + $0xc] sm:$0x1] %vm2804_vm0, %v3031_v10 }
 0x9bc   : > { %2825 = vst.msk [vmem:[%s4968_s30 + $0x1] sm:$0x1] %vm2804_vm0, %v2814_v12 }
 0x9bf   : > { %2930 = vrot.lane.b32.xlu2 %v2922_v15, %s4445_s15  ;;  %2934 = vrot.lane.b32.xlu1 %v2924_v13, %s4445_s15 }
 0x9c0   : > { %2970 = vrot.lane.b32.xlu0 %v5038_v1, %s4434_s18 }
 0x9c1   : > { %v2967_v18 = vpop.permute.xlu1 %2966  ;;  %v2848_v17 = vpop.permute.xlu2 %2847 }
 0x9c2   : > { %2978 = vst.msk [vmem:[%s4968_s30 + $0x8] sm:$0x1] %vm2804_vm0, %v2967_v18  ;;  %v2846_v21 = vpop.permute.xlu0 %2845 }
 0x9c3   : > { %2857 = vst.msk [vmem:[%s4968_s30 + $0x3] sm:$0x1] %vm2804_vm0, %v2846_v21 }
 0x9c4   : > { %2858 = vst.msk [vmem:[%s4968_s30 + $0x13] sm:$0x1] %vm2804_vm0, %v2848_v17 }
 0x9c7   : > { %2936 = vrot.lane.b32.xlu2 %v2925_v33, %s4445_s15  ;;  %2940 = vrot.lane.b32.xlu1 %v2927_v34, %s4445_s15 }
 0x9c8   : > { %2984 = vrot.lane.b32.xlu0 %v5028_v9, %s4438_s16  ;;  %s3146_s16 = sshll.u32 %s3143_s28, 4  ;;  %s3147_s16 = int_to_ptr.hbm [resolvable:$true] %s3146_s16 }
 0x9c9   : > { %v3015_v30 = vpop.permute.xlu1 %3014  ;;  %v2868_v31 = vpop.permute.xlu2 %2867  ;;  %s4359_s25 = sshra.s32 %s3147_s16, 4  ;;  %s4360_s25 = int_to_ptr.hbm [resolvable:$true] %s4359_s25 }
 0x9ca   : > { %3026 = vst.msk [vmem:[%s4968_s30 + $0xb] sm:$0x1] %vm2804_vm0, %v3015_v30  ;;  %v2878_v28 = vpop.permute.xlu0 %2877  ;;  %p4366_p3 = scmp.lt.s32.totalorder %s4360_s25, %s5300_s12 }
 0x9cb   : > { %2889 = vst.msk [vmem:[%s4968_s30 + $0x5] sm:$0x1] %vm2804_vm0, %v2878_v28 }
 0x9cc   : > { %2876 = vst.msk [vmem:[%s4968_s30 + $0x34] sm:$0x1] %vm2804_vm0, %v2868_v31 }
 0x9cf   : > { %2942 = vrot.lane.b32.xlu2 %v2928_v36, %s4445_s15  ;;  %3087 = vrot.lane.b32.xlu1 %v3075_v39, %s4444_s27 }
 0x9d0   : > { %3004 = vrot.lane.b32.xlu0 %v5030_v63, %s4441_s20  ;;  %v3074_v63 = vperm.slane %v3066_v26, 1 }
 0x9d1   : > { %v2882_v40 = vpop.permute.xlu2 %2881  ;;  %v2832_v37 = vpop.permute.xlu1 %2831 }
 0x9d2   : > { %v2999_v42 = vpop.permute.xlu0 %2998  ;;  %2891 = vst.msk [vmem:[%s4968_s30 + $0x25] sm:$0x1] %vm2804_vm0, %v2882_v40 }
 0x9d3   : > { %3010 = vst.msk [vmem:[%s4968_s30 + $0xa] sm:$0x1] %vm2804_vm0, %v2999_v42 }
 0x9d4   : > { %2842 = vst.msk [vmem:[%s4968_s30 + $0x12] sm:$0x1] %vm2804_vm0, %v2832_v37 }
 0x9d7   : > { %3083 = vrot.lane.b32.xlu2 %v3073_v32, %s4444_s27  ;;  %3093 = vrot.lane.b32.xlu1 %v3078_v43, %s4444_s27 }
 0x9d8   : > { %3018 = vrot.lane.b32.xlu0 %v5038_v1, %s4437_s29  ;;  %s3144_s29 = sshll.u32 %s4968_s30, 4  ;;  %s3145_s29 = int_to_ptr.vmem [resolvable:$true] %s3144_s29 }
 0x9d9   : > { %v2896_v44 = vpop.permute.xlu2 %2895  ;;  %v2852_v45 = vpop.permute.xlu1 %2851 }
 0x9da   : > { %v3047_v46 = vpop.permute.xlu0 %3046  ;;  %2906 = vst.msk [vmem:[%s4968_s30 + $0x16] sm:$0x1] %vm2804_vm0, %v2896_v44 }
 0x9db   : > { %3058 = vst.msk [vmem:[%s4968_s30 + $0xd] sm:$0x1] %vm2804_vm0, %v3047_v46 }
 0x9dc   : > { %2860 = vst.msk [vmem:[%s4968_s30 + $0x33] sm:$0x1] %vm2804_vm0, %v2852_v45 }
 0x9df   : > { %3089 = vrot.lane.b32.xlu2 %v3076_v35, %s4444_s27  ;;  %3117 = vrot.lane.b32.xlu1 %v3112_v47, %s4443_s23 }
 0x9e0   : > { %3032 = vrot.lane.b32.xlu0 %v5028_v9, %s4440_s19  ;;  %s4361_s19 = scalar_lea.hbm %s4360_s25, 64 }
 0x9e1   : > { %v2969_v22 = vpop.permute.xlu2 %2968  ;;  %v2866_v48 = vpop.permute.xlu1 %2865  ;;  %p4362_p0 = scmp.ne.s32.totalorder %s4360_s25, %s4361_s19 }
 0x9e2   : > { %v3116_v23 = vpop.permute.xlu0 %3115  ;;  %2979 = vst.msk [vmem:[%s4968_s30 + $0x18] sm:$0x1] %vm2804_vm0, %v2969_v22 }
 0x9e3   : > { %3127 = vst.msk [vmem:[%s4968_s30 + $0xf] sm:$0x1] %vm2804_vm0, %v3116_v23  ;;  %p4363_p1 = pnand %p4362_p0, %p4551_p5 }
 0x9e4   : > { %2875 = vst.msk [vmem:[%s4968_s30 + $0x24] sm:$0x1] %vm2804_vm0, %v2866_v48 }
 0x9e5   : > { %p4364_p2 = pneg %p4363_p1 }
 0x9e7   : > { %3119 = vrot.lane.b32.xlu2 %v3113_v61, %s4443_s23 }
 0x9e8   : > { %2932 = vrot.lane.b32.xlu0 %v2923_v50, %s4445_s15 }
 0x9e9   : > { %v2989_v20 = vpop.permute.xlu2 %2988  ;;  %v2880_v51 = vpop.permute.xlu1 %2879 }
 0x9ea   : > { %2997 = vst.msk [vmem:[%s4968_s30 + $0x39] sm:$0x1] %vm2804_vm0, %v2989_v20  ;;  %v2816_v53 = vpop.permute.xlu0 %2815 }
 0x9eb   : > { %2890 = vst.msk [vmem:[%s4968_s30 + $0x15] sm:$0x1] %vm2804_vm0, %v2880_v51 }
 0x9ec   : > { %2826 = vst.msk [vmem:[%s4968_s30 + $0x11] sm:$0x1] %vm2804_vm0, %v2816_v53 }
 0x9f0   : > { %3079 = vrot.lane.b32.xlu0 %v3071_v56, %s4444_s27 }
 0x9f1   : > { %v3003_v55 = vpop.permute.xlu2 %3002  ;;  %v2900_v58 = vpop.permute.xlu1 %2899 }
 0x9f2   : > { %3012 = vst.msk [vmem:[%s4968_s30 + $0x2a] sm:$0x1] %vm2804_vm0, %v3003_v55  ;;  %v2818_v25 = vpop.permute.xlu0 %2817 }
 0x9f3   : > { %2908 = vst.msk [vmem:[%s4968_s30 + $0x36] sm:$0x1] %vm2804_vm0, %v2900_v58 }
 0x9f4   : > { %2827 = vst.msk [vmem:[%s4968_s30 + $0x21] sm:$0x1] %vm2804_vm0, %v2818_v25 }
 0x9f8   : > { %2938 = vrot.lane.b32.xlu0 %v2926_v59, %s4445_s15 }
 0x9f9   : > { %v3017_v52 = vpop.permute.xlu2 %3016  ;;  %v2973_v60 = vpop.permute.xlu1 %2972 }
 0x9fa   : > { %3027 = vst.msk [vmem:[%s4968_s30 + $0x1b] sm:$0x1] %vm2804_vm0, %v3017_v52  ;;  %v2820_v7 = vpop.permute.xlu0 %2819 }
 0x9fb   : > { %2981 = vst.msk [vmem:[%s4968_s30 + $0x38] sm:$0x1] %vm2804_vm0, %v2973_v60 }
 0x9fc   : > { %2828 = vst.msk [vmem:[%s4968_s30 + $0x31] sm:$0x1] %vm2804_vm0, %v2820_v7 }
 0xa00   : > { %2944 = vrot.lane.b32.xlu0 %v2929_v62, %s4445_s15 }
 0xa01   : > { %v3037_v24 = vpop.permute.xlu2 %3036  ;;  %v2987_v8 = vpop.permute.xlu1 %2986 }
 0xa02   : > { %3045 = vst.msk [vmem:[%s4968_s30 + $0x3c] sm:$0x1] %vm2804_vm0, %v3037_v24  ;;  %v2834_v9 = vpop.permute.xlu0 %2833 }
 0xa03   : > { %2996 = vst.msk [vmem:[%s4968_s30 + $0x29] sm:$0x1] %vm2804_vm0, %v2987_v8 }
 0xa04   : > { %2843 = vst.msk [vmem:[%s4968_s30 + $0x22] sm:$0x1] %vm2804_vm0, %v2834_v9 }
 0xa08   : > { %3085 = vrot.lane.b32.xlu0 %v3074_v63, %s4444_s27 }
 0xa09   : > { %v3051_v57 = vpop.permute.xlu2 %3050  ;;  %v3001_v0 = vpop.permute.xlu1 %3000 }
 0xa0a   : > { %3060 = vst.msk [vmem:[%s4968_s30 + $0x2d] sm:$0x1] %vm2804_vm0, %v3051_v57  ;;  %v2836_v1 = vpop.permute.xlu0 %2835 }
 0xa0b   : > { %3011 = vst.msk [vmem:[%s4968_s30 + $0x1a] sm:$0x1] %vm2804_vm0, %v3001_v0 }
 0xa0c   : > { %2844 = vst.msk [vmem:[%s4968_s30 + $0x32] sm:$0x1] %vm2804_vm0, %v2836_v1 }
 0xa10   : > { %3091 = vrot.lane.b32.xlu0 %v3077_v2, %s4444_s27 }
 0xa11   : > { %v3053_v27 = vpop.permute.xlu2 %3052  ;;  %v3021_v3 = vpop.permute.xlu1 %3020 }
 0xa12   : > { %3061 = vst.msk [vmem:[%s4968_s30 + $0x3d] sm:$0x1] %vm2804_vm0, %v3053_v27  ;;  %v2850_v4 = vpop.permute.xlu0 %2849 }
 0xa13   : > { %3029 = vst.msk [vmem:[%s4968_s30 + $0x3b] sm:$0x1] %vm2804_vm0, %v3021_v3 }
 0xa14   : > { %2859 = vst.msk [vmem:[%s4968_s30 + $0x23] sm:$0x1] %vm2804_vm0, %v2850_v4 }
 0xa18   : > { %3121 = vrot.lane.b32.xlu0 %v3114_v6, %s4443_s23  ;;  %s4365_s23 = scalar_lea.hbm %s5300_s12, 128 }
 0xa19   : > { %v2931_v54 = vpop.permute.xlu2 %2930  ;;  %v3035_v10 = vpop.permute.xlu1 %3034  ;;  %p4367_p4 = scmp.lt.s32.totalorder %s4365_s23, %s4361_s19 }
 0xa1a   : > { %3044 = vst.msk [vmem:[%s4968_s30 + $0x2c] sm:$0x1] %vm2804_vm0, %v3035_v10  ;;  %v2864_v11 = vpop.permute.xlu0 %2863 }
 0xa1b   : > { %2874 = vst.msk [vmem:[%s4968_s30 + $0x14] sm:$0x1] %vm2804_vm0, %v2864_v11  ;;  %p4368_p7 = por %p4367_p4, %p4366_p3 }
 0xa1d   : > { %p4369_p8 = pnand %p4368_p7, %p4364_p2 }
 0xa21   : > { %v2937_v12 = vpop.permute.xlu2 %2936  ;;  %v3049_v15 = vpop.permute.xlu1 %3048 }
 0xa22   : > { %3059 = vst.msk [vmem:[%s4968_s30 + $0x1d] sm:$0x1] %vm2804_vm0, %v3049_v15  ;;  %v2884_v49 = vpop.permute.xlu0 %2883 }
 0xa23   : > { %2892 = vst.msk [vmem:[%s4968_s30 + $0x35] sm:$0x1] %vm2804_vm0, %v2884_v49 }
 0xa29   : > { %v2943_v13 = vpop.permute.xlu2 %2942  ;;  %v3082_v18 = vpop.permute.xlu1 %3081 }
 0xa2a   : > { %v2898_v17 = vpop.permute.xlu0 %2897 }
 0xa2b   : > { %2907 = vst.msk [vmem:[%s4968_s30 + $0x26] sm:$0x1] %vm2804_vm0, %v2898_v17 }
 0xa31   : > { %v3084_v16 = vpop.permute.xlu2 %3083  ;;  %v2935_v21 = vpop.permute.xlu1 %2934 }
 0xa32   : > { %v2948_v33 = vsel %vm2946_vm4, %v2935_v21, %v2937_v12  ;;  %v2971_v34 = vpop.permute.xlu0 %2970 }
 0xa33   : > { %2956 = vst.msk [vmem:[%s4968_s30 + $0x17] sm:$0x1] %vm2804_vm0, %v2948_v33 }
 0xa34   : > { %2980 = vst.msk [vmem:[%s4968_s30 + $0x28] sm:$0x1] %vm2804_vm0, %v2971_v34 }
 0xa39   : > { %v3090_v30 = vpop.permute.xlu2 %3089  ;;  %v2941_v31 = vpop.permute.xlu1 %2940 }
 0xa3a   : > { %v2985_v41 = vpop.permute.xlu0 %2984 }
 0xa3b   : > { %2995 = vst.msk [vmem:[%s4968_s30 + $0x19] sm:$0x1] %vm2804_vm0, %v2985_v41 }
 0xa41   : > { %v3120_v38 = vpop.permute.xlu2 %3119  ;;  %v3088_v28 = vpop.permute.xlu1 %3087 }
 0xa42   : > { %3129 = vst.msk [vmem:[%s4968_s30 + $0x2f] sm:$0x1] %vm2804_vm0, %v3120_v38  ;;  %v3098_v36 = vsel %vm3095_vm5, %v3088_v28, %v3090_v30  ;;  %v3005_v39 = vpop.permute.xlu0 %3004 }
 0xa43   : > { %3106 = vst.msk [vmem:[%s4968_s30 + $0x2e] sm:$0x1] %vm2804_vm0, %v3098_v36 }
 0xa44   : > { %3013 = vst.msk [vmem:[%s4968_s30 + $0x3a] sm:$0x1] %vm2804_vm0, %v3005_v39 }
 0xa49   : > { %v3094_v40 = vpop.permute.xlu1 %3093 }
 0xa4a   : > { %v3019_v37 = vpop.permute.xlu0 %3018 }
 0xa4b   : > { %3028 = vst.msk [vmem:[%s4968_s30 + $0x2b] sm:$0x1] %vm2804_vm0, %v3019_v37 }
 0xa51   : > { %v3118_v26 = vpop.permute.xlu1 %3117 }
 0xa52   : > { %3128 = vst.msk [vmem:[%s4968_s30 + $0x1f] sm:$0x1] %vm2804_vm0, %v3118_v26  ;;  %v3033_v29 = vpop.permute.xlu0 %3032 }
 0xa53   : > { %3043 = vst.msk [vmem:[%s4968_s30 + $0x1c] sm:$0x1] %vm2804_vm0, %v3033_v29 }
 0xa5a   : > { %v2933_v42 = vpop.permute.xlu0 %2932 }
 0xa5b   : > { %v2947_v32 = vsel %vm2946_vm4, %v2931_v54, %v2933_v42 }
 0xa5c   : > { %2955 = vst.msk [vmem:[%s4968_s30 + $0x7] sm:$0x1] %vm2804_vm0, %v2947_v32 }
 0xa62   : > { %v3080_v43 = vpop.permute.xlu0 %3079 }
 0xa63   : > { %v3096_v44 = vsel %vm3095_vm5, %v3080_v43, %v3082_v18 }
 0xa64   : > { %3104 = vst.msk [vmem:[%s4968_s30 + $0xe] sm:$0x1] %vm2804_vm0, %v3096_v44 }
 0xa6a   : > { %v2939_v45 = vpop.permute.xlu0 %2938 }
 0xa6b   : > { %v2949_v14 = vsel %vm2946_vm4, %v2939_v45, %v2941_v31 }
 0xa6c   : > { %2957 = vst.msk [vmem:[%s4968_s30 + $0x27] sm:$0x1] %vm2804_vm0, %v2949_v14 }
 0xa72   : > { %v2945_v46 = vpop.permute.xlu0 %2944 }
 0xa73   : > { %v2950_v35 = vsel %vm2946_vm4, %v2943_v13, %v2945_v46 }
 0xa74   : > { %2958 = vst.msk [vmem:[%s4968_s30 + $0x37] sm:$0x1] %vm2804_vm0, %v2950_v35 }
 0xa7a   : > { %v3086_v47 = vpop.permute.xlu0 %3085 }
 0xa7b   : > { %v3097_v22 = vsel %vm3095_vm5, %v3084_v16, %v3086_v47 }
 0xa7c   : > { %3105 = vst.msk [vmem:[%s4968_s30 + $0x1e] sm:$0x1] %vm2804_vm0, %v3097_v22 }
 0xa82   : > { %v3092_v48 = vpop.permute.xlu0 %3091 }
 0xa83   : > { %v3099_v19 = vsel %vm3095_vm5, %v3092_v48, %v3094_v40 }
 0xa84   : > { %3107 = vst.msk [vmem:[%s4968_s30 + $0x3e] sm:$0x1] %vm2804_vm0, %v3099_v19 }
 0xa8a   : > { %v3122_v23 = vpop.permute.xlu0 %3121 }
 0xa8b   : > { %3130 = vst.msk [vmem:[%s4968_s30 + $0x3f] sm:$0x1] %vm2804_vm0, %v3122_v23 }
 0xa8c   : > { %4372 = shalt.err (!%p4369_p8)
}
 0xa8d   : > { %s4446_s8 = smov 128   ;;  %s4447_s30 = smov 8  }
 0xa8e   : > { %4147 = dma.vmem_to_hbm [thread:$0]  (%p4551_p5), %s3145_s29, 1024, %s3147_s16, %s3132_s17, %s4446_s8, %s4446_s8, %s4447_s30  }
 0xa8f PF: > { %p4169_p9 = scmp.ge.s32.totalorder %s4415_s24, 2  ;;  %s3161_s18 = sand.u32 1, %s4403_s21  }
 0xa90   : > { %s3162_s26 = scalar_lea.sflag [#allocation9], %s3161_s18 }
 0xa91   : > { %p4160_p10 = pnand %p4169_p9, %p4555_p6 }
 0xa93   : > { %p4161_p11 = pneg %p4160_p10 }
 0xa95   : > { %4398 = dma.done.wait (%p4161_p11), %s3162_s26, 1024  }
 0xa96   : > { %4400 = vsyncadd (%p4161_p11), %s3162_s26, 4294966272  ;;  %s5325_s24 = sld [smem:[#allocation18_spill]]  ;;  %s5328_s21 = smov %s4407_s22 }
 0xa97   : > { %s5326_s28 = sld [smem:[#allocation17_spill]] }
 0xa98   : > { %s5327_s23 = sld [smem:[#allocation19_spill]] }
 0xa9c   : > { %p24_p12 = scmp.ge.s32.totalorder %s5325_s24, 4  }
 0xa9d   : > { %s5329_s22 = smov %s5326_s28 }
 0xa9e   :  { %26 = sbr.rel (!%p24_p12) target bundleno = 8 (0x8), region = 125 }
 0xaa3   :  { %3168 = vsyncpa [#allocation8], 1 }
 0xaa4   :  { %3170 = vsyncpa [#allocation8 + $0x1], 1 }
 0xaa5   :  { %3171 = vsyncpa [#allocation11], 1 }
 0xaa6   :  { %3172 = vsyncpa [#allocation9], 1 }
 0xaa7   :  { %3174 = vsyncpa [#allocation9 + $0x1], 1 }

</bundles_post_ra>
